<compile_context>
chip_gen: v6e
topology: v6e:2x2x1
jax: 0.10.0
libtpu: 0.0.40
codegen_flags: <defaults>
</compile_context>

<pallas_src>
import functools

import jax
import jax.numpy as jnp
from jax.experimental import pallas as pl
from jax.experimental.pallas import tpu as pltpu


_NEG_SLOPE = 0.2


def _leaky_relu(v, negative_slope=_NEG_SLOPE):
    # For 0 < slope < 1, max(v, slope*v) == leaky_relu(v): one mul + one max.
    return jnp.maximum(v, negative_slope * v)


def _round_up(n, m):
    return ((n + m - 1) // m) * m


# ----------------------------------------------------------------------------
# Kernel: 7 fused matmuls (after offline layer folding), tiled over the batch.
# ----------------------------------------------------------------------------
def mainflow_kernel(x_ref, wf_ref, bf_ref, wm_ref, bm_ref, wl_ref, bl_ref, o_ref):
    cdt = wm_ref.dtype  # matmul operand dtype (bf16 by default)

    # L0: (tile, data_dim) @ (data_dim, H); f32 accumulate; f32 bias+leaky_relu.
    out = _leaky_relu(
        jnp.dot(x_ref[...].astype(wf_ref.dtype), wf_ref[...],
                preferred_element_type=jnp.float32)
        + bf_ref[...]
    ).astype(cdt)  # keep the inter-layer (tile, H) spill in compute dtype

    # L1..L5: five folded (H, H) layers, each followed by leaky_relu.
    # Static Python loop -> fully unrolled; wm_ref[i]/bm_ref[i] are static
    # leading-axis reads of the packed (5, H, H) / (5, 1, H) weight blocks.
    for i in range(wm_ref.shape[0]):
        out = _leaky_relu(
            jnp.dot(out, wm_ref[i], preferred_element_type=jnp.float32)
            + bm_ref[i]
        ).astype(cdt)

    # L6: (tile, H) @ (H, out_pad) -> lane-dense (128-multiple) output, no act.
    e_hat = (
        jnp.dot(out, wl_ref[...], preferred_element_type=jnp.float32)
        + bl_ref[...]
    )
    # TODO(synk): `freeze` (in-place column zeroing) and `enforce_positivity`
    # are off by default in MainFlow.forward; not implemented in-kernel.
    o_ref[...] = e_hat.astype(o_ref.dtype)


# ----------------------------------------------------------------------------
# Offline (wrapper-side) folding of activation-free linear chains.
# ----------------------------------------------------------------------------
def _compose(w1, b1, w2, b2):
    # (x @ w1 + b1) @ w2 + b2 == x @ (w1 @ w2) + (b1 @ w2 + b2)
    return w1 @ w2, b1 @ w2 + b2


def fold_params(params, compute_dtype=jnp.bfloat16, lane=128):
    """Fold the 13-linear MainFlow chain into 7 linears; pack the 5 HxH mids;
    pad the last layer to a lane-dense (multiple-of-128) output."""
    ws = [(params[2 * i], params[2 * i + 1]) for i in range(len(params) // 2)]
    (aw1, ab1), (aw2, ab2), (aw3, ab3) = ws[0:3]
    (hw1, hb1), (hw2, hb2), (hw3, hb3), (hw4, hb4), (hw5, hb5) = ws[3:8]
    (bw1, bb1), (bw2, bb2), (bw3, bb3), (bw4, bb4), (bw5, bb5) = ws[8:13]

    # Folding is done in f32; only the final operands are cast to compute_dtype.
    f2w, f2b = _compose(aw3, ab3, hw1, hb1)                        # A.out ∘ h.l1
    f3w, f3b = _compose(*_compose(hw2, hb2, hw3, hb3), hw4, hb4)   # h hidden x3
    f4w, f4b = _compose(hw5, hb5, bw1, bb1)                        # h.out ∘ B.l1
    f5w, f5b = _compose(*_compose(bw2, bb2, bw3, bb3), bw4, bb4)   # B hidden x3

    out_dim = bw5.shape[1]
    out_pad = _round_up(out_dim, lane)
    wl = jnp.pad(bw5, ((0, 0), (0, out_pad - out_dim)))
    bl = jnp.pad(bb5, ((0, 0), (0, out_pad - out_dim)))

    # Weights cast to compute_dtype (bf16 MXU fast path); biases stay f32 —
    # the epilogue add / leaky_relu run in f32 on the VPU.
    w_first = aw1.astype(compute_dtype)
    b_first = ab1.astype(jnp.float32)
    w_mid = jnp.stack([aw2, f2w, f3w, f4w, f5w]).astype(compute_dtype)  # (5,H,H)
    b_mid = jnp.stack([ab2, f2b, f3b, f4b, f5b]).astype(jnp.float32)    # (5,1,H)
    w_last = wl.astype(compute_dtype)                                    # (H,out_pad)
    b_last = bl.astype(jnp.float32)                                      # (1,out_pad)
    return (w_first, b_first, w_mid, b_mid, w_last, b_last), out_dim


# ----------------------------------------------------------------------------
# Wrapper
# ----------------------------------------------------------------------------
def mainflow_forward(t, x, params, *, tile_n=2048, compute_dtype=jnp.bfloat16,
                     min_grid_steps=2):
    """Pallas-accelerated MainFlow.forward. `t` is ignored (as in PyTorch)."""
    del t  # unused in MainFlow.forward
    N, data_dim = x.shape

    # Cap the tile so default scoped VMEM (16 MiB on v5e) is never exceeded;
    # multiples of 16 for bf16 sublane packing.
    tile_n = min(int(tile_n), 2048)
    tile_n = _round_up(max(tile_n, 16), 16)

    folded, out_dim = fold_params(params, compute_dtype=compute_dtype)
    w_first, b_first, w_mid, b_mid, w_last, b_last = folded
    H = w_first.shape[1]
    out_pad = w_last.shape[1]

    # Ragged N: pad the batch in the wrapper (cheap copy), slice afterwards.
    # When everything fits in one tile, still split into >= min_grid_steps
    # grid steps so the "parallel" axis can shard across v7x's two TensorCores.
    if N <= tile_n:
        n_tiles = min_grid_steps if N > 16 * (min_grid_steps - 1) else 1
        tile = _round_up(pl.cdiv(max(N, 1), n_tiles), 16)
        n_pad = tile * n_tiles
    else:
        tile = tile_n
        n_pad = _round_up(N, tile)
    x_p = x if n_pad == N else jnp.pad(x, ((0, n_pad - N), (0, 0)))

    def x_map(i):
        return (i, 0)

    def _const_spec(shape, pipeline_mode):
        nd = len(shape)

        def idx(i):
            return (0,) * nd

        # Whole array resident every grid step (constant index_map).
        return pl.BlockSpec(shape, idx, pipeline_mode=pipeline_mode)

    # Advisory cost hint for the XLA scheduler around the custom call.
    flops = 2 * n_pad * (data_dim * H + w_mid.shape[0] * H * H + H * out_pad)
    param_bytes = sum(int(a.size) * a.dtype.itemsize for a in folded)
    bytes_accessed = (
        param_bytes
        + int(x_p.size) * x_p.dtype.itemsize
        + n_pad * out_pad * x.dtype.itemsize
    )
    cost = pl.CostEstimate(
        flops=int(flops), transcendentals=0, bytes_accessed=int(bytes_accessed)
    )

    def build_call(single_buffer_weights):
        # Weights never change across grid steps -> single-buffer them to free
        # VMEM headroom; fall back to default buffering if unsupported.
        pm = pl.Buffered(1) if single_buffer_weights else None
        in_specs = [
            pl.BlockSpec((tile, data_dim), x_map),
            _const_spec(w_first.shape, pm), _const_spec(b_first.shape, pm),
            _const_spec(w_mid.shape, pm), _const_spec(b_mid.shape, pm),
            _const_spec(w_last.shape, pm), _const_spec(b_last.shape, pm),
        ]
        out_specs = pl.BlockSpec((tile, out_pad), x_map)
        grid_spec = pltpu.PrefetchScalarGridSpec(
            num_scalar_prefetch=0,
            grid=(n_pad // tile,),
            in_specs=in_specs,
            out_specs=out_specs,
        )
        return pl.pallas_call(
            mainflow_kernel,
            out_shape=jax.ShapeDtypeStruct((n_pad, out_pad), x.dtype),
            grid_spec=grid_spec,
            compiler_params=pltpu.CompilerParams(
                dimension_semantics=("parallel",),  # batch tiles shard across TCs
            ),
            cost_estimate=cost,
        )

    args = (x_p, w_first, b_first, w_mid, b_mid, w_last, b_last)
    try:
        out_p = build_call(True)(*args)
    except Exception:  # pragma: no cover — Buffered(1) unsupported: default bufs
        out_p = build_call(False)(*args)

    return out_p[:N, :out_dim]


# ----------------------------------------------------------------------------
# Synthetic params + pure-JAX reference (unfolded, matches the PyTorch graph)
# ----------------------------------------------------------------------------
def _init_linear(key, fan_in, fan_out):
    """PyTorch nn.Linear default init, but with W stored as (in, out)."""
    kw, kb = jax.random.split(key)
    bound = 1.0 / jnp.sqrt(jnp.float32(fan_in))
    w = jax.random.uniform(kw, (fan_in, fan_out), jnp.float32, -bound, bound)
    b = jax.random.uniform(kb, (1, fan_out), jnp.float32, -bound, bound)
    return w, b


def make_params(key, data_dim, network_dim, hidden=256):
    """Params for A (1 hidden), h (3 hidden), B (3 hidden): 13 Linear layers."""
    layer_dims = (
        [(data_dim, hidden), (hidden, hidden), (hidden, network_dim)]          # A
        + [(network_dim, hidden)] + [(hidden, hidden)] * 3 + [(hidden, network_dim)]  # h
        + [(network_dim, hidden)] + [(hidden, hidden)] * 3 + [(hidden, data_dim)]     # B
    )
    keys = jax.random.split(key, len(layer_dims))
    params = []
    for k, (fi, fo) in zip(keys, layer_dims):
        w, b = _init_linear(k, fi, fo)
        params += [w, b]
    return params


def mainflow_reference(x, params):
    """Pure-JAX reference of the original (unfolded) 13-layer forward."""
    ws = [(params[2 * i], params[2 * i + 1]) for i in range(len(params) // 2)]
    f = functools.partial(jnp.where)
    lrelu = lambda v: jnp.where(v >= 0, v, _NEG_SLOPE * v)
    lin = lambda v, wb: v @ wb[0] + wb[1]
    # A
    out = lrelu(lin(x, ws[0]))
    out = lrelu(lin(out, ws[1]))
    x_low = lin(out, ws[2])
    # h
    out = lrelu(lin(x_low, ws[3]))
    out = lin(out, ws[4]); out = lin(out, ws[5]); out = lin(out, ws[6])
    out = lrelu(out)
    e_low = lin(out, ws[7])
    # B
    out = lrelu(lin(e_low, ws[8]))
    out = lin(out, ws[9]); out = lin(out, ws[10]); out = lin(out, ws[11])
    out = lrelu(out)
    return lin(out, ws[12])


if __name__ == "__main__":
    key = jax.random.PRNGKey(0)
    k_x, k_p = jax.random.split(key)

    # Small shapes consistent with the module (hidden=256 is baked into A).
    N, data_dim, network_dim, hidden = 203, 3, 3, 256  # ragged N
    x = jax.random.normal(k_x, (N, data_dim), jnp.float32)
    t = jnp.zeros((N, 1), jnp.float32)  # unused, matches MainFlow.forward sig
    params = make_params(k_p, data_dim, network_dim, hidden)

    ref = mainflow_reference(x, params)

    # f32 matmul operands: exact up to fp32 reassociation from offline folding.
    e32 = jax.block_until_ready(
        mainflow_forward(t, x, params, compute_dtype=jnp.float32)
    )
    assert e32.shape == (N, data_dim)
    assert jnp.allclose(e32, ref, atol=1e-4, rtol=1e-4), (
        float(jnp.max(jnp.abs(e32 - ref)))
    )

    # Default path: bf16 MXU operands + bf16 inter-layer spills, f32 accumulate.
    e16 = jax.block_until_ready(mainflow_forward(t, x, params))
    assert e16.shape == (N, data_dim)
    assert bool(jnp.all(jnp.isfinite(e16)))
    assert jnp.allclose(e16, ref, atol=5e-2, rtol=5e-2), (
        float(jnp.max(jnp.abs(e16 - ref)))
    )

    # Multi-tile path: ragged batch padded over several grid steps.
    e_mt = jax.block_until_ready(mainflow_forward(t, x, params, tile_n=64))
    assert e_mt.shape == (N, data_dim)
    assert jnp.allclose(e_mt, e16, atol=1e-3, rtol=1e-3), (
        float(jnp.max(jnp.abs(e_mt - e16)))
    )

    print("KERNEL_OK")
</pallas_src>

<mosaic_0001>
module attributes {stable_mosaic.version = 11 : i64} {
  func.func @mainflow_kernel(%arg0: i32, %arg1: memref<112x3xf32, #tpu.memory_space<vmem>>, %arg2: memref<3x256xf32, #tpu.memory_space<vmem>>, %arg3: memref<1x256xf32, #tpu.memory_space<vmem>>, %arg4: memref<5x256x256xf32, #tpu.memory_space<vmem>>, %arg5: memref<5x1x256xf32, #tpu.memory_space<vmem>>, %arg6: memref<256x128xf32, #tpu.memory_space<vmem>>, %arg7: memref<1x128xf32, #tpu.memory_space<vmem>>, %arg8: memref<112x128xf32, #tpu.memory_space<vmem>>) attributes {dimension_semantics = [#tpu.dimension_semantics<parallel>], iteration_bounds = array<i64: 2>, scalar_prefetch = 0 : i64, scratch_operands = 0 : i64, tpu.core_type = #tpu.core_type<tc>, window_params = [{transform_indices = @transform_0, window_bounds = array<i64: 112, 3>}, {pipeline_mode = #tpu.pipeline_mode<synchronous>, transform_indices = @transform_1, window_bounds = array<i64: 3, 256>}, {pipeline_mode = #tpu.pipeline_mode<synchronous>, transform_indices = @transform_2, window_bounds = array<i64: 1, 256>}, {pipeline_mode = #tpu.pipeline_mode<synchronous>, transform_indices = @transform_3, window_bounds = array<i64: 5, 256, 256>}, {pipeline_mode = #tpu.pipeline_mode<synchronous>, transform_indices = @transform_4, window_bounds = array<i64: 5, 1, 256>}, {pipeline_mode = #tpu.pipeline_mode<synchronous>, transform_indices = @transform_5, window_bounds = array<i64: 256, 128>}, {pipeline_mode = #tpu.pipeline_mode<synchronous>, transform_indices = @transform_6, window_bounds = array<i64: 1, 128>}, {transform_indices = @transform_7, window_bounds = array<i64: 112, 128>}]} {
    %c0 = arith.constant 0 : index
    %c0_0 = arith.constant 0 : index
    %0 = vector.load %arg1[%c0, %c0_0] : memref<112x3xf32, #tpu.memory_space<vmem>>, vector<112x3xf32>
    %c0_1 = arith.constant 0 : index
    %c0_2 = arith.constant 0 : index
    %1 = vector.load %arg2[%c0_1, %c0_2] : memref<3x256xf32, #tpu.memory_space<vmem>>, vector<3x256xf32>
    %cst = arith.constant dense<0.000000e+00> : vector<112x256xf32>
    %2 = tpu.matmul %0, %1, %cst {dimension_numbers = #tpu.dot_dimension_numbers<[1], [0], [0], [1], [0, 0, 1, 1], [], []>} : vector<112x3xf32>, vector<3x256xf32>, vector<112x256xf32> -> vector<112x256xf32>
    %c0_3 = arith.constant 0 : index
    %c0_4 = arith.constant 0 : index
    %3 = vector.load %arg3[%c0_3, %c0_4] : memref<1x256xf32, #tpu.memory_space<vmem>>, vector<1x256xf32>
    %4 = vector.broadcast %3 : vector<1x256xf32> to vector<112x256xf32>
    %5 = arith.addf %2, %4 : vector<112x256xf32>
    %cst_5 = arith.constant 2.000000e-01 : f32
    %6 = vector.broadcast %cst_5 : f32 to vector<112x256xf32>
    %7 = arith.mulf %6, %5 : vector<112x256xf32>
    %8 = arith.maximumf %5, %7 : vector<112x256xf32>
    %c0_6 = arith.constant 0 : index
    %c0_7 = arith.constant 0 : index
    %c0_8 = arith.constant 0 : index
    %9 = vector.load %arg4[%c0_6, %c0_7, %c0_8] : memref<5x256x256xf32, #tpu.memory_space<vmem>>, vector<1x256x256xf32>
    %10 = vector.shape_cast %9 : vector<1x256x256xf32> to vector<256x256xf32>
    %cst_9 = arith.constant dense<0.000000e+00> : vector<112x256xf32>
    %11 = tpu.matmul %8, %10, %cst_9 {dimension_numbers = #tpu.dot_dimension_numbers<[1], [0], [0], [1], [0, 0, 1, 1], [], []>} : vector<112x256xf32>, vector<256x256xf32>, vector<112x256xf32> -> vector<112x256xf32>
    %c0_10 = arith.constant 0 : index
    %c0_11 = arith.constant 0 : index
    %c0_12 = arith.constant 0 : index
    %12 = vector.load %arg5[%c0_10, %c0_11, %c0_12] : memref<5x1x256xf32, #tpu.memory_space<vmem>>, vector<1x1x256xf32>
    %13 = vector.shape_cast %12 : vector<1x1x256xf32> to vector<1x256xf32>
    %14 = vector.broadcast %13 : vector<1x256xf32> to vector<112x256xf32>
    %15 = arith.addf %11, %14 : vector<112x256xf32>
    %cst_13 = arith.constant 2.000000e-01 : f32
    %16 = vector.broadcast %cst_13 : f32 to vector<112x256xf32>
    %17 = arith.mulf %16, %15 : vector<112x256xf32>
    %18 = arith.maximumf %15, %17 : vector<112x256xf32>
    %c1 = arith.constant 1 : index
    %c0_14 = arith.constant 0 : index
    %c0_15 = arith.constant 0 : index
    %19 = vector.load %arg4[%c1, %c0_14, %c0_15] : memref<5x256x256xf32, #tpu.memory_space<vmem>>, vector<1x256x256xf32>
    %20 = vector.shape_cast %19 : vector<1x256x256xf32> to vector<256x256xf32>
    %cst_16 = arith.constant dense<0.000000e+00> : vector<112x256xf32>
    %21 = tpu.matmul %18, %20, %cst_16 {dimension_numbers = #tpu.dot_dimension_numbers<[1], [0], [0], [1], [0, 0, 1, 1], [], []>} : vector<112x256xf32>, vector<256x256xf32>, vector<112x256xf32> -> vector<112x256xf32>
    %c1_17 = arith.constant 1 : index
    %c0_18 = arith.constant 0 : index
    %c0_19 = arith.constant 0 : index
    %22 = vector.load %arg5[%c1_17, %c0_18, %c0_19] : memref<5x1x256xf32, #tpu.memory_space<vmem>>, vector<1x1x256xf32>
    %23 = vector.shape_cast %22 : vector<1x1x256xf32> to vector<1x256xf32>
    %24 = vector.broadcast %23 : vector<1x256xf32> to vector<112x256xf32>
    %25 = arith.addf %21, %24 : vector<112x256xf32>
    %cst_20 = arith.constant 2.000000e-01 : f32
    %26 = vector.broadcast %cst_20 : f32 to vector<112x256xf32>
    %27 = arith.mulf %26, %25 : vector<112x256xf32>
    %28 = arith.maximumf %25, %27 : vector<112x256xf32>
    %c2 = arith.constant 2 : index
    %c0_21 = arith.constant 0 : index
    %c0_22 = arith.constant 0 : index
    %29 = vector.load %arg4[%c2, %c0_21, %c0_22] : memref<5x256x256xf32, #tpu.memory_space<vmem>>, vector<1x256x256xf32>
    %30 = vector.shape_cast %29 : vector<1x256x256xf32> to vector<256x256xf32>
    %cst_23 = arith.constant dense<0.000000e+00> : vector<112x256xf32>
    %31 = tpu.matmul %28, %30, %cst_23 {dimension_numbers = #tpu.dot_dimension_numbers<[1], [0], [0], [1], [0, 0, 1, 1], [], []>} : vector<112x256xf32>, vector<256x256xf32>, vector<112x256xf32> -> vector<112x256xf32>
    %c2_24 = arith.constant 2 : index
    %c0_25 = arith.constant 0 : index
    %c0_26 = arith.constant 0 : index
    %32 = vector.load %arg5[%c2_24, %c0_25, %c0_26] : memref<5x1x256xf32, #tpu.memory_space<vmem>>, vector<1x1x256xf32>
    %33 = vector.shape_cast %32 : vector<1x1x256xf32> to vector<1x256xf32>
    %34 = vector.broadcast %33 : vector<1x256xf32> to vector<112x256xf32>
    %35 = arith.addf %31, %34 : vector<112x256xf32>
    %cst_27 = arith.constant 2.000000e-01 : f32
    %36 = vector.broadcast %cst_27 : f32 to vector<112x256xf32>
    %37 = arith.mulf %36, %35 : vector<112x256xf32>
    %38 = arith.maximumf %35, %37 : vector<112x256xf32>
    %c3 = arith.constant 3 : index
    %c0_28 = arith.constant 0 : index
    %c0_29 = arith.constant 0 : index
    %39 = vector.load %arg4[%c3, %c0_28, %c0_29] : memref<5x256x256xf32, #tpu.memory_space<vmem>>, vector<1x256x256xf32>
    %40 = vector.shape_cast %39 : vector<1x256x256xf32> to vector<256x256xf32>
    %cst_30 = arith.constant dense<0.000000e+00> : vector<112x256xf32>
    %41 = tpu.matmul %38, %40, %cst_30 {dimension_numbers = #tpu.dot_dimension_numbers<[1], [0], [0], [1], [0, 0, 1, 1], [], []>} : vector<112x256xf32>, vector<256x256xf32>, vector<112x256xf32> -> vector<112x256xf32>
    %c3_31 = arith.constant 3 : index
    %c0_32 = arith.constant 0 : index
    %c0_33 = arith.constant 0 : index
    %42 = vector.load %arg5[%c3_31, %c0_32, %c0_33] : memref<5x1x256xf32, #tpu.memory_space<vmem>>, vector<1x1x256xf32>
    %43 = vector.shape_cast %42 : vector<1x1x256xf32> to vector<1x256xf32>
    %44 = vector.broadcast %43 : vector<1x256xf32> to vector<112x256xf32>
    %45 = arith.addf %41, %44 : vector<112x256xf32>
    %cst_34 = arith.constant 2.000000e-01 : f32
    %46 = vector.broadcast %cst_34 : f32 to vector<112x256xf32>
    %47 = arith.mulf %46, %45 : vector<112x256xf32>
    %48 = arith.maximumf %45, %47 : vector<112x256xf32>
    %c4 = arith.constant 4 : index
    %c0_35 = arith.constant 0 : index
    %c0_36 = arith.constant 0 : index
    %49 = vector.load %arg4[%c4, %c0_35, %c0_36] : memref<5x256x256xf32, #tpu.memory_space<vmem>>, vector<1x256x256xf32>
    %50 = vector.shape_cast %49 : vector<1x256x256xf32> to vector<256x256xf32>
    %cst_37 = arith.constant dense<0.000000e+00> : vector<112x256xf32>
    %51 = tpu.matmul %48, %50, %cst_37 {dimension_numbers = #tpu.dot_dimension_numbers<[1], [0], [0], [1], [0, 0, 1, 1], [], []>} : vector<112x256xf32>, vector<256x256xf32>, vector<112x256xf32> -> vector<112x256xf32>
    %c4_38 = arith.constant 4 : index
    %c0_39 = arith.constant 0 : index
    %c0_40 = arith.constant 0 : index
    %52 = vector.load %arg5[%c4_38, %c0_39, %c0_40] : memref<5x1x256xf32, #tpu.memory_space<vmem>>, vector<1x1x256xf32>
    %53 = vector.shape_cast %52 : vector<1x1x256xf32> to vector<1x256xf32>
    %54 = vector.broadcast %53 : vector<1x256xf32> to vector<112x256xf32>
    %55 = arith.addf %51, %54 : vector<112x256xf32>
    %cst_41 = arith.constant 2.000000e-01 : f32
    %56 = vector.broadcast %cst_41 : f32 to vector<112x256xf32>
    %57 = arith.mulf %56, %55 : vector<112x256xf32>
    %58 = arith.maximumf %55, %57 : vector<112x256xf32>
    %c0_42 = arith.constant 0 : index
    %c0_43 = arith.constant 0 : index
    %59 = vector.load %arg6[%c0_42, %c0_43] : memref<256x128xf32, #tpu.memory_space<vmem>>, vector<256x128xf32>
    %cst_44 = arith.constant dense<0.000000e+00> : vector<112x128xf32>
    %60 = tpu.matmul %58, %59, %cst_44 {dimension_numbers = #tpu.dot_dimension_numbers<[1], [0], [0], [1], [0, 0, 1, 1], [], []>} : vector<112x256xf32>, vector<256x128xf32>, vector<112x128xf32> -> vector<112x128xf32>
    %c0_45 = arith.constant 0 : index
    %c0_46 = arith.constant 0 : index
    %61 = vector.load %arg7[%c0_45, %c0_46] : memref<1x128xf32, #tpu.memory_space<vmem>>, vector<1x128xf32>
    %62 = vector.broadcast %61 : vector<1x128xf32> to vector<112x128xf32>
    %63 = arith.addf %60, %62 : vector<112x128xf32>
    %c0_47 = arith.constant 0 : index
    %c0_48 = arith.constant 0 : index
    %64 = vector.load %arg8[%c0_47, %c0_48] : memref<112x128xf32, #tpu.memory_space<vmem>>, vector<112x128xf32>
    tpu.vector_store %arg8[%c0_47, %c0_48], %63 {strides = array<i32>} : memref<112x128xf32, #tpu.memory_space<vmem>>, vector<112x128xf32>,
    return
  }
  func.func @transform_0(%arg0: i32) -> (i32, i32) {
    %c0_i32 = arith.constant 0 : i32
    %c0_i32_0 = arith.constant 0 : i32
    return %arg0, %c0_i32 : i32, i32
  }
  func.func @transform_1(%arg0: i32) -> (i32, i32) {
    %c0_i32 = arith.constant 0 : i32
    %c0_i32_0 = arith.constant 0 : i32
    %c0_i32_1 = arith.constant 0 : i32
    return %c0_i32, %c0_i32_0 : i32, i32
  }
  func.func @transform_2(%arg0: i32) -> (i32, i32) {
    %c0_i32 = arith.constant 0 : i32
    %c0_i32_0 = arith.constant 0 : i32
    %c0_i32_1 = arith.constant 0 : i32
    return %c0_i32, %c0_i32_0 : i32, i32
  }
  func.func @transform_3(%arg0: i32) -> (i32, i32, i32) {
    %c0_i32 = arith.constant 0 : i32
    %c0_i32_0 = arith.constant 0 : i32
    %c0_i32_1 = arith.constant 0 : i32
    %c0_i32_2 = arith.constant 0 : i32
    return %c0_i32, %c0_i32_0, %c0_i32_1 : i32, i32, i32
  }
  func.func @transform_4(%arg0: i32) -> (i32, i32, i32) {
    %c0_i32 = arith.constant 0 : i32
    %c0_i32_0 = arith.constant 0 : i32
    %c0_i32_1 = arith.constant 0 : i32
    %c0_i32_2 = arith.constant 0 : i32
    return %c0_i32, %c0_i32_0, %c0_i32_1 : i32, i32, i32
  }
  func.func @transform_5(%arg0: i32) -> (i32, i32) {
    %c0_i32 = arith.constant 0 : i32
    %c0_i32_0 = arith.constant 0 : i32
    %c0_i32_1 = arith.constant 0 : i32
    return %c0_i32, %c0_i32_0 : i32, i32
  }
  func.func @transform_6(%arg0: i32) -> (i32, i32) {
    %c0_i32 = arith.constant 0 : i32
    %c0_i32_0 = arith.constant 0 : i32
    %c0_i32_1 = arith.constant 0 : i32
    return %c0_i32, %c0_i32_0 : i32, i32
  }
  func.func @transform_7(%arg0: i32) -> (i32, i32) {
    %c0_i32 = arith.constant 0 : i32
    %c0_i32_0 = arith.constant 0 : i32
    return %arg0, %c0_i32 : i32, i32
  }
}

module attributes {stable_mosaic.version = 11 : i64} {
  func.func @mainflow_kernel(%arg0: i32, %arg1: memref<112x3xf32, #tpu.memory_space<vmem>>, %arg2: memref<3x256xf32, #tpu.memory_space<vmem>>, %arg3: memref<1x256xf32, #tpu.memory_space<vmem>>, %arg4: memref<5x256x256xf32, #tpu.memory_space<vmem>>, %arg5: memref<5x1x256xf32, #tpu.memory_space<vmem>>, %arg6: memref<256x128xf32, #tpu.memory_space<vmem>>, %arg7: memref<1x128xf32, #tpu.memory_space<vmem>>, %arg8: memref<112x128xf32, #tpu.memory_space<vmem>>) attributes {dimension_semantics = [#tpu.dimension_semantics<parallel>], iteration_bounds = array<i64: 2>, scalar_prefetch = 0 : i64, scratch_operands = 0 : i64, tpu.core_type = #tpu.core_type<tc>, window_params = [{transform_indices = @transform_0, window_bounds = array<i64: 112, 3>}, {pipeline_mode = #tpu.pipeline_mode<synchronous>, transform_indices = @transform_1, window_bounds = array<i64: 3, 256>}, {pipeline_mode = #tpu.pipeline_mode<synchronous>, transform_indices = @transform_2, window_bounds = array<i64: 1, 256>}, {pipeline_mode = #tpu.pipeline_mode<synchronous>, transform_indices = @transform_3, window_bounds = array<i64: 5, 256, 256>}, {pipeline_mode = #tpu.pipeline_mode<synchronous>, transform_indices = @transform_4, window_bounds = array<i64: 5, 1, 256>}, {pipeline_mode = #tpu.pipeline_mode<synchronous>, transform_indices = @transform_5, window_bounds = array<i64: 256, 128>}, {pipeline_mode = #tpu.pipeline_mode<synchronous>, transform_indices = @transform_6, window_bounds = array<i64: 1, 128>}, {transform_indices = @transform_7, window_bounds = array<i64: 112, 128>}]} {
    %c0 = arith.constant 0 : index
    %c0_0 = arith.constant 0 : index
    %0 = vector.load %arg1[%c0, %c0_0] : memref<112x3xf32, #tpu.memory_space<vmem>>, vector<112x3xf32>
    %c0_1 = arith.constant 0 : index
    %c0_2 = arith.constant 0 : index
    %1 = vector.load %arg2[%c0_1, %c0_2] : memref<3x256xf32, #tpu.memory_space<vmem>>, vector<3x256xf32>
    %cst = arith.constant dense<0.000000e+00> : vector<112x256xf32>
    %2 = tpu.matmul %0, %1, %cst {dimension_numbers = #tpu.dot_dimension_numbers<[1], [0], [0], [1], [0, 0, 1, 1], [], []>} : vector<112x3xf32>, vector<3x256xf32>, vector<112x256xf32> -> vector<112x256xf32>
    %c0_3 = arith.constant 0 : index
    %c0_4 = arith.constant 0 : index
    %3 = vector.load %arg3[%c0_3, %c0_4] : memref<1x256xf32, #tpu.memory_space<vmem>>, vector<1x256xf32>
    %4 = vector.broadcast %3 : vector<1x256xf32> to vector<112x256xf32>
    %5 = arith.addf %2, %4 : vector<112x256xf32>
    %cst_5 = arith.constant 2.000000e-01 : f32
    %6 = vector.broadcast %cst_5 : f32 to vector<112x256xf32>
    %7 = arith.mulf %6, %5 : vector<112x256xf32>
    %8 = arith.maximumf %5, %7 : vector<112x256xf32>
    %c0_6 = arith.constant 0 : index
    %c0_7 = arith.constant 0 : index
    %c0_8 = arith.constant 0 : index
    %9 = vector.load %arg4[%c0_6, %c0_7, %c0_8] : memref<5x256x256xf32, #tpu.memory_space<vmem>>, vector<1x256x256xf32>
    %10 = vector.shape_cast %9 : vector<1x256x256xf32> to vector<256x256xf32>
    %cst_9 = arith.constant dense<0.000000e+00> : vector<112x256xf32>
    %11 = tpu.matmul %8, %10, %cst_9 {dimension_numbers = #tpu.dot_dimension_numbers<[1], [0], [0], [1], [0, 0, 1, 1], [], []>} : vector<112x256xf32>, vector<256x256xf32>, vector<112x256xf32> -> vector<112x256xf32>
    %c0_10 = arith.constant 0 : index
    %c0_11 = arith.constant 0 : index
    %c0_12 = arith.constant 0 : index
    %12 = vector.load %arg5[%c0_10, %c0_11, %c0_12] : memref<5x1x256xf32, #tpu.memory_space<vmem>>, vector<1x1x256xf32>
    %13 = vector.shape_cast %12 : vector<1x1x256xf32> to vector<1x256xf32>
    %14 = vector.broadcast %13 : vector<1x256xf32> to vector<112x256xf32>
    %15 = arith.addf %11, %14 : vector<112x256xf32>
    %cst_13 = arith.constant 2.000000e-01 : f32
    %16 = vector.broadcast %cst_13 : f32 to vector<112x256xf32>
    %17 = arith.mulf %16, %15 : vector<112x256xf32>
    %18 = arith.maximumf %15, %17 : vector<112x256xf32>
    %c1 = arith.constant 1 : index
    %c0_14 = arith.constant 0 : index
    %c0_15 = arith.constant 0 : index
    %19 = vector.load %arg4[%c1, %c0_14, %c0_15] : memref<5x256x256xf32, #tpu.memory_space<vmem>>, vector<1x256x256xf32>
    %20 = vector.shape_cast %19 : vector<1x256x256xf32> to vector<256x256xf32>
    %cst_16 = arith.constant dense<0.000000e+00> : vector<112x256xf32>
    %21 = tpu.matmul %18, %20, %cst_16 {dimension_numbers = #tpu.dot_dimension_numbers<[1], [0], [0], [1], [0, 0, 1, 1], [], []>} : vector<112x256xf32>, vector<256x256xf32>, vector<112x256xf32> -> vector<112x256xf32>
    %c1_17 = arith.constant 1 : index
    %c0_18 = arith.constant 0 : index
    %c0_19 = arith.constant 0 : index
    %22 = vector.load %arg5[%c1_17, %c0_18, %c0_19] : memref<5x1x256xf32, #tpu.memory_space<vmem>>, vector<1x1x256xf32>
    %23 = vector.shape_cast %22 : vector<1x1x256xf32> to vector<1x256xf32>
    %24 = vector.broadcast %23 : vector<1x256xf32> to vector<112x256xf32>
    %25 = arith.addf %21, %24 : vector<112x256xf32>
    %cst_20 = arith.constant 2.000000e-01 : f32
    %26 = vector.broadcast %cst_20 : f32 to vector<112x256xf32>
    %27 = arith.mulf %26, %25 : vector<112x256xf32>
    %28 = arith.maximumf %25, %27 : vector<112x256xf32>
    %c2 = arith.constant 2 : index
    %c0_21 = arith.constant 0 : index
    %c0_22 = arith.constant 0 : index
    %29 = vector.load %arg4[%c2, %c0_21, %c0_22] : memref<5x256x256xf32, #tpu.memory_space<vmem>>, vector<1x256x256xf32>
    %30 = vector.shape_cast %29 : vector<1x256x256xf32> to vector<256x256xf32>
    %cst_23 = arith.constant dense<0.000000e+00> : vector<112x256xf32>
    %31 = tpu.matmul %28, %30, %cst_23 {dimension_numbers = #tpu.dot_dimension_numbers<[1], [0], [0], [1], [0, 0, 1, 1], [], []>} : vector<112x256xf32>, vector<256x256xf32>, vector<112x256xf32> -> vector<112x256xf32>
    %c2_24 = arith.constant 2 : index
    %c0_25 = arith.constant 0 : index
    %c0_26 = arith.constant 0 : index
    %32 = vector.load %arg5[%c2_24, %c0_25, %c0_26] : memref<5x1x256xf32, #tpu.memory_space<vmem>>, vector<1x1x256xf32>
    %33 = vector.shape_cast %32 : vector<1x1x256xf32> to vector<1x256xf32>
    %34 = vector.broadcast %33 : vector<1x256xf32> to vector<112x256xf32>
    %35 = arith.addf %31, %34 : vector<112x256xf32>
    %cst_27 = arith.constant 2.000000e-01 : f32
    %36 = vector.broadcast %cst_27 : f32 to vector<112x256xf32>
    %37 = arith.mulf %36, %35 : vector<112x256xf32>
    %38 = arith.maximumf %35, %37 : vector<112x256xf32>
    %c3 = arith.constant 3 : index
    %c0_28 = arith.constant 0 : index
    %c0_29 = arith.constant 0 : index
    %39 = vector.load %arg4[%c3, %c0_28, %c0_29] : memref<5x256x256xf32, #tpu.memory_space<vmem>>, vector<1x256x256xf32>
    %40 = vector.shape_cast %39 : vector<1x256x256xf32> to vector<256x256xf32>
    %cst_30 = arith.constant dense<0.000000e+00> : vector<112x256xf32>
    %41 = tpu.matmul %38, %40, %cst_30 {dimension_numbers = #tpu.dot_dimension_numbers<[1], [0], [0], [1], [0, 0, 1, 1], [], []>} : vector<112x256xf32>, vector<256x256xf32>, vector<112x256xf32> -> vector<112x256xf32>
    %c3_31 = arith.constant 3 : index
    %c0_32 = arith.constant 0 : index
    %c0_33 = arith.constant 0 : index
    %42 = vector.load %arg5[%c3_31, %c0_32, %c0_33] : memref<5x1x256xf32, #tpu.memory_space<vmem>>, vector<1x1x256xf32>
    %43 = vector.shape_cast %42 : vector<1x1x256xf32> to vector<1x256xf32>
    %44 = vector.broadcast %43 : vector<1x256xf32> to vector<112x256xf32>
    %45 = arith.addf %41, %44 : vector<112x256xf32>
    %cst_34 = arith.constant 2.000000e-01 : f32
    %46 = vector.broadcast %cst_34 : f32 to vector<112x256xf32>
    %47 = arith.mulf %46, %45 : vector<112x256xf32>
    %48 = arith.maximumf %45, %47 : vector<112x256xf32>
    %c4 = arith.constant 4 : index
    %c0_35 = arith.constant 0 : index
    %c0_36 = arith.constant 0 : index
    %49 = vector.load %arg4[%c4, %c0_35, %c0_36] : memref<5x256x256xf32, #tpu.memory_space<vmem>>, vector<1x256x256xf32>
    %50 = vector.shape_cast %49 : vector<1x256x256xf32> to vector<256x256xf32>
    %cst_37 = arith.constant dense<0.000000e+00> : vector<112x256xf32>
    %51 = tpu.matmul %48, %50, %cst_37 {dimension_numbers = #tpu.dot_dimension_numbers<[1], [0], [0], [1], [0, 0, 1, 1], [], []>} : vector<112x256xf32>, vector<256x256xf32>, vector<112x256xf32> -> vector<112x256xf32>
    %c4_38 = arith.constant 4 : index
    %c0_39 = arith.constant 0 : index
    %c0_40 = arith.constant 0 : index
    %52 = vector.load %arg5[%c4_38, %c0_39, %c0_40] : memref<5x1x256xf32, #tpu.memory_space<vmem>>, vector<1x1x256xf32>
    %53 = vector.shape_cast %52 : vector<1x1x256xf32> to vector<1x256xf32>
    %54 = vector.broadcast %53 : vector<1x256xf32> to vector<112x256xf32>
    %55 = arith.addf %51, %54 : vector<112x256xf32>
    %cst_41 = arith.constant 2.000000e-01 : f32
    %56 = vector.broadcast %cst_41 : f32 to vector<112x256xf32>
    %57 = arith.mulf %56, %55 : vector<112x256xf32>
    %58 = arith.maximumf %55, %57 : vector<112x256xf32>
    %c0_42 = arith.constant 0 : index
    %c0_43 = arith.constant 0 : index
    %59 = vector.load %arg6[%c0_42, %c0_43] : memref<256x128xf32, #tpu.memory_space<vmem>>, vector<256x128xf32>
    %cst_44 = arith.constant dense<0.000000e+00> : vector<112x128xf32>
    %60 = tpu.matmul %58, %59, %cst_44 {dimension_numbers = #tpu.dot_dimension_numbers<[1], [0], [0], [1], [0, 0, 1, 1], [], []>} : vector<112x256xf32>, vector<256x128xf32>, vector<112x128xf32> -> vector<112x128xf32>
    %c0_45 = arith.constant 0 : index
    %c0_46 = arith.constant 0 : index
    %61 = vector.load %arg7[%c0_45, %c0_46] : memref<1x128xf32, #tpu.memory_space<vmem>>, vector<1x128xf32>
    %62 = vector.broadcast %61 : vector<1x128xf32> to vector<112x128xf32>
    %63 = arith.addf %60, %62 : vector<112x128xf32>
    %c0_47 = arith.constant 0 : index
    %c0_48 = arith.constant 0 : index
    %64 = vector.load %arg8[%c0_47, %c0_48] : memref<112x128xf32, #tpu.memory_space<vmem>>, vector<112x128xf32>
    tpu.vector_store %arg8[%c0_47, %c0_48], %63 {strides = array<i32>} : memref<112x128xf32, #tpu.memory_space<vmem>>, vector<112x128xf32>,
    return
  }
  func.func @transform_0(%arg0: i32) -> (i32, i32) {
    %c0_i32 = arith.constant 0 : i32
    %c0_i32_0 = arith.constant 0 : i32
    return %arg0, %c0_i32 : i32, i32
  }
  func.func @transform_1(%arg0: i32) -> (i32, i32) {
    %c0_i32 = arith.constant 0 : i32
    %c0_i32_0 = arith.constant 0 : i32
    %c0_i32_1 = arith.constant 0 : i32
    return %c0_i32, %c0_i32_0 : i32, i32
  }
  func.func @transform_2(%arg0: i32) -> (i32, i32) {
    %c0_i32 = arith.constant 0 : i32
    %c0_i32_0 = arith.constant 0 : i32
    %c0_i32_1 = arith.constant 0 : i32
    return %c0_i32, %c0_i32_0 : i32, i32
  }
  func.func @transform_3(%arg0: i32) -> (i32, i32, i32) {
    %c0_i32 = arith.constant 0 : i32
    %c0_i32_0 = arith.constant 0 : i32
    %c0_i32_1 = arith.constant 0 : i32
    %c0_i32_2 = arith.constant 0 : i32
    return %c0_i32, %c0_i32_0, %c0_i32_1 : i32, i32, i32
  }
  func.func @transform_4(%arg0: i32) -> (i32, i32, i32) {
    %c0_i32 = arith.constant 0 : i32
    %c0_i32_0 = arith.constant 0 : i32
    %c0_i32_1 = arith.constant 0 : i32
    %c0_i32_2 = arith.constant 0 : i32
    return %c0_i32, %c0_i32_0, %c0_i32_1 : i32, i32, i32
  }
  func.func @transform_5(%arg0: i32) -> (i32, i32) {
    %c0_i32 = arith.constant 0 : i32
    %c0_i32_0 = arith.constant 0 : i32
    %c0_i32_1 = arith.constant 0 : i32
    return %c0_i32, %c0_i32_0 : i32, i32
  }
  func.func @transform_6(%arg0: i32) -> (i32, i32) {
    %c0_i32 = arith.constant 0 : i32
    %c0_i32_0 = arith.constant 0 : i32
    %c0_i32_1 = arith.constant 0 : i32
    return %c0_i32, %c0_i32_0 : i32, i32
  }
  func.func @transform_7(%arg0: i32) -> (i32, i32) {
    %c0_i32 = arith.constant 0 : i32
    %c0_i32_0 = arith.constant 0 : i32
    return %arg0, %c0_i32 : i32, i32
  }
}

</mosaic_0001>

<bundles_post_ra>
// kernel: tpu_custom_call.1
= control target key start
LH: loop header
LB: loop body
LE: loop exit
PB: predicated region body
PF: predicated region fallthrough
CT: control target
= control target key end

     0   :  { %12 = vsyncpa [#allocation3], 0  ;;  %s3363_s0 = inlined_call_operand.vmem [shape: f32[224,3], index: 0, kind: input, shape index: {}]   ;;  %s3364_s1 = inlined_call_operand.hbm [shape: f32[3,256], index: 1, kind: input, shape index: {}]   ;;  %s3365_s2 = inlined_call_operand.hbm [shape: f32[1,256], index: 2, kind: input, shape index: {}]   ;;  %s3366_s3 = inlined_call_operand.hbm [shape: f32[5,256,256], index: 3, kind: input, shape index: {}]   ;;  %s3367_s4 = inlined_call_operand.hbm [shape: f32[5,1,256], index: 4, kind: input, shape index: {}]   ;;  %s3368_s5 = inlined_call_operand.hbm [shape: f32[256,128], index: 5, kind: input, shape index: {}]   ;;  %s3369_s6 = inlined_call_operand.hbm [shape: f32[1,128], index: 6, kind: input, shape index: {}]   ;;  %s3370_s7 = inlined_call_operand.hbm [shape: f32[224,128], index: 7, kind: output, shape index: {}]  }
   0x1   :  { %13 = vsyncpa [#allocation6], 0 }
   0x2   :  { %14 = vsyncpa [#allocation9], 0 }
   0x3   :  { %15 = vsyncpa [#allocation12], 0 }
   0x4   :  { %16 = vsyncpa [#allocation4], 0 }
   0x5   :  { %18 = vsyncpa [#allocation4 + $0x1], 0  ;;  %s2894_s24 = smov 0   ;;  %s2896_s25 = smov 0  }
   0x6   :  { %s2898_s26 = smov 0   ;;  %s2900_s27 = smov 0  }
   0x7 LB: > { %s2915_s28 = sadd.s32 4294967295, %s2836_s27   ;;  %s2381_s29 = sadd.s32 4294967294, %s2836_s27   ;;  %s2836_s27 = sphi %s2900_s27, %s3393_s27   ;;  %s2832_s26 = sphi %s2898_s26, %s3392_s26   ;;  %s2828_s25 = sphi %s2896_s25, %s3391_s25   ;;  %s2824_s24 = sphi %s2894_s24, %s3390_s24  }
   0x8   : > { %s2919_s30 = sadd.s32 1, %s2836_s27   ;;  %s183_s8 = sadd.s32 1, %s2832_s26 }
   0x9   : > { %s180_s9 = ssub.s32 %s2836_s27, %s2919_s30  ;;  %p193_p0 = scmp.ne.s32.totalorder %s2832_s26, %s2828_s25 }
   0xa   : > { %p181_p1 = scmp.eq.s32.totalorder %s180_s9, 0  ;;  %p194_p2 = scmp.eq.s32.totalorder %s2915_s28, 1 }
   0xb   : > { %p199_p3 = scmp.ne.s32.totalorder %s2828_s25, %s2824_s24  ;;  %p200_p4 = scmp.eq.s32.totalorder %s2381_s29, 1 }
   0xc   : > { %s2930_s10 = scalar_select %p181_p1, %s2832_s26, %s183_s8  }
   0xd   : > { %p2932_p5 = por %p194_p2, %p193_p0  ;;  %p2936_p6 = por %p200_p4, %p199_p3 }
   0xe   : > { %p2382_p7 = scmp.ge.s32.totalorder %s2836_s27, 1  ;;  %p207_p8 = scmp.lt.s32.totalorder %s2836_s27, 3 }
   0xf   : > { %s3374_s11 = scalar_select %p2932_p5, 1, 0 }
  0x10   : > { %s3375_s12 = scalar_select %p2936_p6, 1, 0 }
  0x11   : > { %p3371_p9 = scmp.eq.s32.totalorder %s2915_s28, 0  ;;  %p2943_p10 = pnand %p2382_p7, %p207_p8 }
  0x12   : > { %s2838_s14 = smov [#allocation5]   ;;  %s2839_s16 = smov [#allocation8]  }
  0x13   : > { %s3376_s13 = scalar_select %p2943_p10, 1, 0 }
  0x14   : > { %s231_s15 = sshll.u32 %s2838_s14, 4  ;;  %p2520_p11 = pneg %p2943_p10  ;;  %s232_s15 = int_to_ptr.vmem [resolvable:$true] %s231_s15 }
  0x15   : > { %s254_s17 = sshll.u32 %s2839_s16, 4  ;;  %s2840_s19 = smov [#allocation2]   ;;  %s255_s17 = int_to_ptr.vmem [resolvable:$true] %s254_s17 }
  0x16   : > { %p2951_p12 = pnand %p3371_p9, %p2520_p11  ;;  %s220_s20 = sshll.u32 %s2840_s19, 4  ;;  %s221_s20 = int_to_ptr.vmem [resolvable:$true] %s220_s20 }
  0x17   : > { %s2615_s22 = scalar_lea.vmem %s232_s15, 32  ;;  %p2623_p3 = scmp.lt.s32.totalorder %s232_s15, %s232_s15 }
  0x18   : > { %p2957_p13 = pneg %p2951_p12  ;;  %p2616_p0 = scmp.ne.s32.totalorder %s232_s15, %s2615_s22 }
  0x19   : > { %p2624_p4 = scmp.lt.s32.totalorder %s2615_s22, %s2615_s22 }
  0x1a   : > { %p2618_p1 = pnand %p2616_p0, %p2957_p13 }
  0x1b   : > { %p2625_p7 = por %p2624_p4, %p2623_p3 }
  0x1c   : > { %p2619_p2 = pneg %p2618_p1 }
  0x1e   : > { %p2626_p8 = pnand %p2625_p7, %p2619_p2 }
  0x20   : > { %2629 = shalt.err (!%p2626_p8)
}
  0x21   : > { %2526 = dma.hbm_to_vmem [thread:$0]  (!%p2951_p12), %s3365_s2, 32, %s232_s15, [#allocation6]  }
  0x22   : > { %s2641_s8 = scalar_lea.vmem %s255_s17, 160  ;;  %p2649_p5 = scmp.lt.s32.totalorder %s255_s17, %s255_s17 }
  0x23   : > { %p2642_p11 = scmp.ne.s32.totalorder %s255_s17, %s2641_s8  ;;  %p2650_p0 = scmp.lt.s32.totalorder %s2641_s8, %s2641_s8 }
  0x25   : > { %p2644_p9 = pnand %p2642_p11, %p2957_p13  ;;  %p2651_p1 = por %p2650_p0, %p2649_p5 }
  0x27   : > { %p2645_p6 = pneg %p2644_p9 }
  0x29   : > { %p2652_p10 = pnand %p2651_p1, %p2645_p6 }
  0x2b   : > { %2655 = shalt.err (!%p2652_p10)
}
  0x2c   : > { %s2841_s9 = smov 32   ;;  %s2842_s14 = smov 2  }
  0x2d   : > { %2532 = dma.hbm_to_vmem [thread:$0]  (!%p2951_p12), %s3367_s4, 160, %s255_s17, [#allocation9], %s2841_s9, %s2841_s9, %s2842_s14  }
  0x2e   : > { %s2667_s15 = scalar_lea.vmem %s221_s20, 128  ;;  %p2675_p4 = scmp.lt.s32.totalorder %s221_s20, %s221_s20 }
  0x2f   : > { %p2668_p2 = scmp.ne.s32.totalorder %s221_s20, %s2667_s15  ;;  %p2676_p7 = scmp.lt.s32.totalorder %s2667_s15, %s2667_s15 }
  0x31   : > { %p2670_p3 = pnand %p2668_p2, %p2957_p13  ;;  %p2677_p5 = por %p2676_p7, %p2675_p4 }
  0x33   : > { %p2671_p9 = pneg %p2670_p3 }
  0x35   : > { %p2678_p6 = pnand %p2677_p5, %p2671_p9 }
  0x37   : > { %2681 = shalt.err (!%p2678_p6)
}
  0x38   : > { %2523 = dma.hbm_to_vmem [thread:$0]  (!%p2951_p12), %s3364_s1, 128, %s221_s20, [#allocation3]  }
  0x39   : > { %s2843_s29 = smov [#allocation7]  }
  0x3a   : > { %s241_s17 = sshll.u32 %s2843_s29, 4  ;;  %s242_s17 = int_to_ptr.vmem [resolvable:$true] %s241_s17 }
  0x3b   : > { %s2693_s8 = scalar_lea.vmem %s242_s17, 40960  ;;  %p2701_p0 = scmp.lt.s32.totalorder %s242_s17, %s242_s17 }
  0x3c   : > { %p2694_p10 = scmp.ne.s32.totalorder %s242_s17, %s2693_s8  ;;  %p2702_p1 = scmp.lt.s32.totalorder %s2693_s8, %s2693_s8 }
  0x3e   : > { %p2696_p8 = pnand %p2694_p10, %p2957_p13  ;;  %p2703_p2 = por %p2702_p1, %p2701_p0 }
  0x40   : > { %p2697_p11 = pneg %p2696_p8 }
  0x42   : > { %p2704_p3 = pnand %p2703_p2, %p2697_p11 }
  0x44   : > { %2707 = shalt.err (!%p2704_p3)
}
  0x45   : > { %s2844_s9 = smov 256   ;;  %s2845_s14 = smov 16  }
  0x46   : > { %2529 = dma.hbm_to_vmem [thread:$0]  (!%p2951_p12), %s3366_s3, 40960, %s242_s17, [#allocation6], %s2844_s9, %s2844_s9, %s2845_s14  }
  0x47   : > { %s2846_s19 = smov [#allocation10]  }
  0x48   : > { %s267_s15 = sshll.u32 %s2846_s19, 4  ;;  %s268_s15 = int_to_ptr.vmem [resolvable:$true] %s267_s15 }
  0x49   : > { %s2719_s22 = scalar_lea.vmem %s268_s15, 4096  ;;  %p2727_p5 = scmp.lt.s32.totalorder %s268_s15, %s268_s15 }
  0x4a   : > { %p2720_p9 = scmp.ne.s32.totalorder %s268_s15, %s2719_s22  ;;  %p2728_p6 = scmp.lt.s32.totalorder %s2719_s22, %s2719_s22 }
  0x4c   : > { %p2722_p4 = pnand %p2720_p9, %p2957_p13  ;;  %p2729_p10 = por %p2728_p6, %p2727_p5 }
  0x4e   : > { %p2723_p7 = pneg %p2722_p4 }
  0x50   : > { %p2730_p8 = pnand %p2729_p10, %p2723_p7 }
  0x52   : > { %2733 = shalt.err (!%p2730_p8)
}
  0x53   : > { %s2847_s23 = smov 128   ;;  %s2848_s29 = smov 8  }
  0x54   : > { %2535 = dma.hbm_to_vmem [thread:$0]  (!%p2951_p12), %s3368_s5, 4096, %s268_s15, [#allocation9], %s2847_s23, %s2847_s23, %s2848_s29  }
  0x55   : > { %s2849_s9 = smov [#allocation11]  }
  0x56   : > { %s281_s14 = sshll.u32 %s2849_s9, 4  ;;  %s282_s14 = int_to_ptr.vmem [resolvable:$true] %s281_s14 }
  0x57   : > { %s2745_s16 = scalar_lea.vmem %s282_s14, 16  ;;  %s2752_s20 = scalar_lea.vmem %s282_s14, 32 }
  0x58   : > { %p2746_p11 = scmp.ne.s32.totalorder %s282_s14, %s2745_s16  ;;  %p2753_p2 = scmp.lt.s32.totalorder %s282_s14, %s282_s14 }
  0x59   : > { %p2754_p3 = scmp.lt.s32.totalorder %s2752_s20, %s2745_s16 }
  0x5a   : > { %p2748_p0 = pnand %p2746_p11, %p2957_p13 }
  0x5b   : > { %p2755_p9 = por %p2754_p3, %p2753_p2 }
  0x5c   : > { %p2749_p1 = pneg %p2748_p0 }
  0x5e   : > { %p2756_p4 = pnand %p2755_p9, %p2749_p1 }
  0x60   : > { %2759 = shalt.err (!%p2756_p4)
}
  0x61   : > { %2538 = dma.hbm_to_vmem [thread:$0]  (!%p2951_p12), %s3369_s6, 16, %s282_s14, [#allocation12]  }
  0x62   : > { %p3379_p7 = scmp.ne.s32.totalorder %s3376_s13, 0 }
  0x63   : > { %p3380_p5 = scmp.eq.s32.totalorder (!%p3379_p7), %s2915_s28, 0 }
  0x64   : > { %303 = sbr.rel (%p3379_p7) target bundleno = 1600 (0x640), region = 48 }
  0x69   : > { %2803 = dma.done.wait (%p3380_p5), [#allocation3], 128   ;;  %p3381_p13 = pmov %p3380_p5 }
  0x6a   : > { %p3382_p6 = pmov %p3380_p5 }
  0x6b   : > { %2805 = vsyncadd (%p3381_p13), [#allocation3], 4294967168 }
  0x6c   : > { %2807 = dma.done.wait (%p3382_p6), [#allocation6], 40992   ;;  %p3383_p10 = pmov %p3380_p5 }
  0x6d   : > { %p3384_p8 = pmov %p3380_p5 }
  0x6e   : > { %2809 = vsyncadd (%p3383_p10), [#allocation6], 4294926304 }
  0x6f   : > { %2811 = dma.done.wait (%p3384_p8), [#allocation9], 4256   ;;  %p3385_p12 = pmov %p3380_p5 }
  0x70   : > { %p3386_p11 = pmov %p3380_p5 }
  0x71   : > { %2813 = vsyncadd (%p3385_p12), [#allocation9], 4294963040 }
  0x72   : > { %2815 = dma.done.wait (%p3386_p11), [#allocation12], 16   ;;  %p3387_p0 = pmov %p3380_p5 }
  0x73   : > { %s355_s13 = smul.u32 14, %s2915_s28  ;;  %v2850_v0 = vmov 0.0   ;;  %v376_v1 = vld [vmem:[#allocation2] sm:$0x77]  ;;  %vm434_vm0 = vcmask 1042432   ;;  %vm391_vm1 = vcmask 23552  }
  0x74   : > { %2817 = vsyncadd (%p3387_p0), [#allocation12], 4294967280  ;;  %503 = vmatprep.mubr.f32.mxu0 %v2850_v0  ;;  %v675_v2 = vld [vmem:[#allocation7 + $0xf8] sm:$0xff]  ;;  %v674_v3 = vld [vmem:[#allocation7 + $0xf0] sm:$0xff]  ;;  %v390_v4 = vcombine.high %v376_v1, %v376_v1  ;;  %s352_s29 = sand.u32 1, %s2828_s25   ;;  %s2418_s9 = smul.u32 1792, %s2915_s28 }
  0x75   : > { %p356_p1 = scmp.lt.s32.totalorder %s355_s13, 27  ;;  %720 = vmatprep.subr.mxu1 %v675_v2  ;;  %v673_v7 = vld [vmem:[#allocation7 + $0xe8] sm:$0xff]  ;;  %v672_v8 = vld [vmem:[#allocation7 + $0xe0] sm:$0xff]  ;;  %v671_v9 = vld [vmem:[#allocation7 + $0xd8] sm:$0xff]  ;;  %s2493_s8 = smul.u32 112, %s352_s29 }
  0x76   : > { %721 = vmatpush1.msra.mxu1 %v674_v3  ;;  %2398 = vmatprep.subr.msk.mxu0 %vm434_vm0, %v390_v4  ;;  %v670_v10 = vld [vmem:[#allocation7 + $0xd0] sm:$0xff]  ;;  %v669_v11 = vld [vmem:[#allocation7 + $0xc8] sm:$0xff]  ;;  %v668_v12 = vld [vmem:[#allocation7 + $0xc0] sm:$0xff]  ;;  %s3315_s19 = scalar_lea.hbm %s3370_s7, %s2418_s9  ;;  %s3323_s28 = scalar_lea.sflag [#allocation4], %s352_s29 }
  0x77   : > { %s3395_s13 = smov (!%p356_p1, %s355_s13), 27  ;;  %2399 = vmatpush1.msk.msra.mxu0 %vm434_vm0, %v376_v1  ;;  %722 = vmatprep.subr.mxu1 %v673_v7  ;;  %v667_v13 = vld [vmem:[#allocation7 + $0xb8] sm:$0xff]  ;;  %v666_v15 = vld [vmem:[#allocation7 + $0xb0] sm:$0xff]  ;;  %v665_v16 = vld [vmem:[#allocation7 + $0xa8] sm:$0xff]  ;;  %s3283_s17 = scalar_lea.vmem [#allocation13], %s2493_s8 }
  0x78   : > { %s2397_s18 = sshll.u32 %s3395_s13, 3  ;;  %723 = vmatpush1.msra.mxu1 %v672_v8  ;;  %v664_v17 = vld [vmem:[#allocation7 + $0xa0] sm:$0xff]  ;;  %v663_v18 = vld [vmem:[#allocation7 + $0x98] sm:$0xff]  ;;  %v662_v20 = vld [vmem:[#allocation7 + $0x90] sm:$0xff]  ;;  %s2259_s14 = sshll.u32 %s3283_s17, 4  ;;  %s3317_s14 = int_to_ptr.vmem [resolvable:$true] %s2259_s14 }
  0x79   : > { %s3026_s23 = scalar_lea.vmem %s3363_s0, %s2397_s18  ;;  %724 = vmatprep.subr.mxu1 %v671_v9  ;;  %v661_v21 = vld [vmem:[#allocation7 + $0x88] sm:$0xff]  ;;  %v660_v22 = vld [vmem:[#allocation7 + $0x80] sm:$0xff]  ;;  %v659_v23 = vld [vmem:[#allocation7 + $0x78] sm:$0xff]  ;;  %s2760_s22 = scalar_lea.vmem %s3317_s14, 1792 }
  0x7a   : > { %v362_v5 = vld [vmem:[%s3026_s23] sm:$0xff]  ;;  %v363_v6 = vld [vmem:[%s3026_s23 + $0x8] sm:$0xff]  ;;  %725 = vmatpush1.msra.mxu1 %v670_v10  ;;  %v364_v14 = vld [vmem:[%s3026_s23 + $0x10] sm:$0xff]  ;;  %p2761_p2 = scmp.ne.s32.totalorder %s3317_s14, %s2760_s22  ;;  %p3388_p3 = scmp.ne.s32.totalorder %s3374_s11, 0 }
  0x7b   : > { %2400 = vmatmul.mubr.msk.f32.vlgmr.msra.gmra.mxu0 %vm391_vm1, %v362_v5  ;;  %726 = vmatprep.subr.mxu1 %v669_v11  ;;  %v365_v19 = vld [vmem:[%s3026_s23 + $0x18] sm:$0xff]  ;;  %v366_v24 = vld [vmem:[%s3026_s23 + $0x20] sm:$0xff]  ;;  %v656_v27 = vld [vmem:[#allocation7 + $0x60] sm:$0xff]  ;;  %s2851_s13 = smov [#allocation13]  }
  0x7c   : > { %509 = vmatprep.mubr.f32.mxu0 %v2850_v0  ;;  %727 = vmatpush1.msra.mxu1 %v668_v12  ;;  %v658_v25 = vld [vmem:[#allocation7 + $0x70] sm:$0xff]  ;;  %v657_v26 = vld [vmem:[#allocation7 + $0x68] sm:$0xff]  ;;  %v655_v28 = vld [vmem:[#allocation7 + $0x58] sm:$0xff]  ;;  %p2762_p9 = pnand %p2761_p2, %p3388_p3  ;;  %s2764_s18 = sshll.u32 %s2851_s13, 4  ;;  %s2765_s18 = int_to_ptr.vmem [resolvable:$false] %s2764_s18 }
  0x7d   : > { %728 = vmatprep.subr.mxu1 %v667_v13  ;;  %v367_v29 = vld [vmem:[%s3026_s23 + $0x28] sm:$0xff]  ;;  %v654_v30 = vld [vmem:[#allocation7 + $0x50] sm:$0xff]  ;;  %v653_v31 = vld [vmem:[#allocation7 + $0x48] sm:$0xff]  ;;  %s2766_s21 = scalar_lea.vmem %s2765_s18, 3584  ;;  %p2767_p7 = scmp.lt.s32.totalorder %s3317_s14, %s2765_s18 }
  0x7e   : > { %729 = vmatpush1.msra.mxu1 %v666_v15  ;;  %v652_v32 = vld [vmem:[#allocation7 + $0x40] sm:$0xff]  ;;  %v651_v33 = vld [vmem:[#allocation7 + $0x38] sm:$0xff]  ;;  %v650_v35 = vld [vmem:[#allocation7 + $0x30] sm:$0xff]  ;;  %p2763_p4 = pneg %p2762_p9  ;;  %p2768_p5 = scmp.lt.s32.totalorder %s2766_s21, %s2760_s22 }
  0x7f   : > { %2401 = vmatmul.mubr.msk.f32.gmra.mxu0 %vm391_vm1, %v363_v6  ;;  %730 = vmatprep.subr.mxu1 %v665_v16  ;;  %v368_v34 = vld [vmem:[%s3026_s23 + $0x30] sm:$0xff]  ;;  %v647_v38 = vld [vmem:[#allocation7 + $0x18] sm:$0xff]  ;;  %v369_v39 = vld [vmem:[%s3026_s23 + $0x38] sm:$0xff] }
  0x80   : > { %515 = vmatprep.mubr.f32.mxu0 %v2850_v0  ;;  %731 = vmatpush1.msra.mxu1 %v664_v17  ;;  %v649_v36 = vld [vmem:[#allocation7 + $0x28] sm:$0xff]  ;;  %v648_v37 = vld [vmem:[#allocation7 + $0x20] sm:$0xff]  ;;  %v646_v40 = vld [vmem:[#allocation7 + $0x10] sm:$0xff]  ;;  %p2769_p13 = por %p2768_p5, %p2767_p7 }
  0x81   : > { %732 = vmatprep.subr.mxu1 %v663_v18  ;;  %v645_v41 = vld [vmem:[#allocation7 + $0x8] sm:$0xff]  ;;  %v644_v42 = vld [vmem:[#allocation7] sm:$0xff]  ;;  %v707_v43 = vld [vmem:[#allocation7 + $0x1f8] sm:$0xff] }
  0x82   : > { %733 = vmatpush1.msra.mxu1 %v662_v20  ;;  %v370_v44 = vld [vmem:[%s3026_s23 + $0x40] sm:$0xff]  ;;  %v705_v46 = vld [vmem:[#allocation7 + $0x1e8] sm:$0xff]  ;;  %v704_v47 = vld [vmem:[#allocation7 + $0x1e0] sm:$0xff]  ;;  %p2770_p6 = pnand %p2769_p13, %p2763_p4 }
  0x83   : > { %2402 = vmatmul.mubr.msk.f32.gmra.mxu0 %vm391_vm1, %v364_v14  ;;  %734 = vmatprep.subr.mxu1 %v661_v21  ;;  %v706_v45 = vld [vmem:[#allocation7 + $0x1f0] sm:$0xff]  ;;  %v703_v48 = vld [vmem:[#allocation7 + $0x1d8] sm:$0xff]  ;;  %v701_v51 = vld [vmem:[#allocation7 + $0x1c8] sm:$0xff] }
  0x84   : > { %521 = vmatprep.mubr.f32.mxu0 %v2850_v0  ;;  %735 = vmatpush1.msra.mxu1 %v660_v22  ;;  %v371_v49 = vld [vmem:[%s3026_s23 + $0x48] sm:$0xff]  ;;  %v702_v50 = vld [vmem:[#allocation7 + $0x1d0] sm:$0xff]  ;;  %v372_v54 = vld [vmem:[%s3026_s23 + $0x50] sm:$0xff] }
  0x85   : > { %736 = vmatprep.subr.mxu1 %v659_v23  ;;  %v700_v52 = vld [vmem:[#allocation7 + $0x1c0] sm:$0xff]  ;;  %v699_v53 = vld [vmem:[#allocation7 + $0x1b8] sm:$0xff]  ;;  %v698_v55 = vld [vmem:[#allocation7 + $0x1b0] sm:$0xff] }
  0x86   : > { %737 = vmatpush1.msra.mxu1 %v658_v25  ;;  %v697_v56 = vld [vmem:[#allocation7 + $0x1a8] sm:$0xff]  ;;  %v696_v57 = vld [vmem:[#allocation7 + $0x1a0] sm:$0xff]  ;;  %v695_v58 = vld [vmem:[#allocation7 + $0x198] sm:$0xff] }
  0x87   : > { %2403 = vmatmul.mubr.msk.f32.gmra.mxu0 %vm391_vm1, %v365_v19  ;;  %738 = vmatprep.subr.mxu1 %v657_v26  ;;  %v373_v59 = vld [vmem:[%s3026_s23 + $0x58] sm:$0xff]  ;;  %v692_v62 = vld [vmem:[#allocation7 + $0x180] sm:$0xff]  ;;  %v691_v63 = vld [vmem:[#allocation7 + $0x178] sm:$0xff] }
  0x88   : > { %527 = vmatprep.mubr.f32.mxu0 %v2850_v0  ;;  %739 = vmatpush1.msra.mxu1 %v656_v27  ;;  %v694_v60 = vld [vmem:[#allocation7 + $0x190] sm:$0xff]  ;;  %v693_v61 = vld [vmem:[#allocation7 + $0x188] sm:$0xff]  ;;  %v688_v4 = vld [vmem:[#allocation7 + $0x160] sm:$0xff] }
  0x89   : > { %740 = vmatprep.subr.mxu1 %v655_v28  ;;  %v374_v1 = vld [vmem:[%s3026_s23 + $0x60] sm:$0xff]  ;;  %v689_v3 = vld [vmem:[#allocation7 + $0x168] sm:$0xff]  ;;  %v375_v6 = vld [vmem:[%s3026_s23 + $0x68] sm:$0xff] }
  0x8a   : > { %741 = vmatpush1.msra.mxu1 %v654_v30  ;;  %v690_v2 = vld [vmem:[#allocation7 + $0x170] sm:$0xff]  ;;  %v687_v5 = vld [vmem:[#allocation7 + $0x158] sm:$0xff]  ;;  %v685_v8 = vld [vmem:[#allocation7 + $0x148] sm:$0xff] }
  0x8b   : > { %2404 = vmatmul.mubr.msk.f32.gmra.mxu0 %vm391_vm1, %v366_v24  ;;  %742 = vmatprep.subr.mxu1 %v653_v31  ;;  %v686_v7 = vld [vmem:[#allocation7 + $0x150] sm:$0xff]  ;;  %v684_v9 = vld [vmem:[#allocation7 + $0x140] sm:$0xff]  ;;  %v683_v10 = vld [vmem:[#allocation7 + $0x138] sm:$0xff] }
  0x8c   : > { %533 = vmatprep.mubr.f32.mxu0 %v2850_v0  ;;  %743 = vmatpush1.msra.mxu1 %v652_v32  ;;  %v682_v11 = vld [vmem:[#allocation7 + $0x130] sm:$0xff]  ;;  %v681_v12 = vld [vmem:[#allocation7 + $0x128] sm:$0xff]  ;;  %v680_v13 = vld [vmem:[#allocation7 + $0x120] sm:$0xff] }
  0x8d   : > { %744 = vmatprep.subr.mxu1 %v651_v33  ;;  %v678_v14 = vld [vmem:[#allocation7 + $0x110] sm:$0xff]  ;;  %v677_v15 = vld [vmem:[#allocation7 + $0x108] sm:$0xff]  ;;  %v676_v16 = vld [vmem:[#allocation7 + $0x100] sm:$0xff] }
  0x8e   : > { %745 = vmatpush1.msra.mxu1 %v650_v35  ;;  %v957_v17 = vld [vmem:[#allocation7 + $0x2f8] sm:$0xff]  ;;  %v956_v18 = vld [vmem:[#allocation7 + $0x2f0] sm:$0xff]  ;;  %v955_v19 = vld [vmem:[#allocation7 + $0x2e8] sm:$0xff] }
  0x8f   : > { %2405 = vmatmul.mubr.msk.f32.gmra.mxu0 %vm391_vm1, %v367_v29  ;;  %746 = vmatprep.subr.mxu1 %v649_v36  ;;  %v954_v20 = vld [vmem:[#allocation7 + $0x2e0] sm:$0xff]  ;;  %v953_v21 = vld [vmem:[#allocation7 + $0x2d8] sm:$0xff]  ;;  %v952_v22 = vld [vmem:[#allocation7 + $0x2d0] sm:$0xff] }
  0x90   : > { %539 = vmatprep.mubr.f32.mxu0 %v2850_v0  ;;  %747 = vmatpush1.msra.mxu1 %v648_v37  ;;  %v951_v23 = vld [vmem:[#allocation7 + $0x2c8] sm:$0xff]  ;;  %v950_v24 = vld [vmem:[#allocation7 + $0x2c0] sm:$0xff]  ;;  %v949_v25 = vld [vmem:[#allocation7 + $0x2b8] sm:$0xff] }
  0x91   : > { %748 = vmatprep.subr.mxu1 %v647_v38  ;;  %1003 = vmatprep.subr.mxu0 %v957_v17  ;;  %v948_v26 = vld [vmem:[#allocation7 + $0x2b0] sm:$0xff]  ;;  %v947_v27 = vld [vmem:[#allocation7 + $0x2a8] sm:$0xff]  ;;  %v946_v28 = vld [vmem:[#allocation7 + $0x2a0] sm:$0xff] }
  0x92   : > { %749 = vmatpush1.msra.mxu1 %v646_v40  ;;  %1004 = vmatpush1.msra.mxu0 %v956_v18  ;;  %v945_v29 = vld [vmem:[#allocation7 + $0x298] sm:$0xff]  ;;  %v944_v30 = vld [vmem:[#allocation7 + $0x290] sm:$0xff]  ;;  %v943_v31 = vld [vmem:[#allocation7 + $0x288] sm:$0xff] }
  0x93   : > { %2406 = vmatmul.mubr.msk.f32.gmra.mxu0 %vm391_vm1, %v368_v34  ;;  %750 = vmatprep.subr.mxu1 %v645_v41  ;;  %v942_v32 = vld [vmem:[#allocation7 + $0x280] sm:$0xff]  ;;  %v941_v33 = vld [vmem:[#allocation7 + $0x278] sm:$0xff]  ;;  %v940_v34 = vld [vmem:[#allocation7 + $0x270] sm:$0xff] }
  0x94   : > { %545 = vmatprep.mubr.f32.mxu0 %v2850_v0  ;;  %751 = vmatpush1.msra.mxu1 %v644_v42  ;;  %v939_v35 = vld [vmem:[#allocation7 + $0x268] sm:$0xff]  ;;  %v938_v36 = vld [vmem:[#allocation7 + $0x260] sm:$0xff]  ;;  %v937_v37 = vld [vmem:[#allocation7 + $0x258] sm:$0xff] }
  0x95   : > { %752 = vmatprep.subr.mxu1 %v707_v43  ;;  %1005 = vmatprep.subr.mxu0 %v955_v19  ;;  %v936_v38 = vld [vmem:[#allocation7 + $0x250] sm:$0xff]  ;;  %v934_v40 = vld [vmem:[#allocation7 + $0x240] sm:$0xff]  ;;  %v933_v41 = vld [vmem:[#allocation7 + $0x238] sm:$0xff] }
  0x96   : > { %753 = vmatpush2.msra.mxu1 %v706_v45  ;;  %1006 = vmatpush1.msra.mxu0 %v954_v20  ;;  %v932_v42 = vld [vmem:[#allocation7 + $0x230] sm:$0xff]  ;;  %v931_v43 = vld [vmem:[#allocation7 + $0x228] sm:$0xff]  ;;  %v929_v45 = vld [vmem:[#allocation7 + $0x218] sm:$0xff] }
  0x97   : > { %2407 = vmatmul.mubr.msk.f32.gmra.mxu0 %vm391_vm1, %v369_v39  ;;  %754 = vmatprep.subr.mxu1 %v705_v46  ;;  %v935_v39 = vld [vmem:[#allocation7 + $0x248] sm:$0xff]  ;;  %v928_v46 = vld [vmem:[#allocation7 + $0x210] sm:$0xff] }
  0x98   : > { %551 = vmatprep.mubr.f32.mxu0 %v2850_v0  ;;  %755 = vmatpush2.msra.mxu1 %v704_v47  ;;  %v927_v47 = vld [vmem:[#allocation7 + $0x208] sm:$0xff] }
  0x99   : > { %756 = vmatprep.subr.mxu1 %v703_v48  ;;  %1007 = vmatprep.subr.mxu0 %v953_v21  ;;  %v926_v48 = vld [vmem:[#allocation7 + $0x200] sm:$0xff] }
  0x9a   : > { %757 = vmatpush2.msra.mxu1 %v702_v50  ;;  %1008 = vmatpush1.msra.mxu0 %v952_v22  ;;  %v988_v50 = vld [vmem:[#allocation7 + $0x3f0] sm:$0xff] }
  0x9b   : > { %2408 = vmatmul.mubr.msk.f32.gmra.mxu0 %vm391_vm1, %v370_v44  ;;  %758 = vmatprep.subr.mxu1 %v701_v51  ;;  %v930_v44 = vld [vmem:[#allocation7 + $0x220] sm:$0xff]  ;;  %v987_v51 = vld [vmem:[#allocation7 + $0x3e8] sm:$0xff] }
  0x9c   : > { %557 = vmatprep.mubr.f32.mxu0 %v2850_v0  ;;  %759 = vmatpush2.msra.mxu1 %v700_v52  ;;  %v986_v52 = vld [vmem:[#allocation7 + $0x3e0] sm:$0xff] }
  0x9d   : > { %760 = vmatprep.subr.mxu1 %v699_v53  ;;  %1009 = vmatprep.subr.mxu0 %v951_v23  ;;  %v985_v53 = vld [vmem:[#allocation7 + $0x3d8] sm:$0xff] }
  0x9e   : > { %761 = vmatpush2.msra.mxu1 %v698_v55  ;;  %1010 = vmatpush1.msra.mxu0 %v950_v24  ;;  %v983_v55 = vld [vmem:[#allocation7 + $0x3c8] sm:$0xff] }
  0x9f   : > { %2409 = vmatmul.mubr.msk.f32.gmra.mxu0 %vm391_vm1, %v371_v49  ;;  %762 = vmatprep.subr.mxu1 %v697_v56  ;;  %v989_v49 = vld [vmem:[#allocation7 + $0x3f8] sm:$0xff]  ;;  %v982_v56 = vld [vmem:[#allocation7 + $0x3c0] sm:$0xff] }
  0xa0   : > { %563 = vmatprep.mubr.f32.mxu0 %v2850_v0  ;;  %763 = vmatpush2.msra.mxu1 %v696_v57  ;;  %v981_v57 = vld [vmem:[#allocation7 + $0x3b8] sm:$0xff] }
  0xa1   : > { %764 = vmatprep.subr.mxu1 %v695_v58  ;;  %1011 = vmatprep.subr.mxu0 %v949_v25  ;;  %v980_v58 = vld [vmem:[#allocation7 + $0x3b0] sm:$0xff] }
  0xa2   : > { %765 = vmatpush2.msra.mxu1 %v694_v60  ;;  %1012 = vmatpush1.msra.mxu0 %v948_v26  ;;  %v978_v60 = vld [vmem:[#allocation7 + $0x3a0] sm:$0xff] }
  0xa3   : > { %2410 = vmatmul.mubr.msk.f32.gmra.mxu0 %vm391_vm1, %v372_v54  ;;  %766 = vmatprep.subr.mxu1 %v693_v61  ;;  %v984_v54 = vld [vmem:[#allocation7 + $0x3d0] sm:$0xff]  ;;  %v977_v61 = vld [vmem:[#allocation7 + $0x398] sm:$0xff] }
  0xa4   : > { %569 = vmatprep.mubr.f32.mxu0 %v2850_v0  ;;  %767 = vmatpush2.msra.mxu1 %v692_v62  ;;  %v976_v62 = vld [vmem:[#allocation7 + $0x390] sm:$0xff] }
  0xa5   : > { %768 = vmatprep.subr.mxu1 %v691_v63  ;;  %1013 = vmatprep.subr.mxu0 %v947_v27  ;;  %v975_v63 = vld [vmem:[#allocation7 + $0x388] sm:$0xff] }
  0xa6   : > { %769 = vmatpush2.msra.mxu1 %v690_v2  ;;  %1014 = vmatpush1.msra.mxu0 %v946_v28  ;;  %v973_v2 = vld [vmem:[#allocation7 + $0x378] sm:$0xff] }
  0xa7   : > { %2411 = vmatmul.mubr.msk.f32.gmra.mxu0 %vm391_vm1, %v373_v59  ;;  %770 = vmatprep.subr.mxu1 %v689_v3  ;;  %v979_v59 = vld [vmem:[#allocation7 + $0x3a8] sm:$0xff]  ;;  %v972_v3 = vld [vmem:[#allocation7 + $0x370] sm:$0xff] }
  0xa8   : > { %575 = vmatprep.mubr.f32.mxu0 %v2850_v0  ;;  %771 = vmatpush2.msra.mxu1 %v688_v4  ;;  %v971_v4 = vld [vmem:[#allocation7 + $0x368] sm:$0xff] }
  0xa9   : > { %772 = vmatprep.subr.mxu1 %v687_v5  ;;  %1015 = vmatprep.subr.mxu0 %v945_v29  ;;  %v970_v5 = vld [vmem:[#allocation7 + $0x360] sm:$0xff] }
  0xaa   : > { %773 = vmatpush2.msra.mxu1 %v686_v7  ;;  %1016 = vmatpush1.msra.mxu0 %v944_v30  ;;  %v379_v7 = vlaneseq }
  0xab   : > { %2412 = vmatmul.mubr.msk.f32.gmra.mxu0 %vm391_vm1, %v374_v1  ;;  %774 = vmatprep.subr.mxu1 %v685_v8  ;;  %v974_v1 = vld [vmem:[#allocation7 + $0x380] sm:$0xff]  ;;  %v968_v8 = vld [vmem:[#allocation7 + $0x350] sm:$0xff] }
  0xac   : > { %581 = vmatprep.mubr.f32.mxu0 %v2850_v0  ;;  %775 = vmatpush2.msra.mxu1 %v684_v9  ;;  %v679_v0 = vld [vmem:[#allocation7 + $0x118] sm:$0xff]  ;;  %v380_v9 = vshrl.u32 %v379_v7, 7 }
  0xad   : > { %776 = vmatprep.subr.mxu1 %v683_v10  ;;  %1017 = vmatprep.subr.mxu0 %v943_v31 }
  0xae   : > { %777 = vmatpush2.msra.mxu1 %v682_v11  ;;  %1018 = vmatpush1.msra.mxu0 %v942_v32  ;;  %v3069_v10 = vsub.s32 0, %v380_v9  ;;  %v377_v11 = vld [vmem:[#allocation5] sm:$0x3] }
  0xaf   : > { %2413 = vmatmul.mubr.msk.f32.gmra.mxu0 %vm391_vm1, %v375_v6  ;;  %778 = vmatprep.subr.mxu1 %v681_v12  ;;  %v969_v6 = vld [vmem:[#allocation7 + $0x358] sm:$0xff]  ;;  %v3071_v12 = vsub.s32 1, %v380_v9 }
  0xb0   : > { %779 = vmatpush2.msra.mxu1 %v680_v13  ;;  %1019 = vmatprep.subr.mxu0 %v941_v33  ;;  %v3074_v13 = vrot.slane %v377_v11, %v3069_v10 }
  0xb1   : > { %780 = vmatprep.subr.mxu1 %v679_v0  ;;  %1020 = vmatpush1.msra.mxu0 %v940_v34  ;;  %v3077_v0 = vrot.slane %v377_v11, %v3071_v12 }
  0xb2   : > { %781 = vmatpush2.msra.mxu1 %v678_v14  ;;  %1021 = vmatprep.subr.mxu0 %v939_v35 }
  0xb3   : > { %782 = vmatprep.subr.mxu1 %v677_v15  ;;  %1022 = vmatpush1.msra.mxu0 %v938_v36 }
  0xb4   : > { %783 = vmatpush2.msra.mxu1 %v676_v16  ;;  %1023 = vmatprep.subr.mxu0 %v937_v37 }
  0xb5   : > { %1024 = vmatpush1.msra.mxu0 %v936_v38 }
  0xb6   : > { %1025 = vmatprep.subr.mxu0 %v935_v39 }
  0xb7   : > { %1026 = vmatpush1.msra.mxu0 %v934_v40 }
  0xb8   : > { %1027 = vmatprep.subr.mxu0 %v933_v41 }
  0xb9   : > { %1028 = vmatpush1.msra.mxu0 %v932_v42 }
  0xba   : > { %1029 = vmatprep.subr.mxu0 %v931_v43 }
  0xbb   : > { %1030 = vmatpush1.msra.mxu0 %v930_v44 }
  0xbc   : > { %1031 = vmatprep.subr.mxu0 %v929_v45 }
  0xbd   : > { %1032 = vmatpush1.msra.mxu0 %v928_v46 }
  0xbe   : > { %1033 = vmatprep.subr.mxu0 %v927_v47 }
  0xbf   : > { %1034 = vmatpush1.msra.mxu0 %v926_v48 }
  0xc0   : > { %1035 = vmatprep.subr.mxu0 %v989_v49 }
  0xc1   : > { %1036 = vmatpush2.msra.mxu0 %v988_v50 }
  0xc2   : > { %1037 = vmatprep.subr.mxu0 %v987_v51 }
  0xc3   : > { %1038 = vmatpush2.msra.mxu0 %v986_v52 }
  0xc4   : > { %1039 = vmatprep.subr.mxu0 %v985_v53 }
  0xc5   : > { %1040 = vmatpush2.msra.mxu0 %v984_v54 }
  0xc6   : > { %1041 = vmatprep.subr.mxu0 %v983_v55 }
  0xc7   : > { %1042 = vmatpush2.msra.mxu0 %v982_v56 }
  0xc8   : > { %1043 = vmatprep.subr.mxu0 %v981_v57 }
  0xc9   : > { %1044 = vmatpush2.msra.mxu0 %v980_v58 }
  0xca   : > { %1045 = vmatprep.subr.mxu0 %v979_v59 }
  0xcb   : > { %1046 = vmatpush2.msra.mxu0 %v978_v60 }
  0xcc   : > { %1047 = vmatprep.subr.mxu0 %v977_v61 }
  0xcd   : > { %1048 = vmatpush2.msra.mxu0 %v976_v62 }
  0xce   : > { %1049 = vmatprep.subr.mxu0 %v975_v63 }
  0xcf   : > { %1050 = vmatpush2.msra.mxu0 %v974_v1 }
  0xd0   : > { %1051 = vmatprep.subr.mxu0 %v973_v2 }
  0xd1   : > { %1052 = vmatpush2.msra.mxu0 %v972_v3 }
  0xd2   : > { %1053 = vmatprep.subr.mxu0 %v971_v4 }
  0xd3   : > { %1054 = vmatpush2.msra.mxu0 %v970_v5 }
  0xd4   : > { %1055 = vmatprep.subr.mxu0 %v969_v6 }
  0xd5   : > { %1056 = vmatpush2.msra.mxu0 %v968_v8 }
 0x13b   : > { %v505_v14 = vpop.f32.mrf.mxu0 }
 0x13c   : > { %v506_v15 = vadd.f32 %v505_v14, %v3074_v13 }
 0x13d   : > { %v507_v16 = vpop.f32.mrf.mxu0 }
 0x13e   : > { %v508_v17 = vadd.f32 %v507_v16, %v3077_v0  ;;  %v588_v18 = vmul.f32 0.2, %v506_v15 }
 0x13f   : > { %v511_v19 = vpop.f32.mrf.mxu0 }
 0x140   : > { %v512_v20 = vadd.f32 %v511_v19, %v3074_v13  ;;  %v589_v21 = vmul.f32 0.2, %v508_v17  ;;  %v616_v25 = vmax.f32 %v506_v15, %v588_v18 }
 0x141   : > { %v513_v22 = vpop.f32.mrf.mxu0 }
 0x142   : > { %v514_v23 = vadd.f32 %v513_v22, %v3077_v0  ;;  %v617_v24 = vmax.f32 %v508_v17, %v589_v21  ;;  %v590_v26 = vmul.f32 0.2, %v512_v20 }
 0x143   : > { %v517_v27 = vpop.f32.mrf.mxu0 }
 0x144   : > { %v591_v28 = vmul.f32 0.2, %v514_v23  ;;  %v518_v29 = vadd.f32 %v517_v27, %v3074_v13  ;;  %784 = vmatprep.mubr.f32.mxu1 %v617_v24  ;;  %v618_v33 = vmax.f32 %v512_v20, %v590_v26 }
 0x145   : > { %v519_v30 = vpop.f32.mrf.mxu0  ;;  %785 = vmatmul.mubr.f32.vlgmr.msra.gmra.mxu1 %v616_v25 }
 0x146   : > { %v619_v31 = vmax.f32 %v514_v23, %v591_v28  ;;  %v520_v32 = vadd.f32 %v519_v30, %v3077_v0  ;;  %v592_v34 = vmul.f32 0.2, %v518_v29 }
 0x147   : > { %v523_v35 = vpop.f32.mrf.mxu0 }
 0x148   : > { %v593_v36 = vmul.f32 0.2, %v520_v32  ;;  %v524_v37 = vadd.f32 %v523_v35, %v3074_v13  ;;  %790 = vmatprep.mubr.f32.mxu1 %v619_v31  ;;  %v620_v41 = vmax.f32 %v518_v29, %v592_v34 }
 0x149   : > { %v525_v38 = vpop.f32.mrf.mxu0  ;;  %791 = vmatmul.mubr.f32.gmra.mxu1 %v618_v33 }
 0x14a   : > { %v621_v39 = vmax.f32 %v520_v32, %v593_v36  ;;  %v526_v40 = vadd.f32 %v525_v38, %v3077_v0  ;;  %v594_v42 = vmul.f32 0.2, %v524_v37 }
 0x14b   : > { %v529_v43 = vpop.f32.mrf.mxu0 }
 0x14c   : > { %v595_v44 = vmul.f32 0.2, %v526_v40  ;;  %v530_v45 = vadd.f32 %v529_v43, %v3074_v13  ;;  %796 = vmatprep.mubr.f32.mxu1 %v621_v39  ;;  %v622_v49 = vmax.f32 %v524_v37, %v594_v42 }
 0x14d   : > { %v531_v46 = vpop.f32.mrf.mxu0  ;;  %797 = vmatmul.mubr.f32.gmra.mxu1 %v620_v41 }
 0x14e   : > { %v623_v47 = vmax.f32 %v526_v40, %v595_v44  ;;  %v532_v48 = vadd.f32 %v531_v46, %v3077_v0  ;;  %v596_v50 = vmul.f32 0.2, %v530_v45 }
 0x14f   : > { %v535_v51 = vpop.f32.mrf.mxu0 }
 0x150   : > { %v597_v52 = vmul.f32 0.2, %v532_v48  ;;  %v536_v53 = vadd.f32 %v535_v51, %v3074_v13  ;;  %802 = vmatprep.mubr.f32.mxu1 %v623_v47  ;;  %v624_v57 = vmax.f32 %v530_v45, %v596_v50 }
 0x151   : > { %v537_v54 = vpop.f32.mrf.mxu0  ;;  %803 = vmatmul.mubr.f32.gmra.mxu1 %v622_v49 }
 0x152   : > { %v625_v55 = vmax.f32 %v532_v48, %v597_v52  ;;  %v538_v56 = vadd.f32 %v537_v54, %v3077_v0  ;;  %v598_v58 = vmul.f32 0.2, %v536_v53 }
 0x153   : > { %v541_v59 = vpop.f32.mrf.mxu0 }
 0x154   : > { %v599_v60 = vmul.f32 0.2, %v538_v56  ;;  %v542_v61 = vadd.f32 %v541_v59, %v3074_v13  ;;  %808 = vmatprep.mubr.f32.mxu1 %v625_v55  ;;  %v626_v2 = vmax.f32 %v536_v53, %v598_v58 }
 0x155   : > { %v543_v62 = vpop.f32.mrf.mxu0  ;;  %809 = vmatmul.mubr.f32.gmra.mxu1 %v624_v57 }
 0x156   : > { %v627_v63 = vmax.f32 %v538_v56, %v599_v60  ;;  %v544_v1 = vadd.f32 %v543_v62, %v3077_v0  ;;  %v600_v3 = vmul.f32 0.2, %v542_v61 }
 0x157   : > { %v547_v4 = vpop.f32.mrf.mxu0 }
 0x158   : > { %v601_v5 = vmul.f32 0.2, %v544_v1  ;;  %v548_v6 = vadd.f32 %v547_v4, %v3074_v13  ;;  %814 = vmatprep.mubr.f32.mxu1 %v627_v63  ;;  %v628_v11 = vmax.f32 %v542_v61, %v600_v3  ;;  %v967_v3 = vld [vmem:[#allocation7 + $0x348] sm:$0xff]  ;;  %v966_v4 = vld [vmem:[#allocation7 + $0x340] sm:$0xff] }
 0x159   : > { %v549_v7 = vpop.f32.mrf.mxu0  ;;  %815 = vmatmul.mubr.f32.gmra.mxu1 %v626_v2  ;;  %1057 = vmatprep.subr.mxu0 %v967_v3  ;;  %v1252_v3 = vld [vmem:[#allocation7 + $0x558] sm:$0xff] }
 0x15a   : > { %v629_v8 = vmax.f32 %v544_v1, %v601_v5  ;;  %v550_v9 = vadd.f32 %v549_v7, %v3077_v0  ;;  %v602_v14 = vmul.f32 0.2, %v548_v6  ;;  %1058 = vmatpush2.msra.mxu0 %v966_v4  ;;  %v964_v5 = vld [vmem:[#allocation7 + $0x330] sm:$0xff]  ;;  %v961_v7 = vld [vmem:[#allocation7 + $0x318] sm:$0xff] }
 0x15b   : > { %v553_v15 = vpop.f32.mrf.mxu0  ;;  %v1251_v4 = vld [vmem:[#allocation7 + $0x550] sm:$0xff] }
 0x15c   : > { %v603_v16 = vmul.f32 0.2, %v550_v9  ;;  %v554_v17 = vadd.f32 %v553_v15, %v3074_v13  ;;  %820 = vmatprep.mubr.f32.mxu1 %v629_v8  ;;  %v630_v21 = vmax.f32 %v548_v6, %v602_v14  ;;  %v963_v6 = vld [vmem:[#allocation7 + $0x328] sm:$0xff]  ;;  %v960_v8 = vld [vmem:[#allocation7 + $0x310] sm:$0xff]  ;;  %v1240_v14 = vld [vmem:[#allocation7 + $0x4f8] sm:$0xff] }
 0x15d   : > { %v555_v18 = vpop.f32.mrf.mxu0  ;;  %821 = vmatmul.mubr.f32.gmra.mxu1 %v628_v11  ;;  %v958_v11 = vld [vmem:[#allocation7 + $0x300] sm:$0xff]  ;;  %v1239_v15 = vld [vmem:[#allocation7 + $0x4f0] sm:$0xff]  ;;  %1286 = vmatprep.subr.mxu1 %v1240_v14 }
 0x15e   : > { %v631_v19 = vmax.f32 %v550_v9, %v603_v16  ;;  %v556_v20 = vadd.f32 %v555_v18, %v3077_v0  ;;  %v604_v22 = vmul.f32 0.2, %v554_v17  ;;  %v959_v9 = vld [vmem:[#allocation7 + $0x308] sm:$0xff]  ;;  %1287 = vmatpush1.msra.mxu1 %v1239_v15  ;;  %v1236_v18 = vld [vmem:[#allocation7 + $0x4d8] sm:$0xff] }
 0x15f   : > { %v559_v23 = vpop.f32.mrf.mxu0  ;;  %v1238_v16 = vld [vmem:[#allocation7 + $0x4e8] sm:$0xff] }
 0x160   : > { %v605_v24 = vmul.f32 0.2, %v556_v20  ;;  %v560_v25 = vadd.f32 %v559_v23, %v3074_v13  ;;  %826 = vmatprep.mubr.f32.mxu1 %v631_v19  ;;  %v632_v29 = vmax.f32 %v554_v17, %v604_v22  ;;  %v1237_v17 = vld [vmem:[#allocation7 + $0x4e0] sm:$0xff]  ;;  %1288 = vmatprep.subr.mxu1 %v1238_v16  ;;  %v1235_v19 = vld [vmem:[#allocation7 + $0x4d0] sm:$0xff]  ;;  %v1232_v22 = vld [vmem:[#allocation7 + $0x4b8] sm:$0xff] }
 0x161   : > { %v561_v26 = vpop.f32.mrf.mxu0  ;;  %827 = vmatmul.mubr.f32.gmra.mxu1 %v630_v21  ;;  %v1233_v21 = vld [vmem:[#allocation7 + $0x4c0] sm:$0xff]  ;;  %v1231_v23 = vld [vmem:[#allocation7 + $0x4b0] sm:$0xff] }
 0x162   : > { %v633_v27 = vmax.f32 %v556_v20, %v605_v24  ;;  %v562_v28 = vadd.f32 %v561_v26, %v3077_v0  ;;  %v606_v30 = vmul.f32 0.2, %v560_v25  ;;  %1289 = vmatpush1.msra.mxu1 %v1237_v17  ;;  %v1234_v20 = vld [vmem:[#allocation7 + $0x4c8] sm:$0xff]  ;;  %v1228_v26 = vld [vmem:[#allocation7 + $0x498] sm:$0xff] }
 0x163   : > { %v565_v31 = vpop.f32.mrf.mxu0  ;;  %1290 = vmatprep.subr.mxu1 %v1236_v18  ;;  %v1230_v24 = vld [vmem:[#allocation7 + $0x4a8] sm:$0xff] }
 0x164   : > { %v607_v32 = vmul.f32 0.2, %v562_v28  ;;  %v566_v33 = vadd.f32 %v565_v31, %v3074_v13  ;;  %832 = vmatprep.mubr.f32.mxu1 %v633_v27  ;;  %v634_v37 = vmax.f32 %v560_v25, %v606_v30  ;;  %1291 = vmatpush1.msra.mxu1 %v1235_v19  ;;  %v1229_v25 = vld [vmem:[#allocation7 + $0x4a0] sm:$0xff]  ;;  %v1227_v27 = vld [vmem:[#allocation7 + $0x490] sm:$0xff]  ;;  %v1224_v30 = vld [vmem:[#allocation7 + $0x478] sm:$0xff] }
 0x165   : > { %v567_v34 = vpop.f32.mrf.mxu0  ;;  %833 = vmatmul.mubr.f32.gmra.mxu1 %v632_v29  ;;  %1292 = vmatprep.subr.mxu1 %v1234_v20  ;;  %v1225_v29 = vld [vmem:[#allocation7 + $0x480] sm:$0xff]  ;;  %v1223_v31 = vld [vmem:[#allocation7 + $0x470] sm:$0xff] }
 0x166   : > { %v635_v35 = vmax.f32 %v562_v28, %v607_v32  ;;  %v568_v36 = vadd.f32 %v567_v34, %v3077_v0  ;;  %v608_v38 = vmul.f32 0.2, %v566_v33  ;;  %1293 = vmatpush1.msra.mxu1 %v1233_v21  ;;  %v1226_v28 = vld [vmem:[#allocation7 + $0x488] sm:$0xff]  ;;  %v1220_v34 = vld [vmem:[#allocation7 + $0x458] sm:$0xff] }
 0x167   : > { %v571_v39 = vpop.f32.mrf.mxu0  ;;  %1294 = vmatprep.subr.mxu1 %v1232_v22  ;;  %v1222_v32 = vld [vmem:[#allocation7 + $0x468] sm:$0xff] }
 0x168   : > { %v609_v40 = vmul.f32 0.2, %v568_v36  ;;  %v572_v41 = vadd.f32 %v571_v39, %v3074_v13  ;;  %838 = vmatprep.mubr.f32.mxu1 %v635_v35  ;;  %v636_v45 = vmax.f32 %v566_v33, %v608_v38  ;;  %1295 = vmatpush1.msra.mxu1 %v1231_v23  ;;  %v1221_v33 = vld [vmem:[#allocation7 + $0x460] sm:$0xff]  ;;  %v1219_v35 = vld [vmem:[#allocation7 + $0x450] sm:$0xff]  ;;  %v1216_v38 = vld [vmem:[#allocation7 + $0x438] sm:$0xff] }
 0x169   : > { %v573_v42 = vpop.f32.mrf.mxu0  ;;  %839 = vmatmul.mubr.f32.gmra.mxu1 %v634_v37  ;;  %1296 = vmatprep.subr.mxu1 %v1230_v24  ;;  %v1217_v37 = vld [vmem:[#allocation7 + $0x440] sm:$0xff]  ;;  %v1215_v39 = vld [vmem:[#allocation7 + $0x430] sm:$0xff] }
 0x16a   : > { %v637_v43 = vmax.f32 %v568_v36, %v609_v40  ;;  %v574_v44 = vadd.f32 %v573_v42, %v3077_v0  ;;  %v610_v46 = vmul.f32 0.2, %v572_v41  ;;  %1297 = vmatpush1.msra.mxu1 %v1229_v25  ;;  %v1218_v36 = vld [vmem:[#allocation7 + $0x448] sm:$0xff]  ;;  %v1212_v42 = vld [vmem:[#allocation7 + $0x418] sm:$0xff] }
 0x16b   : > { %v577_v47 = vpop.f32.mrf.mxu0  ;;  %1298 = vmatprep.subr.mxu1 %v1228_v26  ;;  %v1214_v40 = vld [vmem:[#allocation7 + $0x428] sm:$0xff] }
 0x16c   : > { %v611_v48 = vmul.f32 0.2, %v574_v44  ;;  %v578_v49 = vadd.f32 %v577_v47, %v3074_v13  ;;  %844 = vmatprep.mubr.f32.mxu1 %v637_v43  ;;  %v638_v53 = vmax.f32 %v572_v41, %v610_v46  ;;  %1299 = vmatpush1.msra.mxu1 %v1227_v27  ;;  %v1213_v41 = vld [vmem:[#allocation7 + $0x420] sm:$0xff]  ;;  %v1211_v43 = vld [vmem:[#allocation7 + $0x410] sm:$0xff]  ;;  %v1272_v46 = vld [vmem:[#allocation7 + $0x5f8] sm:$0xff] }
 0x16d   : > { %v579_v50 = vpop.f32.mrf.mxu0  ;;  %845 = vmatmul.mubr.f32.gmra.mxu1 %v636_v45  ;;  %1300 = vmatprep.subr.mxu1 %v1226_v28  ;;  %v1209_v45 = vld [vmem:[#allocation7 + $0x400] sm:$0xff]  ;;  %v1271_v47 = vld [vmem:[#allocation7 + $0x5f0] sm:$0xff] }
 0x16e   : > { %v639_v51 = vmax.f32 %v574_v44, %v611_v48  ;;  %v580_v52 = vadd.f32 %v579_v50, %v3077_v0  ;;  %v612_v54 = vmul.f32 0.2, %v578_v49  ;;  %1301 = vmatpush1.msra.mxu1 %v1225_v29  ;;  %v1210_v44 = vld [vmem:[#allocation7 + $0x408] sm:$0xff]  ;;  %v1268_v50 = vld [vmem:[#allocation7 + $0x5d8] sm:$0xff] }
 0x16f   : > { %v583_v55 = vpop.f32.mrf.mxu0  ;;  %1302 = vmatprep.subr.mxu1 %v1224_v30  ;;  %v1270_v48 = vld [vmem:[#allocation7 + $0x5e8] sm:$0xff] }
 0x170   : > { %v613_v56 = vmul.f32 0.2, %v580_v52  ;;  %v584_v57 = vadd.f32 %v583_v55, %v3074_v13  ;;  %850 = vmatprep.mubr.f32.mxu1 %v639_v51  ;;  %v640_v61 = vmax.f32 %v578_v49, %v612_v54  ;;  %v965_v13 = vld [vmem:[#allocation7 + $0x338] sm:$0xff]  ;;  %1303 = vmatpush1.msra.mxu1 %v1223_v31  ;;  %v1269_v49 = vld [vmem:[#allocation7 + $0x5e0] sm:$0xff]  ;;  %v1267_v51 = vld [vmem:[#allocation7 + $0x5d0] sm:$0xff] }
 0x171   : > { %v585_v58 = vpop.f32.mrf.mxu0  ;;  %851 = vmatmul.mubr.f32.gmra.mxu1 %v638_v53  ;;  %1059 = vmatprep.subr.mxu0 %v965_v13  ;;  %v1265_v53 = vld [vmem:[#allocation7 + $0x5c0] sm:$0xff]  ;;  %v1264_v54 = vld [vmem:[#allocation7 + $0x5b8] sm:$0xff]  ;;  %v1263_v55 = vld [vmem:[#allocation7 + $0x5b0] sm:$0xff] }
 0x172   : > { %v641_v59 = vmax.f32 %v580_v52, %v613_v56  ;;  %v586_v60 = vadd.f32 %v585_v58, %v3077_v0  ;;  %v614_v62 = vmul.f32 0.2, %v584_v57  ;;  %1060 = vmatpush2.msra.mxu0 %v964_v5  ;;  %v962_v0 = vld [vmem:[#allocation7 + $0x320] sm:$0xff]  ;;  %1304 = vmatprep.subr.mxu1 %v1222_v32  ;;  %v1266_v52 = vld [vmem:[#allocation7 + $0x5c8] sm:$0xff]  ;;  %v1260_v58 = vld [vmem:[#allocation7 + $0x598] sm:$0xff] }
 0x173   : > { %1061 = vmatprep.subr.mxu0 %v963_v6  ;;  %1305 = vmatpush1.msra.mxu1 %v1221_v33  ;;  %v1262_v56 = vld [vmem:[#allocation7 + $0x5a8] sm:$0xff]  ;;  %v708_v13 = vld [vmem:[#allocation8] sm:$0x3] }
 0x174   : > { %v615_v63 = vmul.f32 0.2, %v586_v60  ;;  %856 = vmatprep.mubr.f32.mxu1 %v641_v59  ;;  %v642_v2 = vmax.f32 %v584_v57, %v614_v62  ;;  %1062 = vmatpush2.msra.mxu0 %v962_v0  ;;  %v1261_v57 = vld [vmem:[#allocation7 + $0x5a0] sm:$0xff]  ;;  %v1259_v59 = vld [vmem:[#allocation7 + $0x590] sm:$0xff]  ;;  %v1256_v62 = vld [vmem:[#allocation7 + $0x578] sm:$0xff]  ;;  %v3108_v5 = vrot.slane %v708_v13, %v3069_v10  ;;  %v3111_v6 = vrot.slane %v708_v13, %v3071_v12 }
 0x175   : > { %857 = vmatmul.mubr.f32.gmra.mxu1 %v640_v61  ;;  %1063 = vmatprep.subr.mxu0 %v961_v7  ;;  %v1257_v61 = vld [vmem:[#allocation7 + $0x580] sm:$0xff] }
 0x176   : > { %v643_v1 = vmax.f32 %v586_v60, %v615_v63  ;;  %1064 = vmatpush2.msra.mxu0 %v960_v8  ;;  %1306 = vmatprep.subr.mxu1 %v1220_v34  ;;  %v1258_v60 = vld [vmem:[#allocation7 + $0x588] sm:$0xff]  ;;  %v1255_v63 = vld [vmem:[#allocation7 + $0x570] sm:$0xff] }
 0x177   : > { %1065 = vmatprep.subr.mxu0 %v959_v9  ;;  %1307 = vmatpush1.msra.mxu1 %v1219_v35 }
 0x178   : > { %862 = vmatprep.mubr.f32.mxu1 %v643_v1  ;;  %1066 = vmatpush2.msra.mxu0 %v958_v11  ;;  %v1254_v1 = vld [vmem:[#allocation7 + $0x568] sm:$0xff] }
 0x179   : > { %863 = vmatmul.mubr.f32.gmra.mxu1 %v642_v2  ;;  %1308 = vmatprep.subr.mxu1 %v1218_v36  ;;  %v1253_v2 = vld [vmem:[#allocation7 + $0x560] sm:$0xff] }
 0x17a   : > { %1309 = vmatpush1.msra.mxu1 %v1217_v37 }
 0x17b   : > { %1310 = vmatprep.subr.mxu1 %v1216_v38 }
 0x17c   : > { %1311 = vmatpush1.msra.mxu1 %v1215_v39 }
 0x17d   : > { %1312 = vmatprep.subr.mxu1 %v1214_v40 }
 0x17e   : > { %1313 = vmatpush1.msra.mxu1 %v1213_v41 }
 0x17f   : > { %1314 = vmatprep.subr.mxu1 %v1212_v42 }
 0x180   : > { %1315 = vmatpush1.msra.mxu1 %v1211_v43 }
 0x181   : > { %1316 = vmatprep.subr.mxu1 %v1210_v44 }
 0x182   : > { %1317 = vmatpush1.msra.mxu1 %v1209_v45 }
 0x183   : > { %1318 = vmatprep.subr.mxu1 %v1272_v46 }
 0x184   : > { %1319 = vmatpush2.msra.mxu1 %v1271_v47 }
 0x185   : > { %1320 = vmatprep.subr.mxu1 %v1270_v48 }
 0x186   : > { %1321 = vmatpush2.msra.mxu1 %v1269_v49 }
 0x187   : > { %1322 = vmatprep.subr.mxu1 %v1268_v50 }
 0x188   : > { %1323 = vmatpush2.msra.mxu1 %v1267_v51 }
 0x189   : > { %1324 = vmatprep.subr.mxu1 %v1266_v52 }
 0x18a   : > { %1325 = vmatpush2.msra.mxu1 %v1265_v53 }
 0x18b   : > { %1326 = vmatprep.subr.mxu1 %v1264_v54 }
 0x18c   : > { %1327 = vmatpush2.msra.mxu1 %v1263_v55 }
 0x18d   : > { %1328 = vmatprep.subr.mxu1 %v1262_v56 }
 0x18e   : > { %1329 = vmatpush2.msra.mxu1 %v1261_v57 }
 0x18f   : > { %1330 = vmatprep.subr.mxu1 %v1260_v58 }
 0x190   : > { %1331 = vmatpush2.msra.mxu1 %v1259_v59 }
 0x191   : > { %1332 = vmatprep.subr.mxu1 %v1258_v60 }
 0x192   : > { %1333 = vmatpush2.msra.mxu1 %v1257_v61 }
 0x193   : > { %1334 = vmatprep.subr.mxu1 %v1256_v62 }
 0x194   : > { %1335 = vmatpush2.msra.mxu1 %v1255_v63 }
 0x195   : > { %1336 = vmatprep.subr.mxu1 %v1254_v1 }
 0x196   : > { %1337 = vmatpush2.msra.mxu1 %v1253_v2 }
 0x197   : > { %1338 = vmatprep.subr.mxu1 %v1252_v3 }
 0x198   : > { %1339 = vmatpush2.msra.mxu1 %v1251_v4 }
 0x205   : > { %v786_v0 = vpop.f32.mrf.mxu1 }
 0x206   : > { %v787_v7 = vadd.f32 %v786_v0, %v3108_v5 }
 0x207   : > { %v788_v8 = vpop.f32.mrf.mxu1 }
 0x208   : > { %v789_v9 = vadd.f32 %v788_v8, %v3111_v6  ;;  %v869_v11 = vmul.f32 0.2, %v787_v7 }
 0x209   : > { %v792_v14 = vpop.f32.mrf.mxu1 }
 0x20a   : > { %v870_v15 = vmul.f32 0.2, %v789_v9  ;;  %v793_v16 = vadd.f32 %v792_v14, %v3108_v5  ;;  %v897_v20 = vmax.f32 %v787_v7, %v869_v11 }
 0x20b   : > { %v794_v17 = vpop.f32.mrf.mxu1 }
 0x20c   : > { %v898_v18 = vmax.f32 %v789_v9, %v870_v15  ;;  %v795_v19 = vadd.f32 %v794_v17, %v3111_v6  ;;  %v871_v21 = vmul.f32 0.2, %v793_v16 }
 0x20d   : > { %v798_v22 = vpop.f32.mrf.mxu1 }
 0x20e   : > { %v872_v23 = vmul.f32 0.2, %v795_v19  ;;  %v799_v24 = vadd.f32 %v798_v22, %v3108_v5  ;;  %1067 = vmatprep.mubr.f32.mxu0 %v898_v18  ;;  %v899_v28 = vmax.f32 %v793_v16, %v871_v21 }
 0x20f   : > { %v800_v25 = vpop.f32.mrf.mxu1  ;;  %1068 = vmatmul.mubr.f32.vlgmr.msra.gmra.mxu0 %v897_v20 }
 0x210   : > { %v900_v26 = vmax.f32 %v795_v19, %v872_v23  ;;  %v801_v27 = vadd.f32 %v800_v25, %v3111_v6  ;;  %v873_v29 = vmul.f32 0.2, %v799_v24 }
 0x211   : > { %v804_v30 = vpop.f32.mrf.mxu1 }
 0x212   : > { %v874_v31 = vmul.f32 0.2, %v801_v27  ;;  %v805_v32 = vadd.f32 %v804_v30, %v3108_v5  ;;  %1073 = vmatprep.mubr.f32.mxu0 %v900_v26  ;;  %v901_v36 = vmax.f32 %v799_v24, %v873_v29 }
 0x213   : > { %v806_v33 = vpop.f32.mrf.mxu1  ;;  %1074 = vmatmul.mubr.f32.gmra.mxu0 %v899_v28 }
 0x214   : > { %v902_v34 = vmax.f32 %v801_v27, %v874_v31  ;;  %v807_v35 = vadd.f32 %v806_v33, %v3111_v6  ;;  %v875_v37 = vmul.f32 0.2, %v805_v32 }
 0x215   : > { %v810_v38 = vpop.f32.mrf.mxu1 }
 0x216   : > { %v876_v39 = vmul.f32 0.2, %v807_v35  ;;  %v811_v40 = vadd.f32 %v810_v38, %v3108_v5  ;;  %1079 = vmatprep.mubr.f32.mxu0 %v902_v34  ;;  %v903_v44 = vmax.f32 %v805_v32, %v875_v37 }
 0x217   : > { %v812_v41 = vpop.f32.mrf.mxu1  ;;  %1080 = vmatmul.mubr.f32.gmra.mxu0 %v901_v36 }
 0x218   : > { %v904_v42 = vmax.f32 %v807_v35, %v876_v39  ;;  %v813_v43 = vadd.f32 %v812_v41, %v3111_v6  ;;  %v877_v45 = vmul.f32 0.2, %v811_v40 }
 0x219   : > { %v816_v46 = vpop.f32.mrf.mxu1 }
 0x21a   : > { %v878_v47 = vmul.f32 0.2, %v813_v43  ;;  %v817_v48 = vadd.f32 %v816_v46, %v3108_v5  ;;  %1085 = vmatprep.mubr.f32.mxu0 %v904_v42  ;;  %v905_v52 = vmax.f32 %v811_v40, %v877_v45 }
 0x21b   : > { %v818_v49 = vpop.f32.mrf.mxu1  ;;  %1086 = vmatmul.mubr.f32.gmra.mxu0 %v903_v44 }
 0x21c   : > { %v906_v50 = vmax.f32 %v813_v43, %v878_v47  ;;  %v819_v51 = vadd.f32 %v818_v49, %v3111_v6  ;;  %v879_v53 = vmul.f32 0.2, %v817_v48 }
 0x21d   : > { %v822_v54 = vpop.f32.mrf.mxu1 }
 0x21e   : > { %v880_v55 = vmul.f32 0.2, %v819_v51  ;;  %v823_v56 = vadd.f32 %v822_v54, %v3108_v5  ;;  %1091 = vmatprep.mubr.f32.mxu0 %v906_v50  ;;  %v907_v60 = vmax.f32 %v817_v48, %v879_v53 }
 0x21f   : > { %v824_v57 = vpop.f32.mrf.mxu1  ;;  %1092 = vmatmul.mubr.f32.gmra.mxu0 %v905_v52 }
 0x220   : > { %v908_v58 = vmax.f32 %v819_v51, %v880_v55  ;;  %v825_v59 = vadd.f32 %v824_v57, %v3111_v6  ;;  %v881_v61 = vmul.f32 0.2, %v823_v56 }
 0x221   : > { %v828_v62 = vpop.f32.mrf.mxu1 }
 0x222   : > { %v882_v63 = vmul.f32 0.2, %v825_v59  ;;  %v829_v1 = vadd.f32 %v828_v62, %v3108_v5  ;;  %1097 = vmatprep.mubr.f32.mxu0 %v908_v58  ;;  %v909_v13 = vmax.f32 %v823_v56, %v881_v61  ;;  %v1250_v61 = vld [vmem:[#allocation7 + $0x548] sm:$0xff]  ;;  %v1249_v62 = vld [vmem:[#allocation7 + $0x540] sm:$0xff] }
 0x223   : > { %v830_v2 = vpop.f32.mrf.mxu1  ;;  %1098 = vmatmul.mubr.f32.gmra.mxu0 %v907_v60  ;;  %1340 = vmatprep.subr.mxu1 %v1250_v61  ;;  %v1535_v61 = vld [vmem:[#allocation7 + $0x758] sm:$0xff] }
 0x224   : > { %v910_v3 = vmax.f32 %v825_v59, %v882_v63  ;;  %v831_v4 = vadd.f32 %v830_v2, %v3111_v6  ;;  %v883_v0 = vmul.f32 0.2, %v829_v1  ;;  %1341 = vmatpush2.msra.mxu1 %v1249_v62  ;;  %v1247_v63 = vld [vmem:[#allocation7 + $0x530] sm:$0xff]  ;;  %v1244_v2 = vld [vmem:[#allocation7 + $0x518] sm:$0xff] }
 0x225   : > { %v834_v7 = vpop.f32.mrf.mxu1  ;;  %v1534_v62 = vld [vmem:[#allocation7 + $0x750] sm:$0xff] }
 0x226   : > { %v884_v8 = vmul.f32 0.2, %v831_v4  ;;  %v835_v9 = vadd.f32 %v834_v7, %v3108_v5  ;;  %1103 = vmatprep.mubr.f32.mxu0 %v910_v3  ;;  %v911_v16 = vmax.f32 %v829_v1, %v883_v0  ;;  %v1246_v1 = vld [vmem:[#allocation7 + $0x528] sm:$0xff]  ;;  %v1243_v3 = vld [vmem:[#allocation7 + $0x510] sm:$0xff]  ;;  %v1523_v0 = vld [vmem:[#allocation7 + $0x6f8] sm:$0xff] }
 0x227   : > { %v836_v11 = vpop.f32.mrf.mxu1  ;;  %1104 = vmatmul.mubr.f32.gmra.mxu0 %v909_v13  ;;  %v1241_v13 = vld [vmem:[#allocation7 + $0x500] sm:$0xff]  ;;  %v1522_v7 = vld [vmem:[#allocation7 + $0x6f0] sm:$0xff]  ;;  %1569 = vmatprep.subr.mxu0 %v1523_v0 }
 0x228   : > { %v912_v14 = vmax.f32 %v831_v4, %v884_v8  ;;  %v837_v15 = vadd.f32 %v836_v11, %v3111_v6  ;;  %v885_v17 = vmul.f32 0.2, %v835_v9  ;;  %v1242_v4 = vld [vmem:[#allocation7 + $0x508] sm:$0xff]  ;;  %1570 = vmatpush1.msra.mxu0 %v1522_v7  ;;  %v1519_v11 = vld [vmem:[#allocation7 + $0x6d8] sm:$0xff] }
 0x229   : > { %v840_v18 = vpop.f32.mrf.mxu1  ;;  %v1521_v8 = vld [vmem:[#allocation7 + $0x6e8] sm:$0xff] }
 0x22a   : > { %v886_v19 = vmul.f32 0.2, %v837_v15  ;;  %v841_v20 = vadd.f32 %v840_v18, %v3108_v5  ;;  %1109 = vmatprep.mubr.f32.mxu0 %v912_v14  ;;  %v913_v24 = vmax.f32 %v835_v9, %v885_v17  ;;  %v1520_v9 = vld [vmem:[#allocation7 + $0x6e0] sm:$0xff]  ;;  %1571 = vmatprep.subr.mxu0 %v1521_v8  ;;  %v1518_v14 = vld [vmem:[#allocation7 + $0x6d0] sm:$0xff]  ;;  %v1515_v17 = vld [vmem:[#allocation7 + $0x6b8] sm:$0xff] }
 0x22b   : > { %v842_v21 = vpop.f32.mrf.mxu1  ;;  %1110 = vmatmul.mubr.f32.gmra.mxu0 %v911_v16  ;;  %v1516_v16 = vld [vmem:[#allocation7 + $0x6c0] sm:$0xff]  ;;  %v1514_v18 = vld [vmem:[#allocation7 + $0x6b0] sm:$0xff] }
 0x22c   : > { %v914_v22 = vmax.f32 %v837_v15, %v886_v19  ;;  %v843_v23 = vadd.f32 %v842_v21, %v3111_v6  ;;  %v887_v25 = vmul.f32 0.2, %v841_v20  ;;  %1572 = vmatpush1.msra.mxu0 %v1520_v9  ;;  %v1517_v15 = vld [vmem:[#allocation7 + $0x6c8] sm:$0xff]  ;;  %v1511_v21 = vld [vmem:[#allocation7 + $0x698] sm:$0xff] }
 0x22d   : > { %v846_v26 = vpop.f32.mrf.mxu1  ;;  %1573 = vmatprep.subr.mxu0 %v1519_v11  ;;  %v1513_v19 = vld [vmem:[#allocation7 + $0x6a8] sm:$0xff] }
 0x22e   : > { %v888_v27 = vmul.f32 0.2, %v843_v23  ;;  %v847_v28 = vadd.f32 %v846_v26, %v3108_v5  ;;  %1115 = vmatprep.mubr.f32.mxu0 %v914_v22  ;;  %v915_v32 = vmax.f32 %v841_v20, %v887_v25  ;;  %1574 = vmatpush1.msra.mxu0 %v1518_v14  ;;  %v1512_v20 = vld [vmem:[#allocation7 + $0x6a0] sm:$0xff]  ;;  %v1510_v22 = vld [vmem:[#allocation7 + $0x690] sm:$0xff]  ;;  %v1507_v25 = vld [vmem:[#allocation7 + $0x678] sm:$0xff] }
 0x22f   : > { %v848_v29 = vpop.f32.mrf.mxu1  ;;  %1116 = vmatmul.mubr.f32.gmra.mxu0 %v913_v24  ;;  %1575 = vmatprep.subr.mxu0 %v1517_v15  ;;  %v1508_v24 = vld [vmem:[#allocation7 + $0x680] sm:$0xff]  ;;  %v1506_v26 = vld [vmem:[#allocation7 + $0x670] sm:$0xff] }
 0x230   : > { %v916_v30 = vmax.f32 %v843_v23, %v888_v27  ;;  %v849_v31 = vadd.f32 %v848_v29, %v3111_v6  ;;  %v889_v33 = vmul.f32 0.2, %v847_v28  ;;  %1576 = vmatpush1.msra.mxu0 %v1516_v16  ;;  %v1509_v23 = vld [vmem:[#allocation7 + $0x688] sm:$0xff]  ;;  %v1503_v29 = vld [vmem:[#allocation7 + $0x658] sm:$0xff] }
 0x231   : > { %v852_v34 = vpop.f32.mrf.mxu1  ;;  %1577 = vmatprep.subr.mxu0 %v1515_v17  ;;  %v1505_v27 = vld [vmem:[#allocation7 + $0x668] sm:$0xff] }
 0x232   : > { %v890_v35 = vmul.f32 0.2, %v849_v31  ;;  %v853_v36 = vadd.f32 %v852_v34, %v3108_v5  ;;  %1121 = vmatprep.mubr.f32.mxu0 %v916_v30  ;;  %v917_v40 = vmax.f32 %v847_v28, %v889_v33  ;;  %1578 = vmatpush1.msra.mxu0 %v1514_v18  ;;  %v1504_v28 = vld [vmem:[#allocation7 + $0x660] sm:$0xff]  ;;  %v1502_v30 = vld [vmem:[#allocation7 + $0x650] sm:$0xff]  ;;  %v1499_v33 = vld [vmem:[#allocation7 + $0x638] sm:$0xff] }
 0x233   : > { %v854_v37 = vpop.f32.mrf.mxu1  ;;  %1122 = vmatmul.mubr.f32.gmra.mxu0 %v915_v32  ;;  %1579 = vmatprep.subr.mxu0 %v1513_v19  ;;  %v1500_v32 = vld [vmem:[#allocation7 + $0x640] sm:$0xff]  ;;  %v1498_v34 = vld [vmem:[#allocation7 + $0x630] sm:$0xff] }
 0x234   : > { %v918_v38 = vmax.f32 %v849_v31, %v890_v35  ;;  %v855_v39 = vadd.f32 %v854_v37, %v3111_v6  ;;  %v891_v41 = vmul.f32 0.2, %v853_v36  ;;  %1580 = vmatpush1.msra.mxu0 %v1512_v20  ;;  %v1501_v31 = vld [vmem:[#allocation7 + $0x648] sm:$0xff]  ;;  %v1495_v37 = vld [vmem:[#allocation7 + $0x618] sm:$0xff] }
 0x235   : > { %v858_v42 = vpop.f32.mrf.mxu1  ;;  %1581 = vmatprep.subr.mxu0 %v1511_v21  ;;  %v1497_v35 = vld [vmem:[#allocation7 + $0x628] sm:$0xff] }
 0x236   : > { %v892_v43 = vmul.f32 0.2, %v855_v39  ;;  %v859_v44 = vadd.f32 %v858_v42, %v3108_v5  ;;  %1127 = vmatprep.mubr.f32.mxu0 %v918_v38  ;;  %v919_v48 = vmax.f32 %v853_v36, %v891_v41  ;;  %1582 = vmatpush1.msra.mxu0 %v1510_v22  ;;  %v1496_v36 = vld [vmem:[#allocation7 + $0x620] sm:$0xff]  ;;  %v1494_v38 = vld [vmem:[#allocation7 + $0x610] sm:$0xff]  ;;  %v1555_v41 = vld [vmem:[#allocation7 + $0x7f8] sm:$0xff] }
 0x237   : > { %v860_v45 = vpop.f32.mrf.mxu1  ;;  %1128 = vmatmul.mubr.f32.gmra.mxu0 %v917_v40  ;;  %1583 = vmatprep.subr.mxu0 %v1509_v23  ;;  %v1492_v40 = vld [vmem:[#allocation7 + $0x600] sm:$0xff]  ;;  %v1554_v42 = vld [vmem:[#allocation7 + $0x7f0] sm:$0xff] }
 0x238   : > { %v920_v46 = vmax.f32 %v855_v39, %v892_v43  ;;  %v861_v47 = vadd.f32 %v860_v45, %v3111_v6  ;;  %v893_v49 = vmul.f32 0.2, %v859_v44  ;;  %1584 = vmatpush1.msra.mxu0 %v1508_v24  ;;  %v1493_v39 = vld [vmem:[#allocation7 + $0x608] sm:$0xff]  ;;  %v1551_v45 = vld [vmem:[#allocation7 + $0x7d8] sm:$0xff] }
 0x239   : > { %v864_v50 = vpop.f32.mrf.mxu1  ;;  %1585 = vmatprep.subr.mxu0 %v1507_v25  ;;  %v1553_v43 = vld [vmem:[#allocation7 + $0x7e8] sm:$0xff] }
 0x23a   : > { %v894_v51 = vmul.f32 0.2, %v861_v47  ;;  %v865_v52 = vadd.f32 %v864_v50, %v3108_v5  ;;  %1133 = vmatprep.mubr.f32.mxu0 %v920_v46  ;;  %v921_v56 = vmax.f32 %v859_v44, %v893_v49  ;;  %v1248_v5 = vld [vmem:[#allocation7 + $0x538] sm:$0xff]  ;;  %1586 = vmatpush1.msra.mxu0 %v1506_v26  ;;  %v1552_v44 = vld [vmem:[#allocation7 + $0x7e0] sm:$0xff]  ;;  %v1550_v46 = vld [vmem:[#allocation7 + $0x7d0] sm:$0xff] }
 0x23b   : > { %v866_v53 = vpop.f32.mrf.mxu1  ;;  %1134 = vmatmul.mubr.f32.gmra.mxu0 %v919_v48  ;;  %1342 = vmatprep.subr.mxu1 %v1248_v5  ;;  %v1548_v48 = vld [vmem:[#allocation7 + $0x7c0] sm:$0xff]  ;;  %v1547_v49 = vld [vmem:[#allocation7 + $0x7b8] sm:$0xff]  ;;  %v1546_v50 = vld [vmem:[#allocation7 + $0x7b0] sm:$0xff] }
 0x23c   : > { %v922_v54 = vmax.f32 %v861_v47, %v894_v51  ;;  %v867_v55 = vadd.f32 %v866_v53, %v3111_v6  ;;  %v895_v57 = vmul.f32 0.2, %v865_v52  ;;  %1343 = vmatpush2.msra.mxu1 %v1247_v63  ;;  %v1245_v6 = vld [vmem:[#allocation7 + $0x520] sm:$0xff]  ;;  %1587 = vmatprep.subr.mxu0 %v1505_v27  ;;  %v1549_v47 = vld [vmem:[#allocation7 + $0x7c8] sm:$0xff]  ;;  %v1543_v53 = vld [vmem:[#allocation7 + $0x798] sm:$0xff] }
 0x23d   : > { %1344 = vmatprep.subr.mxu1 %v1246_v1  ;;  %1588 = vmatpush1.msra.mxu0 %v1504_v28  ;;  %v1545_v51 = vld [vmem:[#allocation7 + $0x7a8] sm:$0xff]  ;;  %v991_v5 = vld [vmem:[#allocation8 + $0x2] sm:$0x3] }
 0x23e   : > { %v896_v58 = vmul.f32 0.2, %v867_v55  ;;  %1139 = vmatprep.mubr.f32.mxu0 %v922_v54  ;;  %v923_v60 = vmax.f32 %v865_v52, %v895_v57  ;;  %1345 = vmatpush2.msra.mxu1 %v1245_v6  ;;  %v1544_v52 = vld [vmem:[#allocation7 + $0x7a0] sm:$0xff]  ;;  %v1542_v54 = vld [vmem:[#allocation7 + $0x790] sm:$0xff]  ;;  %v1539_v57 = vld [vmem:[#allocation7 + $0x778] sm:$0xff]  ;;  %v3142_v63 = vrot.slane %v991_v5, %v3069_v10  ;;  %v3145_v1 = vrot.slane %v991_v5, %v3071_v12 }
 0x23f   : > { %1140 = vmatmul.mubr.f32.gmra.mxu0 %v921_v56  ;;  %1346 = vmatprep.subr.mxu1 %v1244_v2  ;;  %v1540_v56 = vld [vmem:[#allocation7 + $0x780] sm:$0xff] }
 0x240   : > { %v924_v59 = vmax.f32 %v867_v55, %v896_v58  ;;  %1347 = vmatpush2.msra.mxu1 %v1243_v3  ;;  %1589 = vmatprep.subr.mxu0 %v1503_v29  ;;  %v1541_v55 = vld [vmem:[#allocation7 + $0x788] sm:$0xff]  ;;  %v1538_v58 = vld [vmem:[#allocation7 + $0x770] sm:$0xff] }
 0x241   : > { %1348 = vmatprep.subr.mxu1 %v1242_v4  ;;  %1590 = vmatpush1.msra.mxu0 %v1502_v30 }
 0x242   : > { %1145 = vmatprep.mubr.f32.mxu0 %v924_v59  ;;  %1349 = vmatpush2.msra.mxu1 %v1241_v13  ;;  %v1537_v59 = vld [vmem:[#allocation7 + $0x768] sm:$0xff] }
 0x243   : > { %1146 = vmatmul.mubr.f32.gmra.mxu0 %v923_v60  ;;  %1591 = vmatprep.subr.mxu0 %v1501_v31  ;;  %v1536_v60 = vld [vmem:[#allocation7 + $0x760] sm:$0xff] }
 0x244   : > { %1592 = vmatpush1.msra.mxu0 %v1500_v32 }
 0x245   : > { %1593 = vmatprep.subr.mxu0 %v1499_v33 }
 0x246   : > { %1594 = vmatpush1.msra.mxu0 %v1498_v34 }
 0x247   : > { %1595 = vmatprep.subr.mxu0 %v1497_v35 }
 0x248   : > { %1596 = vmatpush1.msra.mxu0 %v1496_v36 }
 0x249   : > { %1597 = vmatprep.subr.mxu0 %v1495_v37 }
 0x24a   : > { %1598 = vmatpush1.msra.mxu0 %v1494_v38 }
 0x24b   : > { %1599 = vmatprep.subr.mxu0 %v1493_v39 }
 0x24c   : > { %1600 = vmatpush1.msra.mxu0 %v1492_v40 }
 0x24d   : > { %1601 = vmatprep.subr.mxu0 %v1555_v41 }
 0x24e   : > { %1602 = vmatpush2.msra.mxu0 %v1554_v42 }
 0x24f   : > { %1603 = vmatprep.subr.mxu0 %v1553_v43 }
 0x250   : > { %1604 = vmatpush2.msra.mxu0 %v1552_v44 }
 0x251   : > { %1605 = vmatprep.subr.mxu0 %v1551_v45 }
 0x252   : > { %1606 = vmatpush2.msra.mxu0 %v1550_v46 }
 0x253   : > { %1607 = vmatprep.subr.mxu0 %v1549_v47 }
 0x254   : > { %1608 = vmatpush2.msra.mxu0 %v1548_v48 }
 0x255   : > { %1609 = vmatprep.subr.mxu0 %v1547_v49 }
 0x256   : > { %1610 = vmatpush2.msra.mxu0 %v1546_v50 }
 0x257   : > { %1611 = vmatprep.subr.mxu0 %v1545_v51 }
 0x258   : > { %1612 = vmatpush2.msra.mxu0 %v1544_v52 }
 0x259   : > { %1613 = vmatprep.subr.mxu0 %v1543_v53 }
 0x25a   : > { %1614 = vmatpush2.msra.mxu0 %v1542_v54 }
 0x25b   : > { %1615 = vmatprep.subr.mxu0 %v1541_v55 }
 0x25c   : > { %1616 = vmatpush2.msra.mxu0 %v1540_v56 }
 0x25d   : > { %1617 = vmatprep.subr.mxu0 %v1539_v57 }
 0x25e   : > { %1618 = vmatpush2.msra.mxu0 %v1538_v58 }
 0x25f   : > { %1619 = vmatprep.subr.mxu0 %v1537_v59 }
 0x260   : > { %1620 = vmatpush2.msra.mxu0 %v1536_v60 }
 0x261   : > { %1621 = vmatprep.subr.mxu0 %v1535_v61 }
 0x262   : > { %1622 = vmatpush2.msra.mxu0 %v1534_v62 }
 0x2cf   : > { %v1069_v6 = vpop.f32.mrf.mxu0 }
 0x2d0   : > { %v1070_v2 = vadd.f32 %v1069_v6, %v3142_v63 }
 0x2d1   : > { %v1071_v3 = vpop.f32.mrf.mxu0 }
 0x2d2   : > { %v1072_v4 = vadd.f32 %v1071_v3, %v3145_v1  ;;  %v1152_v13 = vmul.f32 0.2, %v1070_v2 }
 0x2d3   : > { %v1075_v0 = vpop.f32.mrf.mxu0 }
 0x2d4   : > { %v1153_v7 = vmul.f32 0.2, %v1072_v4  ;;  %v1076_v8 = vadd.f32 %v1075_v0, %v3142_v63  ;;  %v1180_v15 = vmax.f32 %v1070_v2, %v1152_v13 }
 0x2d5   : > { %v1077_v9 = vpop.f32.mrf.mxu0 }
 0x2d6   : > { %v1181_v11 = vmax.f32 %v1072_v4, %v1153_v7  ;;  %v1078_v14 = vadd.f32 %v1077_v9, %v3145_v1  ;;  %v1154_v16 = vmul.f32 0.2, %v1076_v8 }
 0x2d7   : > { %v1081_v17 = vpop.f32.mrf.mxu0 }
 0x2d8   : > { %v1155_v18 = vmul.f32 0.2, %v1078_v14  ;;  %v1082_v19 = vadd.f32 %v1081_v17, %v3142_v63  ;;  %1350 = vmatprep.mubr.f32.mxu1 %v1181_v11  ;;  %v1182_v23 = vmax.f32 %v1076_v8, %v1154_v16 }
 0x2d9   : > { %v1083_v20 = vpop.f32.mrf.mxu0  ;;  %1351 = vmatmul.mubr.f32.vlgmr.msra.gmra.mxu1 %v1180_v15 }
 0x2da   : > { %v1183_v21 = vmax.f32 %v1078_v14, %v1155_v18  ;;  %v1084_v22 = vadd.f32 %v1083_v20, %v3145_v1  ;;  %v1156_v24 = vmul.f32 0.2, %v1082_v19 }
 0x2db   : > { %v1087_v25 = vpop.f32.mrf.mxu0 }
 0x2dc   : > { %v1157_v26 = vmul.f32 0.2, %v1084_v22  ;;  %v1088_v27 = vadd.f32 %v1087_v25, %v3142_v63  ;;  %1356 = vmatprep.mubr.f32.mxu1 %v1183_v21  ;;  %v1184_v31 = vmax.f32 %v1082_v19, %v1156_v24 }
 0x2dd   : > { %v1089_v28 = vpop.f32.mrf.mxu0  ;;  %1357 = vmatmul.mubr.f32.gmra.mxu1 %v1182_v23 }
 0x2de   : > { %v1185_v29 = vmax.f32 %v1084_v22, %v1157_v26  ;;  %v1090_v30 = vadd.f32 %v1089_v28, %v3145_v1  ;;  %v1158_v32 = vmul.f32 0.2, %v1088_v27 }
 0x2df   : > { %v1093_v33 = vpop.f32.mrf.mxu0 }
 0x2e0   : > { %v1159_v34 = vmul.f32 0.2, %v1090_v30  ;;  %v1094_v35 = vadd.f32 %v1093_v33, %v3142_v63  ;;  %1362 = vmatprep.mubr.f32.mxu1 %v1185_v29  ;;  %v1186_v39 = vmax.f32 %v1088_v27, %v1158_v32 }
 0x2e1   : > { %v1095_v36 = vpop.f32.mrf.mxu0  ;;  %1363 = vmatmul.mubr.f32.gmra.mxu1 %v1184_v31 }
 0x2e2   : > { %v1187_v37 = vmax.f32 %v1090_v30, %v1159_v34  ;;  %v1096_v38 = vadd.f32 %v1095_v36, %v3145_v1  ;;  %v1160_v40 = vmul.f32 0.2, %v1094_v35 }
 0x2e3   : > { %v1099_v41 = vpop.f32.mrf.mxu0 }
 0x2e4   : > { %v1161_v42 = vmul.f32 0.2, %v1096_v38  ;;  %v1100_v43 = vadd.f32 %v1099_v41, %v3142_v63  ;;  %1368 = vmatprep.mubr.f32.mxu1 %v1187_v37  ;;  %v1188_v47 = vmax.f32 %v1094_v35, %v1160_v40 }
 0x2e5   : > { %v1101_v44 = vpop.f32.mrf.mxu0  ;;  %1369 = vmatmul.mubr.f32.gmra.mxu1 %v1186_v39 }
 0x2e6   : > { %v1189_v45 = vmax.f32 %v1096_v38, %v1161_v42  ;;  %v1102_v46 = vadd.f32 %v1101_v44, %v3145_v1  ;;  %v1162_v48 = vmul.f32 0.2, %v1100_v43 }
 0x2e7   : > { %v1105_v49 = vpop.f32.mrf.mxu0 }
 0x2e8   : > { %v1163_v50 = vmul.f32 0.2, %v1102_v46  ;;  %v1106_v51 = vadd.f32 %v1105_v49, %v3142_v63  ;;  %1374 = vmatprep.mubr.f32.mxu1 %v1189_v45  ;;  %v1190_v55 = vmax.f32 %v1100_v43, %v1162_v48 }
 0x2e9   : > { %v1107_v52 = vpop.f32.mrf.mxu0  ;;  %1375 = vmatmul.mubr.f32.gmra.mxu1 %v1188_v47 }
 0x2ea   : > { %v1191_v53 = vmax.f32 %v1102_v46, %v1163_v50  ;;  %v1108_v54 = vadd.f32 %v1107_v52, %v3145_v1  ;;  %v1164_v56 = vmul.f32 0.2, %v1106_v51 }
 0x2eb   : > { %v1111_v57 = vpop.f32.mrf.mxu0 }
 0x2ec   : > { %v1165_v58 = vmul.f32 0.2, %v1108_v54  ;;  %v1112_v59 = vadd.f32 %v1111_v57, %v3142_v63  ;;  %1380 = vmatprep.mubr.f32.mxu1 %v1191_v53  ;;  %v1192_v5 = vmax.f32 %v1106_v51, %v1164_v56  ;;  %v1533_v56 = vld [vmem:[#allocation7 + $0x748] sm:$0xff]  ;;  %v1532_v57 = vld [vmem:[#allocation7 + $0x740] sm:$0xff] }
 0x2ed   : > { %v1113_v60 = vpop.f32.mrf.mxu0  ;;  %1381 = vmatmul.mubr.f32.gmra.mxu1 %v1190_v55  ;;  %1623 = vmatprep.subr.mxu0 %v1533_v56  ;;  %v1818_v56 = vld [vmem:[#allocation7 + $0x958] sm:$0xff] }
 0x2ee   : > { %v1193_v61 = vmax.f32 %v1108_v54, %v1165_v58  ;;  %v1114_v62 = vadd.f32 %v1113_v60, %v3145_v1  ;;  %v1166_v6 = vmul.f32 0.2, %v1112_v59  ;;  %1624 = vmatpush2.msra.mxu0 %v1532_v57  ;;  %v1530_v58 = vld [vmem:[#allocation7 + $0x730] sm:$0xff]  ;;  %v1527_v60 = vld [vmem:[#allocation7 + $0x718] sm:$0xff] }
 0x2ef   : > { %v1117_v2 = vpop.f32.mrf.mxu0  ;;  %v1817_v57 = vld [vmem:[#allocation7 + $0x950] sm:$0xff] }
 0x2f0   : > { %v1167_v3 = vmul.f32 0.2, %v1114_v62  ;;  %v1118_v4 = vadd.f32 %v1117_v2, %v3142_v63  ;;  %1386 = vmatprep.mubr.f32.mxu1 %v1193_v61  ;;  %v1194_v8 = vmax.f32 %v1112_v59, %v1166_v6  ;;  %v1529_v59 = vld [vmem:[#allocation7 + $0x728] sm:$0xff]  ;;  %v1526_v61 = vld [vmem:[#allocation7 + $0x710] sm:$0xff]  ;;  %v1806_v6 = vld [vmem:[#allocation7 + $0x8f8] sm:$0xff] }
 0x2f1   : > { %v1119_v13 = vpop.f32.mrf.mxu0  ;;  %1387 = vmatmul.mubr.f32.gmra.mxu1 %v1192_v5  ;;  %v1524_v5 = vld [vmem:[#allocation7 + $0x700] sm:$0xff]  ;;  %v1805_v2 = vld [vmem:[#allocation7 + $0x8f0] sm:$0xff]  ;;  %1852 = vmatprep.subr.mxu1 %v1806_v6 }
 0x2f2   : > { %v1195_v0 = vmax.f32 %v1114_v62, %v1167_v3  ;;  %v1120_v7 = vadd.f32 %v1119_v13, %v3145_v1  ;;  %v1168_v9 = vmul.f32 0.2, %v1118_v4  ;;  %v1525_v62 = vld [vmem:[#allocation7 + $0x708] sm:$0xff]  ;;  %1853 = vmatpush1.msra.mxu1 %v1805_v2  ;;  %v1802_v13 = vld [vmem:[#allocation7 + $0x8d8] sm:$0xff] }
 0x2f3   : > { %v1123_v11 = vpop.f32.mrf.mxu0  ;;  %v1804_v3 = vld [vmem:[#allocation7 + $0x8e8] sm:$0xff] }
 0x2f4   : > { %v1169_v14 = vmul.f32 0.2, %v1120_v7  ;;  %v1124_v15 = vadd.f32 %v1123_v11, %v3142_v63  ;;  %1392 = vmatprep.mubr.f32.mxu1 %v1195_v0  ;;  %v1196_v19 = vmax.f32 %v1118_v4, %v1168_v9  ;;  %v1803_v4 = vld [vmem:[#allocation7 + $0x8e0] sm:$0xff]  ;;  %1854 = vmatprep.subr.mxu1 %v1804_v3  ;;  %v1801_v0 = vld [vmem:[#allocation7 + $0x8d0] sm:$0xff]  ;;  %v1798_v9 = vld [vmem:[#allocation7 + $0x8b8] sm:$0xff] }
 0x2f5   : > { %v1125_v16 = vpop.f32.mrf.mxu0  ;;  %1393 = vmatmul.mubr.f32.gmra.mxu1 %v1194_v8  ;;  %v1799_v8 = vld [vmem:[#allocation7 + $0x8c0] sm:$0xff]  ;;  %v1797_v11 = vld [vmem:[#allocation7 + $0x8b0] sm:$0xff] }
 0x2f6   : > { %v1197_v17 = vmax.f32 %v1120_v7, %v1169_v14  ;;  %v1126_v18 = vadd.f32 %v1125_v16, %v3145_v1  ;;  %v1170_v20 = vmul.f32 0.2, %v1124_v15  ;;  %1855 = vmatpush1.msra.mxu1 %v1803_v4  ;;  %v1800_v7 = vld [vmem:[#allocation7 + $0x8c8] sm:$0xff]  ;;  %v1794_v16 = vld [vmem:[#allocation7 + $0x898] sm:$0xff] }
 0x2f7   : > { %v1129_v21 = vpop.f32.mrf.mxu0  ;;  %1856 = vmatprep.subr.mxu1 %v1802_v13  ;;  %v1796_v14 = vld [vmem:[#allocation7 + $0x8a8] sm:$0xff] }
 0x2f8   : > { %v1171_v22 = vmul.f32 0.2, %v1126_v18  ;;  %v1130_v23 = vadd.f32 %v1129_v21, %v3142_v63  ;;  %1398 = vmatprep.mubr.f32.mxu1 %v1197_v17  ;;  %v1198_v27 = vmax.f32 %v1124_v15, %v1170_v20  ;;  %1857 = vmatpush1.msra.mxu1 %v1801_v0  ;;  %v1795_v15 = vld [vmem:[#allocation7 + $0x8a0] sm:$0xff]  ;;  %v1793_v17 = vld [vmem:[#allocation7 + $0x890] sm:$0xff]  ;;  %v1790_v20 = vld [vmem:[#allocation7 + $0x878] sm:$0xff] }
 0x2f9   : > { %v1131_v24 = vpop.f32.mrf.mxu0  ;;  %1399 = vmatmul.mubr.f32.gmra.mxu1 %v1196_v19  ;;  %1858 = vmatprep.subr.mxu1 %v1800_v7  ;;  %v1791_v19 = vld [vmem:[#allocation7 + $0x880] sm:$0xff]  ;;  %v1789_v21 = vld [vmem:[#allocation7 + $0x870] sm:$0xff] }
 0x2fa   : > { %v1199_v25 = vmax.f32 %v1126_v18, %v1171_v22  ;;  %v1132_v26 = vadd.f32 %v1131_v24, %v3145_v1  ;;  %v1172_v28 = vmul.f32 0.2, %v1130_v23  ;;  %1859 = vmatpush1.msra.mxu1 %v1799_v8  ;;  %v1792_v18 = vld [vmem:[#allocation7 + $0x888] sm:$0xff]  ;;  %v1786_v24 = vld [vmem:[#allocation7 + $0x858] sm:$0xff] }
 0x2fb   : > { %v1135_v29 = vpop.f32.mrf.mxu0  ;;  %1860 = vmatprep.subr.mxu1 %v1798_v9  ;;  %v1788_v22 = vld [vmem:[#allocation7 + $0x868] sm:$0xff] }
 0x2fc   : > { %v1173_v30 = vmul.f32 0.2, %v1132_v26  ;;  %v1136_v31 = vadd.f32 %v1135_v29, %v3142_v63  ;;  %1404 = vmatprep.mubr.f32.mxu1 %v1199_v25  ;;  %v1200_v35 = vmax.f32 %v1130_v23, %v1172_v28  ;;  %1861 = vmatpush1.msra.mxu1 %v1797_v11  ;;  %v1787_v23 = vld [vmem:[#allocation7 + $0x860] sm:$0xff]  ;;  %v1785_v25 = vld [vmem:[#allocation7 + $0x850] sm:$0xff]  ;;  %v1782_v28 = vld [vmem:[#allocation7 + $0x838] sm:$0xff] }
 0x2fd   : > { %v1137_v32 = vpop.f32.mrf.mxu0  ;;  %1405 = vmatmul.mubr.f32.gmra.mxu1 %v1198_v27  ;;  %1862 = vmatprep.subr.mxu1 %v1796_v14  ;;  %v1783_v27 = vld [vmem:[#allocation7 + $0x840] sm:$0xff]  ;;  %v1781_v29 = vld [vmem:[#allocation7 + $0x830] sm:$0xff] }
 0x2fe   : > { %v1201_v33 = vmax.f32 %v1132_v26, %v1173_v30  ;;  %v1138_v34 = vadd.f32 %v1137_v32, %v3145_v1  ;;  %v1174_v36 = vmul.f32 0.2, %v1136_v31  ;;  %1863 = vmatpush1.msra.mxu1 %v1795_v15  ;;  %v1784_v26 = vld [vmem:[#allocation7 + $0x848] sm:$0xff]  ;;  %v1778_v32 = vld [vmem:[#allocation7 + $0x818] sm:$0xff] }
 0x2ff   : > { %v1141_v37 = vpop.f32.mrf.mxu0  ;;  %1864 = vmatprep.subr.mxu1 %v1794_v16  ;;  %v1780_v30 = vld [vmem:[#allocation7 + $0x828] sm:$0xff] }
 0x300   : > { %v1175_v38 = vmul.f32 0.2, %v1138_v34  ;;  %v1142_v39 = vadd.f32 %v1141_v37, %v3142_v63  ;;  %1410 = vmatprep.mubr.f32.mxu1 %v1201_v33  ;;  %v1202_v43 = vmax.f32 %v1136_v31, %v1174_v36  ;;  %1865 = vmatpush1.msra.mxu1 %v1793_v17  ;;  %v1779_v31 = vld [vmem:[#allocation7 + $0x820] sm:$0xff]  ;;  %v1777_v33 = vld [vmem:[#allocation7 + $0x810] sm:$0xff]  ;;  %v1838_v36 = vld [vmem:[#allocation7 + $0x9f8] sm:$0xff] }
 0x301   : > { %v1143_v40 = vpop.f32.mrf.mxu0  ;;  %1411 = vmatmul.mubr.f32.gmra.mxu1 %v1200_v35  ;;  %1866 = vmatprep.subr.mxu1 %v1792_v18  ;;  %v1775_v35 = vld [vmem:[#allocation7 + $0x800] sm:$0xff]  ;;  %v1837_v37 = vld [vmem:[#allocation7 + $0x9f0] sm:$0xff] }
 0x302   : > { %v1203_v41 = vmax.f32 %v1138_v34, %v1175_v38  ;;  %v1144_v42 = vadd.f32 %v1143_v40, %v3145_v1  ;;  %v1176_v44 = vmul.f32 0.2, %v1142_v39  ;;  %1867 = vmatpush1.msra.mxu1 %v1791_v19  ;;  %v1776_v34 = vld [vmem:[#allocation7 + $0x808] sm:$0xff]  ;;  %v1834_v40 = vld [vmem:[#allocation7 + $0x9d8] sm:$0xff] }
 0x303   : > { %v1147_v45 = vpop.f32.mrf.mxu0  ;;  %1868 = vmatprep.subr.mxu1 %v1790_v20  ;;  %v1836_v38 = vld [vmem:[#allocation7 + $0x9e8] sm:$0xff] }
 0x304   : > { %v1177_v46 = vmul.f32 0.2, %v1144_v42  ;;  %v1148_v47 = vadd.f32 %v1147_v45, %v3142_v63  ;;  %1416 = vmatprep.mubr.f32.mxu1 %v1203_v41  ;;  %v1204_v51 = vmax.f32 %v1142_v39, %v1176_v44  ;;  %v1531_v63 = vld [vmem:[#allocation7 + $0x738] sm:$0xff]  ;;  %1869 = vmatpush1.msra.mxu1 %v1789_v21  ;;  %v1835_v39 = vld [vmem:[#allocation7 + $0x9e0] sm:$0xff]  ;;  %v1833_v41 = vld [vmem:[#allocation7 + $0x9d0] sm:$0xff] }
 0x305   : > { %v1149_v48 = vpop.f32.mrf.mxu0  ;;  %1417 = vmatmul.mubr.f32.gmra.mxu1 %v1202_v43  ;;  %1625 = vmatprep.subr.mxu0 %v1531_v63  ;;  %v1831_v43 = vld [vmem:[#allocation7 + $0x9c0] sm:$0xff]  ;;  %v1830_v44 = vld [vmem:[#allocation7 + $0x9b8] sm:$0xff]  ;;  %v1829_v45 = vld [vmem:[#allocation7 + $0x9b0] sm:$0xff] }
 0x306   : > { %v1205_v49 = vmax.f32 %v1144_v42, %v1177_v46  ;;  %v1150_v50 = vadd.f32 %v1149_v48, %v3145_v1  ;;  %v1178_v52 = vmul.f32 0.2, %v1148_v47  ;;  %1626 = vmatpush2.msra.mxu0 %v1530_v58  ;;  %v1528_v1 = vld [vmem:[#allocation7 + $0x720] sm:$0xff]  ;;  %1870 = vmatprep.subr.mxu1 %v1788_v22  ;;  %v1832_v42 = vld [vmem:[#allocation7 + $0x9c8] sm:$0xff]  ;;  %v1826_v48 = vld [vmem:[#allocation7 + $0x998] sm:$0xff] }
 0x307   : > { %1627 = vmatprep.subr.mxu0 %v1529_v59  ;;  %1871 = vmatpush1.msra.mxu1 %v1787_v23  ;;  %v1828_v46 = vld [vmem:[#allocation7 + $0x9a8] sm:$0xff]  ;;  %v1274_v63 = vld [vmem:[#allocation8 + $0x4] sm:$0x3] }
 0x308   : > { %v1179_v53 = vmul.f32 0.2, %v1150_v50  ;;  %1422 = vmatprep.mubr.f32.mxu1 %v1205_v49  ;;  %v1206_v55 = vmax.f32 %v1148_v47, %v1178_v52  ;;  %1628 = vmatpush2.msra.mxu0 %v1528_v1  ;;  %v1827_v47 = vld [vmem:[#allocation7 + $0x9a0] sm:$0xff]  ;;  %v1825_v49 = vld [vmem:[#allocation7 + $0x990] sm:$0xff]  ;;  %v1822_v52 = vld [vmem:[#allocation7 + $0x978] sm:$0xff]  ;;  %v3176_v58 = vrot.slane %v1274_v63, %v3069_v10  ;;  %v3179_v59 = vrot.slane %v1274_v63, %v3071_v12 }
 0x309   : > { %1423 = vmatmul.mubr.f32.gmra.mxu1 %v1204_v51  ;;  %1629 = vmatprep.subr.mxu0 %v1527_v60  ;;  %v1823_v51 = vld [vmem:[#allocation7 + $0x980] sm:$0xff] }
 0x30a   : > { %v1207_v54 = vmax.f32 %v1150_v50, %v1179_v53  ;;  %1630 = vmatpush2.msra.mxu0 %v1526_v61  ;;  %1872 = vmatprep.subr.mxu1 %v1786_v24  ;;  %v1824_v50 = vld [vmem:[#allocation7 + $0x988] sm:$0xff]  ;;  %v1821_v53 = vld [vmem:[#allocation7 + $0x970] sm:$0xff] }
 0x30b   : > { %1631 = vmatprep.subr.mxu0 %v1525_v62  ;;  %1873 = vmatpush1.msra.mxu1 %v1785_v25 }
 0x30c   : > { %1428 = vmatprep.mubr.f32.mxu1 %v1207_v54  ;;  %1632 = vmatpush2.msra.mxu0 %v1524_v5  ;;  %v1820_v54 = vld [vmem:[#allocation7 + $0x968] sm:$0xff] }
 0x30d   : > { %1429 = vmatmul.mubr.f32.gmra.mxu1 %v1206_v55  ;;  %1874 = vmatprep.subr.mxu1 %v1784_v26  ;;  %v1819_v55 = vld [vmem:[#allocation7 + $0x960] sm:$0xff] }
 0x30e   : > { %1875 = vmatpush1.msra.mxu1 %v1783_v27 }
 0x30f   : > { %1876 = vmatprep.subr.mxu1 %v1782_v28 }
 0x310   : > { %1877 = vmatpush1.msra.mxu1 %v1781_v29 }
 0x311   : > { %1878 = vmatprep.subr.mxu1 %v1780_v30 }
 0x312   : > { %1879 = vmatpush1.msra.mxu1 %v1779_v31 }
 0x313   : > { %1880 = vmatprep.subr.mxu1 %v1778_v32 }
 0x314   : > { %1881 = vmatpush1.msra.mxu1 %v1777_v33 }
 0x315   : > { %1882 = vmatprep.subr.mxu1 %v1776_v34 }
 0x316   : > { %1883 = vmatpush1.msra.mxu1 %v1775_v35 }
 0x317   : > { %1884 = vmatprep.subr.mxu1 %v1838_v36 }
 0x318   : > { %1885 = vmatpush2.msra.mxu1 %v1837_v37 }
 0x319   : > { %1886 = vmatprep.subr.mxu1 %v1836_v38 }
 0x31a   : > { %1887 = vmatpush2.msra.mxu1 %v1835_v39 }
 0x31b   : > { %1888 = vmatprep.subr.mxu1 %v1834_v40 }
 0x31c   : > { %1889 = vmatpush2.msra.mxu1 %v1833_v41 }
 0x31d   : > { %1890 = vmatprep.subr.mxu1 %v1832_v42 }
 0x31e   : > { %1891 = vmatpush2.msra.mxu1 %v1831_v43 }
 0x31f   : > { %1892 = vmatprep.subr.mxu1 %v1830_v44 }
 0x320   : > { %1893 = vmatpush2.msra.mxu1 %v1829_v45 }
 0x321   : > { %1894 = vmatprep.subr.mxu1 %v1828_v46 }
 0x322   : > { %1895 = vmatpush2.msra.mxu1 %v1827_v47 }
 0x323   : > { %1896 = vmatprep.subr.mxu1 %v1826_v48 }
 0x324   : > { %1897 = vmatpush2.msra.mxu1 %v1825_v49 }
 0x325   : > { %1898 = vmatprep.subr.mxu1 %v1824_v50 }
 0x326   : > { %1899 = vmatpush2.msra.mxu1 %v1823_v51 }
 0x327   : > { %1900 = vmatprep.subr.mxu1 %v1822_v52 }
 0x328   : > { %1901 = vmatpush2.msra.mxu1 %v1821_v53 }
 0x329   : > { %1902 = vmatprep.subr.mxu1 %v1820_v54 }
 0x32a   : > { %1903 = vmatpush2.msra.mxu1 %v1819_v55 }
 0x32b   : > { %1904 = vmatprep.subr.mxu1 %v1818_v56 }
 0x32c   : > { %1905 = vmatpush2.msra.mxu1 %v1817_v57 }
 0x399   : > { %v1352_v1 = vpop.f32.mrf.mxu1 }
 0x39a   : > { %v1353_v60 = vadd.f32 %v1352_v1, %v3176_v58 }
 0x39b   : > { %v1354_v61 = vpop.f32.mrf.mxu1 }
 0x39c   : > { %v1355_v62 = vadd.f32 %v1354_v61, %v3179_v59  ;;  %v1435_v5 = vmul.f32 0.2, %v1353_v60 }
 0x39d   : > { %v1358_v6 = vpop.f32.mrf.mxu1 }
 0x39e   : > { %v1436_v2 = vmul.f32 0.2, %v1355_v62  ;;  %v1359_v3 = vadd.f32 %v1358_v6, %v3176_v58  ;;  %v1463_v7 = vmax.f32 %v1353_v60, %v1435_v5 }
 0x39f   : > { %v1360_v4 = vpop.f32.mrf.mxu1 }
 0x3a0   : > { %v1464_v13 = vmax.f32 %v1355_v62, %v1436_v2  ;;  %v1361_v0 = vadd.f32 %v1360_v4, %v3179_v59  ;;  %v1437_v8 = vmul.f32 0.2, %v1359_v3 }
 0x3a1   : > { %v1364_v9 = vpop.f32.mrf.mxu1 }
 0x3a2   : > { %v1438_v11 = vmul.f32 0.2, %v1361_v0  ;;  %v1365_v14 = vadd.f32 %v1364_v9, %v3176_v58  ;;  %1633 = vmatprep.mubr.f32.mxu0 %v1464_v13  ;;  %v1465_v18 = vmax.f32 %v1359_v3, %v1437_v8 }
 0x3a3   : > { %v1366_v15 = vpop.f32.mrf.mxu1  ;;  %1634 = vmatmul.mubr.f32.vlgmr.msra.gmra.mxu0 %v1463_v7 }
 0x3a4   : > { %v1466_v16 = vmax.f32 %v1361_v0, %v1438_v11  ;;  %v1367_v17 = vadd.f32 %v1366_v15, %v3179_v59  ;;  %v1439_v19 = vmul.f32 0.2, %v1365_v14 }
 0x3a5   : > { %v1370_v20 = vpop.f32.mrf.mxu1 }
 0x3a6   : > { %v1440_v21 = vmul.f32 0.2, %v1367_v17  ;;  %v1371_v22 = vadd.f32 %v1370_v20, %v3176_v58  ;;  %1639 = vmatprep.mubr.f32.mxu0 %v1466_v16  ;;  %v1467_v26 = vmax.f32 %v1365_v14, %v1439_v19 }
 0x3a7   : > { %v1372_v23 = vpop.f32.mrf.mxu1  ;;  %1640 = vmatmul.mubr.f32.gmra.mxu0 %v1465_v18 }
 0x3a8   : > { %v1468_v24 = vmax.f32 %v1367_v17, %v1440_v21  ;;  %v1373_v25 = vadd.f32 %v1372_v23, %v3179_v59  ;;  %v1441_v27 = vmul.f32 0.2, %v1371_v22 }
 0x3a9   : > { %v1376_v28 = vpop.f32.mrf.mxu1 }
 0x3aa   : > { %v1442_v29 = vmul.f32 0.2, %v1373_v25  ;;  %v1377_v30 = vadd.f32 %v1376_v28, %v3176_v58  ;;  %1645 = vmatprep.mubr.f32.mxu0 %v1468_v24  ;;  %v1469_v34 = vmax.f32 %v1371_v22, %v1441_v27 }
 0x3ab   : > { %v1378_v31 = vpop.f32.mrf.mxu1  ;;  %1646 = vmatmul.mubr.f32.gmra.mxu0 %v1467_v26 }
 0x3ac   : > { %v1470_v32 = vmax.f32 %v1373_v25, %v1442_v29  ;;  %v1379_v33 = vadd.f32 %v1378_v31, %v3179_v59  ;;  %v1443_v35 = vmul.f32 0.2, %v1377_v30 }
 0x3ad   : > { %v1382_v36 = vpop.f32.mrf.mxu1 }
 0x3ae   : > { %v1444_v37 = vmul.f32 0.2, %v1379_v33  ;;  %v1383_v38 = vadd.f32 %v1382_v36, %v3176_v58  ;;  %1651 = vmatprep.mubr.f32.mxu0 %v1470_v32  ;;  %v1471_v42 = vmax.f32 %v1377_v30, %v1443_v35 }
 0x3af   : > { %v1384_v39 = vpop.f32.mrf.mxu1  ;;  %1652 = vmatmul.mubr.f32.gmra.mxu0 %v1469_v34 }
 0x3b0   : > { %v1472_v40 = vmax.f32 %v1379_v33, %v1444_v37  ;;  %v1385_v41 = vadd.f32 %v1384_v39, %v3179_v59  ;;  %v1445_v43 = vmul.f32 0.2, %v1383_v38 }
 0x3b1   : > { %v1388_v44 = vpop.f32.mrf.mxu1 }
 0x3b2   : > { %v1446_v45 = vmul.f32 0.2, %v1385_v41  ;;  %v1389_v46 = vadd.f32 %v1388_v44, %v3176_v58  ;;  %1657 = vmatprep.mubr.f32.mxu0 %v1472_v40  ;;  %v1473_v50 = vmax.f32 %v1383_v38, %v1445_v43 }
 0x3b3   : > { %v1390_v47 = vpop.f32.mrf.mxu1  ;;  %1658 = vmatmul.mubr.f32.gmra.mxu0 %v1471_v42 }
 0x3b4   : > { %v1474_v48 = vmax.f32 %v1385_v41, %v1446_v45  ;;  %v1391_v49 = vadd.f32 %v1390_v47, %v3179_v59  ;;  %v1447_v51 = vmul.f32 0.2, %v1389_v46 }
 0x3b5   : > { %v1394_v52 = vpop.f32.mrf.mxu1 }
 0x3b6   : > { %v1448_v53 = vmul.f32 0.2, %v1391_v49  ;;  %v1395_v54 = vadd.f32 %v1394_v52, %v3176_v58  ;;  %1663 = vmatprep.mubr.f32.mxu0 %v1474_v48  ;;  %v1475_v63 = vmax.f32 %v1389_v46, %v1447_v51  ;;  %v1816_v51 = vld [vmem:[#allocation7 + $0x948] sm:$0xff]  ;;  %v1815_v52 = vld [vmem:[#allocation7 + $0x940] sm:$0xff] }
 0x3b7   : > { %v1396_v55 = vpop.f32.mrf.mxu1  ;;  %1664 = vmatmul.mubr.f32.gmra.mxu0 %v1473_v50  ;;  %1906 = vmatprep.subr.mxu1 %v1816_v51 }
 0x3b8   : > { %v1476_v56 = vmax.f32 %v1391_v49, %v1448_v53  ;;  %v1397_v57 = vadd.f32 %v1396_v55, %v3179_v59  ;;  %v1449_v1 = vmul.f32 0.2, %v1395_v54  ;;  %1907 = vmatpush2.msra.mxu1 %v1815_v52  ;;  %v1813_v53 = vld [vmem:[#allocation7 + $0x930] sm:$0xff]  ;;  %v1810_v55 = vld [vmem:[#allocation7 + $0x918] sm:$0xff] }
 0x3b9   : > { %v1400_v60 = vpop.f32.mrf.mxu1 }
 0x3ba   : > { %v1450_v61 = vmul.f32 0.2, %v1397_v57  ;;  %v1401_v62 = vadd.f32 %v1400_v60, %v3176_v58  ;;  %1669 = vmatprep.mubr.f32.mxu0 %v1476_v56  ;;  %v1477_v3 = vmax.f32 %v1395_v54, %v1449_v1  ;;  %v1812_v54 = vld [vmem:[#allocation7 + $0x928] sm:$0xff]  ;;  %v1809_v56 = vld [vmem:[#allocation7 + $0x910] sm:$0xff] }
 0x3bb   : > { %v1402_v5 = vpop.f32.mrf.mxu1  ;;  %1670 = vmatmul.mubr.f32.gmra.mxu0 %v1475_v63  ;;  %v1807_v63 = vld [vmem:[#allocation7 + $0x900] sm:$0xff] }
 0x3bc   : > { %v1478_v6 = vmax.f32 %v1397_v57, %v1450_v61  ;;  %v1403_v2 = vadd.f32 %v1402_v5, %v3179_v59  ;;  %v1451_v4 = vmul.f32 0.2, %v1401_v62  ;;  %v1808_v57 = vld [vmem:[#allocation7 + $0x908] sm:$0xff]  ;;  %v2087_v61 = vld [vmem:[#allocation10 + $0xf0] sm:$0xff]  ;;  %v2086_v5 = vld [vmem:[#allocation10 + $0xe8] sm:$0xff] }
 0x3bd   : > { %v1406_v13 = vpop.f32.mrf.mxu1  ;;  %v2088_v1 = vld [vmem:[#allocation10 + $0xf8] sm:$0xff] }
 0x3be   : > { %v1452_v0 = vmul.f32 0.2, %v1403_v2  ;;  %v1407_v7 = vadd.f32 %v1406_v13, %v3176_v58  ;;  %1675 = vmatprep.mubr.f32.mxu0 %v1478_v6  ;;  %v1479_v14 = vmax.f32 %v1401_v62, %v1451_v4  ;;  %v2072_v60 = vld [vmem:[#allocation10 + $0x78] sm:$0xff]  ;;  %2419 = vmatprep.subr.mxu0 %v2088_v1  ;;  %v2071_v62 = vld [vmem:[#allocation10 + $0x70] sm:$0xff]  ;;  %v2070_v6 = vld [vmem:[#allocation10 + $0x68] sm:$0xff] }
 0x3bf   : > { %v1408_v8 = vpop.f32.mrf.mxu1  ;;  %1676 = vmatmul.mubr.f32.gmra.mxu0 %v1477_v3  ;;  %v2069_v3 = vld [vmem:[#allocation10 + $0x60] sm:$0xff]  ;;  %v2084_v4 = vld [vmem:[#allocation10 + $0xd8] sm:$0xff] }
 0x3c0   : > { %v1480_v9 = vmax.f32 %v1403_v2, %v1452_v0  ;;  %v1409_v11 = vadd.f32 %v1408_v8, %v3179_v59  ;;  %v1453_v15 = vmul.f32 0.2, %v1407_v7  ;;  %2420 = vmatpush3.msra.mxu0 %v2072_v60  ;;  %v2085_v2 = vld [vmem:[#allocation10 + $0xe0] sm:$0xff]  ;;  %v2068_v13 = vld [vmem:[#allocation10 + $0x58] sm:$0xff]  ;;  %v2083_v0 = vld [vmem:[#allocation10 + $0xd0] sm:$0xff] }
 0x3c1   : > { %v1412_v16 = vpop.f32.mrf.mxu1  ;;  %2421 = vmatprep.subr.mxu0 %v2087_v61  ;;  %v2082_v8 = vld [vmem:[#allocation10 + $0xc8] sm:$0xff] }
 0x3c2   : > { %v1454_v17 = vmul.f32 0.2, %v1409_v11  ;;  %v1413_v18 = vadd.f32 %v1412_v16, %v3176_v58  ;;  %1681 = vmatprep.mubr.f32.mxu0 %v1480_v9  ;;  %v1481_v22 = vmax.f32 %v1407_v7, %v1453_v15  ;;  %2422 = vmatpush3.msra.mxu0 %v2071_v62  ;;  %v2067_v7 = vld [vmem:[#allocation10 + $0x50] sm:$0xff]  ;;  %v2066_v9 = vld [vmem:[#allocation10 + $0x48] sm:$0xff]  ;;  %v2080_v15 = vld [vmem:[#allocation10 + $0xb8] sm:$0xff] }
 0x3c3   : > { %v1414_v19 = vpop.f32.mrf.mxu1  ;;  %1682 = vmatmul.mubr.f32.gmra.mxu0 %v1479_v14  ;;  %2423 = vmatprep.subr.mxu0 %v2086_v5  ;;  %v2065_v14 = vld [vmem:[#allocation10 + $0x40] sm:$0xff]  ;;  %v2064_v16 = vld [vmem:[#allocation10 + $0x38] sm:$0xff] }
 0x3c4   : > { %v1482_v20 = vmax.f32 %v1409_v11, %v1454_v17  ;;  %v1415_v21 = vadd.f32 %v1414_v19, %v3179_v59  ;;  %v1455_v23 = vmul.f32 0.2, %v1413_v18  ;;  %2424 = vmatpush3.msra.mxu0 %v2070_v6  ;;  %v2081_v11 = vld [vmem:[#allocation10 + $0xc0] sm:$0xff]  ;;  %v2079_v17 = vld [vmem:[#allocation10 + $0xb0] sm:$0xff]  ;;  %v2078_v19 = vld [vmem:[#allocation10 + $0xa8] sm:$0xff] }
 0x3c5   : > { %v1418_v24 = vpop.f32.mrf.mxu1  ;;  %2425 = vmatprep.subr.mxu0 %v2085_v2 }
 0x3c6   : > { %v1456_v25 = vmul.f32 0.2, %v1415_v21  ;;  %v1419_v26 = vadd.f32 %v1418_v24, %v3176_v58  ;;  %1687 = vmatprep.mubr.f32.mxu0 %v1482_v20  ;;  %v1483_v30 = vmax.f32 %v1413_v18, %v1455_v23  ;;  %2426 = vmatpush3.msra.mxu0 %v2069_v3  ;;  %v2063_v18 = vld [vmem:[#allocation10 + $0x30] sm:$0xff]  ;;  %v2062_v20 = vld [vmem:[#allocation10 + $0x28] sm:$0xff]  ;;  %v2076_v23 = vld [vmem:[#allocation10 + $0x98] sm:$0xff] }
 0x3c7   : > { %v1420_v27 = vpop.f32.mrf.mxu1  ;;  %1688 = vmatmul.mubr.f32.gmra.mxu0 %v1481_v22  ;;  %2427 = vmatprep.subr.mxu0 %v2084_v4  ;;  %v2061_v22 = vld [vmem:[#allocation10 + $0x20] sm:$0xff]  ;;  %v2060_v24 = vld [vmem:[#allocation10 + $0x18] sm:$0xff] }
 0x3c8   : > { %v1484_v28 = vmax.f32 %v1415_v21, %v1456_v25  ;;  %v1421_v29 = vadd.f32 %v1420_v27, %v3179_v59  ;;  %v1457_v31 = vmul.f32 0.2, %v1419_v26  ;;  %2428 = vmatpush3.msra.mxu0 %v2068_v13  ;;  %v2077_v21 = vld [vmem:[#allocation10 + $0xa0] sm:$0xff]  ;;  %v2075_v25 = vld [vmem:[#allocation10 + $0x90] sm:$0xff] }
 0x3c9   : > { %v1424_v32 = vpop.f32.mrf.mxu1  ;;  %2429 = vmatprep.subr.mxu0 %v2083_v0 }
 0x3ca   : > { %v1458_v33 = vmul.f32 0.2, %v1421_v29  ;;  %v1425_v34 = vadd.f32 %v1424_v32, %v3176_v58  ;;  %1693 = vmatprep.mubr.f32.mxu0 %v1484_v28  ;;  %v1485_v38 = vmax.f32 %v1419_v26, %v1457_v31  ;;  %2430 = vmatpush3.msra.mxu0 %v2067_v7  ;;  %v1557_v26 = vld [vmem:[#allocation8 + $0x6] sm:$0x3] }
 0x3cb   : > { %v1426_v35 = vpop.f32.mrf.mxu1  ;;  %1694 = vmatmul.mubr.f32.gmra.mxu0 %v1483_v30  ;;  %2431 = vmatprep.subr.mxu0 %v2082_v8  ;;  %v3210_v27 = vrot.slane %v1557_v26, %v3069_v10  ;;  %v3213_v28 = vrot.slane %v1557_v26, %v3071_v12 }
 0x3cc   : > { %v1486_v36 = vmax.f32 %v1421_v29, %v1458_v33  ;;  %v1427_v37 = vadd.f32 %v1426_v35, %v3179_v59  ;;  %v1459_v39 = vmul.f32 0.2, %v1425_v34  ;;  %2432 = vmatpush3.msra.mxu0 %v2066_v9 }
 0x3cd   : > { %v1430_v40 = vpop.f32.mrf.mxu1  ;;  %2433 = vmatprep.subr.mxu0 %v2081_v11 }
 0x3ce   : > { %v1460_v41 = vmul.f32 0.2, %v1427_v37  ;;  %v1431_v42 = vadd.f32 %v1430_v40, %v3176_v58  ;;  %1699 = vmatprep.mubr.f32.mxu0 %v1486_v36  ;;  %v1487_v46 = vmax.f32 %v1425_v34, %v1459_v39  ;;  %v1814_v58 = vld [vmem:[#allocation7 + $0x938] sm:$0xff]  ;;  %2434 = vmatpush3.msra.mxu0 %v2065_v14 }
 0x3cf   : > { %v1432_v43 = vpop.f32.mrf.mxu1  ;;  %1700 = vmatmul.mubr.f32.gmra.mxu0 %v1485_v38  ;;  %1908 = vmatprep.subr.mxu1 %v1814_v58 }
 0x3d0   : > { %v1488_v44 = vmax.f32 %v1427_v37, %v1460_v41  ;;  %v1433_v45 = vadd.f32 %v1432_v43, %v3179_v59  ;;  %v1461_v47 = vmul.f32 0.2, %v1431_v42  ;;  %1909 = vmatpush2.msra.mxu1 %v1813_v53  ;;  %v1811_v59 = vld [vmem:[#allocation7 + $0x920] sm:$0xff]  ;;  %2435 = vmatprep.subr.mxu0 %v2080_v15 }
 0x3d1   : > { %1910 = vmatprep.subr.mxu1 %v1812_v54  ;;  %2436 = vmatpush3.msra.mxu0 %v2064_v16 }
 0x3d2   : > { %v1462_v48 = vmul.f32 0.2, %v1433_v45  ;;  %1705 = vmatprep.mubr.f32.mxu0 %v1488_v44  ;;  %v1489_v50 = vmax.f32 %v1431_v42, %v1461_v47  ;;  %1911 = vmatpush2.msra.mxu1 %v1811_v59 }
 0x3d3   : > { %1706 = vmatmul.mubr.f32.gmra.mxu0 %v1487_v46  ;;  %1912 = vmatprep.subr.mxu1 %v1810_v55 }
 0x3d4   : > { %v1490_v49 = vmax.f32 %v1433_v45, %v1462_v48  ;;  %1913 = vmatpush2.msra.mxu1 %v1809_v56  ;;  %2437 = vmatprep.subr.mxu0 %v2079_v17 }
 0x3d5   : > { %1914 = vmatprep.subr.mxu1 %v1808_v57  ;;  %2438 = vmatpush3.msra.mxu0 %v2063_v18 }
 0x3d6   : > { %1711 = vmatprep.mubr.f32.mxu0 %v1490_v49  ;;  %1915 = vmatpush2.msra.mxu1 %v1807_v63 }
 0x3d7   : > { %1712 = vmatmul.mubr.f32.gmra.mxu0 %v1489_v50  ;;  %2439 = vmatprep.subr.mxu0 %v2078_v19 }
 0x3d8   : > { %2440 = vmatpush3.msra.mxu0 %v2062_v20 }
 0x3d9   : > { %2441 = vmatprep.subr.mxu0 %v2077_v21 }
 0x3da   : > { %2442 = vmatpush3.msra.mxu0 %v2061_v22 }
 0x3db   : > { %2443 = vmatprep.subr.mxu0 %v2076_v23 }
 0x3dc   : > { %2444 = vmatpush3.msra.mxu0 %v2060_v24 }
 0x3dd   : > { %2445 = vmatprep.subr.mxu0 %v2075_v25 }
 0x463   : > { %v1635_v29 = vpop.f32.mrf.mxu0 }
 0x464   : > { %v1636_v30 = vadd.f32 %v1635_v29, %v3210_v27 }
 0x465   : > { %v1637_v31 = vpop.f32.mrf.mxu0 }
 0x466   : > { %v1638_v32 = vadd.f32 %v1637_v31, %v3213_v28  ;;  %v1718_v33 = vmul.f32 0.2, %v1636_v30 }
 0x467   : > { %v1641_v34 = vpop.f32.mrf.mxu0 }
 0x468   : > { %v1719_v35 = vmul.f32 0.2, %v1638_v32  ;;  %v1642_v36 = vadd.f32 %v1641_v34, %v3210_v27  ;;  %v1746_v40 = vmax.f32 %v1636_v30, %v1718_v33 }
 0x469   : > { %v1643_v37 = vpop.f32.mrf.mxu0 }
 0x46a   : > { %v1747_v38 = vmax.f32 %v1638_v32, %v1719_v35  ;;  %v1644_v39 = vadd.f32 %v1643_v37, %v3213_v28  ;;  %v1720_v41 = vmul.f32 0.2, %v1642_v36 }
 0x46b   : > { %v1647_v42 = vpop.f32.mrf.mxu0 }
 0x46c   : > { %v1721_v43 = vmul.f32 0.2, %v1644_v39  ;;  %v1648_v44 = vadd.f32 %v1647_v42, %v3210_v27  ;;  %1916 = vmatprep.mubr.f32.mxu1 %v1747_v38  ;;  %v1748_v48 = vmax.f32 %v1642_v36, %v1720_v41 }
 0x46d   : > { %v1649_v45 = vpop.f32.mrf.mxu0  ;;  %1917 = vmatmul.mubr.f32.vlgmr.msra.gmra.mxu1 %v1746_v40 }
 0x46e   : > { %v1749_v46 = vmax.f32 %v1644_v39, %v1721_v43  ;;  %v1650_v47 = vadd.f32 %v1649_v45, %v3213_v28  ;;  %v1722_v49 = vmul.f32 0.2, %v1648_v44 }
 0x46f   : > { %v1653_v50 = vpop.f32.mrf.mxu0 }
 0x470   : > { %v1723_v51 = vmul.f32 0.2, %v1650_v47  ;;  %v1654_v52 = vadd.f32 %v1653_v50, %v3210_v27  ;;  %1922 = vmatprep.mubr.f32.mxu1 %v1749_v46  ;;  %v1750_v59 = vmax.f32 %v1648_v44, %v1722_v49 }
 0x471   : > { %v1655_v58 = vpop.f32.mrf.mxu0  ;;  %1923 = vmatmul.mubr.f32.gmra.mxu1 %v1748_v48 }
 0x472   : > { %v1751_v53 = vmax.f32 %v1650_v47, %v1723_v51  ;;  %v1656_v54 = vadd.f32 %v1655_v58, %v3213_v28  ;;  %v1724_v55 = vmul.f32 0.2, %v1654_v52 }
 0x473   : > { %v1659_v56 = vpop.f32.mrf.mxu0 }
 0x474   : > { %v1725_v57 = vmul.f32 0.2, %v1656_v54  ;;  %v1660_v63 = vadd.f32 %v1659_v56, %v3210_v27  ;;  %1928 = vmatprep.mubr.f32.mxu1 %v1751_v53  ;;  %v1752_v62 = vmax.f32 %v1654_v52, %v1724_v55 }
 0x475   : > { %v1661_v1 = vpop.f32.mrf.mxu0  ;;  %1929 = vmatmul.mubr.f32.gmra.mxu1 %v1750_v59 }
 0x476   : > { %v1753_v60 = vmax.f32 %v1656_v54, %v1725_v57  ;;  %v1662_v61 = vadd.f32 %v1661_v1, %v3213_v28  ;;  %v1726_v5 = vmul.f32 0.2, %v1660_v63 }
 0x477   : > { %v1665_v6 = vpop.f32.mrf.mxu0 }
 0x478   : > { %v1727_v2 = vmul.f32 0.2, %v1662_v61  ;;  %v1666_v3 = vadd.f32 %v1665_v6, %v3210_v27  ;;  %1934 = vmatprep.mubr.f32.mxu1 %v1753_v60  ;;  %v1754_v7 = vmax.f32 %v1660_v63, %v1726_v5 }
 0x479   : > { %v1667_v4 = vpop.f32.mrf.mxu0  ;;  %1935 = vmatmul.mubr.f32.gmra.mxu1 %v1752_v62 }
 0x47a   : > { %v1755_v13 = vmax.f32 %v1662_v61, %v1727_v2  ;;  %v1668_v0 = vadd.f32 %v1667_v4, %v3213_v28  ;;  %v1728_v8 = vmul.f32 0.2, %v1666_v3 }
 0x47b   : > { %v1671_v9 = vpop.f32.mrf.mxu0 }
 0x47c   : > { %v1729_v11 = vmul.f32 0.2, %v1668_v0  ;;  %v1672_v14 = vadd.f32 %v1671_v9, %v3210_v27  ;;  %1940 = vmatprep.mubr.f32.mxu1 %v1755_v13  ;;  %v1756_v18 = vmax.f32 %v1666_v3, %v1728_v8 }
 0x47d   : > { %v1673_v15 = vpop.f32.mrf.mxu0  ;;  %1941 = vmatmul.mubr.f32.gmra.mxu1 %v1754_v7 }
 0x47e   : > { %v1757_v16 = vmax.f32 %v1668_v0, %v1729_v11  ;;  %v1674_v17 = vadd.f32 %v1673_v15, %v3213_v28  ;;  %v1730_v19 = vmul.f32 0.2, %v1672_v14 }
 0x47f   : > { %v1677_v20 = vpop.f32.mrf.mxu0 }
 0x480   : > { %v1731_v21 = vmul.f32 0.2, %v1674_v17  ;;  %v1678_v22 = vadd.f32 %v1677_v20, %v3210_v27  ;;  %1946 = vmatprep.mubr.f32.mxu1 %v1757_v16  ;;  %v1758_v26 = vmax.f32 %v1672_v14, %v1730_v19  ;;  %v2059_v19 = vld [vmem:[#allocation10 + $0x10] sm:$0xff]  ;;  %v2074_v20 = vld [vmem:[#allocation10 + $0x88] sm:$0xff] }
 0x481   : > { %v1679_v23 = vpop.f32.mrf.mxu0  ;;  %1947 = vmatmul.mubr.f32.gmra.mxu1 %v1756_v18  ;;  %2446 = vmatpush3.msra.mxu0 %v2059_v19 }
 0x482   : > { %v1759_v24 = vmax.f32 %v1674_v17, %v1731_v21  ;;  %v1680_v25 = vadd.f32 %v1679_v23, %v3213_v28  ;;  %v1732_v29 = vmul.f32 0.2, %v1678_v22  ;;  %2447 = vmatprep.subr.mxu0 %v2074_v20  ;;  %v2073_v21 = vld [vmem:[#allocation10 + $0x80] sm:$0xff] }
 0x483   : > { %v1683_v30 = vpop.f32.mrf.mxu0 }
 0x484   : > { %v1733_v31 = vmul.f32 0.2, %v1680_v25  ;;  %v1684_v32 = vadd.f32 %v1683_v30, %v3210_v27  ;;  %1952 = vmatprep.mubr.f32.mxu1 %v1759_v24  ;;  %v1760_v36 = vmax.f32 %v1678_v22, %v1732_v29  ;;  %v2057_v22 = vld [vmem:[#allocation10] sm:$0xff] }
 0x485   : > { %v1685_v33 = vpop.f32.mrf.mxu0  ;;  %1953 = vmatmul.mubr.f32.gmra.mxu1 %v1758_v26 }
 0x486   : > { %v1761_v34 = vmax.f32 %v1680_v25, %v1733_v31  ;;  %v1686_v35 = vadd.f32 %v1685_v33, %v3213_v28  ;;  %v1734_v37 = vmul.f32 0.2, %v1684_v32 }
 0x487   : > { %v1689_v38 = vpop.f32.mrf.mxu0 }
 0x488   : > { %v1735_v39 = vmul.f32 0.2, %v1686_v35  ;;  %v1690_v40 = vadd.f32 %v1689_v38, %v3210_v27  ;;  %1958 = vmatprep.mubr.f32.mxu1 %v1761_v34  ;;  %v1762_v44 = vmax.f32 %v1684_v32, %v1734_v37 }
 0x489   : > { %v1691_v41 = vpop.f32.mrf.mxu0  ;;  %1959 = vmatmul.mubr.f32.gmra.mxu1 %v1760_v36 }
 0x48a   : > { %v1763_v42 = vmax.f32 %v1686_v35, %v1735_v39  ;;  %v1692_v43 = vadd.f32 %v1691_v41, %v3213_v28  ;;  %v1736_v45 = vmul.f32 0.2, %v1690_v40 }
 0x48b   : > { %v1695_v46 = vpop.f32.mrf.mxu0 }
 0x48c   : > { %v1737_v47 = vmul.f32 0.2, %v1692_v43  ;;  %v1696_v48 = vadd.f32 %v1695_v46, %v3210_v27  ;;  %1964 = vmatprep.mubr.f32.mxu1 %v1763_v42  ;;  %v1764_v52 = vmax.f32 %v1690_v40, %v1736_v45 }
 0x48d   : > { %v1697_v49 = vpop.f32.mrf.mxu0  ;;  %1965 = vmatmul.mubr.f32.gmra.mxu1 %v1762_v44 }
 0x48e   : > { %v1765_v50 = vmax.f32 %v1692_v43, %v1737_v47  ;;  %v1698_v51 = vadd.f32 %v1697_v49, %v3213_v28  ;;  %v1738_v58 = vmul.f32 0.2, %v1696_v48 }
 0x48f   : > { %v1701_v53 = vpop.f32.mrf.mxu0 }
 0x490   : > { %v1739_v54 = vmul.f32 0.2, %v1698_v51  ;;  %v1702_v59 = vadd.f32 %v1701_v53, %v3210_v27  ;;  %1970 = vmatprep.mubr.f32.mxu1 %v1765_v50  ;;  %v1766_v63 = vmax.f32 %v1696_v48, %v1738_v58 }
 0x491   : > { %v1703_v55 = vpop.f32.mrf.mxu0  ;;  %1971 = vmatmul.mubr.f32.gmra.mxu1 %v1764_v52 }
 0x492   : > { %v1767_v56 = vmax.f32 %v1698_v51, %v1739_v54  ;;  %v1704_v57 = vadd.f32 %v1703_v55, %v3213_v28  ;;  %v1740_v1 = vmul.f32 0.2, %v1702_v59 }
 0x493   : > { %v1707_v60 = vpop.f32.mrf.mxu0 }
 0x494   : > { %v1741_v61 = vmul.f32 0.2, %v1704_v57  ;;  %v1708_v62 = vadd.f32 %v1707_v60, %v3210_v27  ;;  %1976 = vmatprep.mubr.f32.mxu1 %v1767_v56  ;;  %v1768_v3 = vmax.f32 %v1702_v59, %v1740_v1 }
 0x495   : > { %v1709_v5 = vpop.f32.mrf.mxu0  ;;  %1977 = vmatmul.mubr.f32.gmra.mxu1 %v1766_v63 }
 0x496   : > { %v1769_v6 = vmax.f32 %v1704_v57, %v1741_v61  ;;  %v1710_v2 = vadd.f32 %v1709_v5, %v3213_v28  ;;  %v1742_v4 = vmul.f32 0.2, %v1708_v62 }
 0x497   : > { %v1713_v13 = vpop.f32.mrf.mxu0 }
 0x498   : > { %v1743_v0 = vmul.f32 0.2, %v1710_v2  ;;  %v1714_v7 = vadd.f32 %v1713_v13, %v3210_v27  ;;  %1982 = vmatprep.mubr.f32.mxu1 %v1769_v6  ;;  %v1770_v14 = vmax.f32 %v1708_v62, %v1742_v4  ;;  %v2058_v27 = vld [vmem:[#allocation10 + $0x8] sm:$0xff] }
 0x499   : > { %v1715_v8 = vpop.f32.mrf.mxu0  ;;  %1983 = vmatmul.mubr.f32.gmra.mxu1 %v1768_v3  ;;  %2448 = vmatpush3.msra.mxu0 %v2058_v27 }
 0x49a   : > { %v1771_v9 = vmax.f32 %v1710_v2, %v1743_v0  ;;  %v1716_v11 = vadd.f32 %v1715_v8, %v3213_v28  ;;  %v1744_v15 = vmul.f32 0.2, %v1714_v7  ;;  %2449 = vmatprep.subr.mxu0 %v2073_v21  ;;  %v1840_v28 = vld [vmem:[#allocation8 + $0x8] sm:$0x3] }
 0x49b   : > { %2450 = vmatpush3.msra.mxu0 %v2057_v22  ;;  %v3244_v23 = vrot.slane %v1840_v28, %v3069_v10  ;;  %v3247_v24 = vrot.slane %v1840_v28, %v3071_v12 }
 0x49c   : > { %v1745_v16 = vmul.f32 0.2, %v1716_v11  ;;  %1988 = vmatprep.mubr.f32.mxu1 %v1771_v9  ;;  %v1772_v18 = vmax.f32 %v1714_v7, %v1744_v15 }
 0x49d   : > { %1989 = vmatmul.mubr.f32.gmra.mxu1 %v1770_v14 }
 0x49e   : > { %v1773_v17 = vmax.f32 %v1716_v11, %v1745_v16 }
 0x4a0   : > { %1994 = vmatprep.mubr.f32.mxu1 %v1773_v17 }
 0x4a1   : > { %1995 = vmatmul.mubr.f32.gmra.mxu1 %v1772_v18 }
 0x52d   : > { %v1918_v25 = vpop.f32.mrf.mxu1 }
 0x52e   : > { %v1919_v26 = vadd.f32 %v1918_v25, %v3244_v23 }
 0x52f   : > { %v1920_v29 = vpop.f32.mrf.mxu1 }
 0x530   : > { %v1921_v30 = vadd.f32 %v1920_v29, %v3247_v24  ;;  %v2001_v31 = vmul.f32 0.2, %v1919_v26 }
 0x531   : > { %v1924_v32 = vpop.f32.mrf.mxu1 }
 0x532   : > { %v2002_v33 = vmul.f32 0.2, %v1921_v30  ;;  %v1925_v34 = vadd.f32 %v1924_v32, %v3244_v23  ;;  %v2029_v10 = vmax.f32 %v1919_v26, %v2001_v31 }
 0x533   : > { %v1926_v35 = vpop.f32.mrf.mxu1 }
 0x534   : > { %v2030_v36 = vmax.f32 %v1921_v30, %v2002_v33  ;;  %v1927_v37 = vadd.f32 %v1926_v35, %v3247_v24  ;;  %v2003_v38 = vmul.f32 0.2, %v1925_v34 }
 0x535   : > { %v1930_v39 = vpop.f32.mrf.mxu1 }
 0x536   : > { %v2004_v12 = vmul.f32 0.2, %v1927_v37  ;;  %v1931_v40 = vadd.f32 %v1930_v39, %v3244_v23  ;;  %2160 = vmatprep.mubr.f32.mxu0 %v2030_v36  ;;  %v2031_v44 = vmax.f32 %v1925_v34, %v2003_v38 }
 0x537   : > { %v1932_v41 = vpop.f32.mrf.mxu1  ;;  %2161 = vmatmul.mubr.f32.vlgmr.msra.gmra.mxu0 %v2029_v10 }
 0x538   : > { %v2032_v42 = vmax.f32 %v1927_v37, %v2004_v12  ;;  %v1933_v43 = vadd.f32 %v1932_v41, %v3247_v24  ;;  %v2005_v45 = vmul.f32 0.2, %v1931_v40 }
 0x539   : > { %v1936_v46 = vpop.f32.mrf.mxu1 }
 0x53a   : > { %v2006_v47 = vmul.f32 0.2, %v1933_v43  ;;  %v1937_v48 = vadd.f32 %v1936_v46, %v3244_v23  ;;  %2165 = vmatprep.mubr.f32.mxu0 %v2032_v42  ;;  %v2033_v52 = vmax.f32 %v1931_v40, %v2005_v45 }
 0x53b   : > { %v1938_v49 = vpop.f32.mrf.mxu1  ;;  %2166 = vmatmul.mubr.f32.gmra.mxu0 %v2031_v44 }
 0x53c   : > { %v2034_v50 = vmax.f32 %v1933_v43, %v2006_v47  ;;  %v1939_v51 = vadd.f32 %v1938_v49, %v3247_v24  ;;  %v2007_v58 = vmul.f32 0.2, %v1937_v48 }
 0x53d   : > { %v1942_v53 = vpop.f32.mrf.mxu1 }
 0x53e   : > { %v2008_v54 = vmul.f32 0.2, %v1939_v51  ;;  %v1943_v59 = vadd.f32 %v1942_v53, %v3244_v23  ;;  %2170 = vmatprep.mubr.f32.mxu0 %v2034_v50  ;;  %v2035_v63 = vmax.f32 %v1937_v48, %v2007_v58 }
 0x53f   : > { %v1944_v55 = vpop.f32.mrf.mxu1  ;;  %2171 = vmatmul.mubr.f32.gmra.mxu0 %v2033_v52 }
 0x540   : > { %v2036_v56 = vmax.f32 %v1939_v51, %v2008_v54  ;;  %v1945_v57 = vadd.f32 %v1944_v55, %v3247_v24  ;;  %v2009_v1 = vmul.f32 0.2, %v1943_v59 }
 0x541   : > { %v1948_v60 = vpop.f32.mrf.mxu1 }
 0x542   : > { %v2010_v61 = vmul.f32 0.2, %v1945_v57  ;;  %v1949_v62 = vadd.f32 %v1948_v60, %v3244_v23  ;;  %2175 = vmatprep.mubr.f32.mxu0 %v2036_v56  ;;  %v2037_v3 = vmax.f32 %v1943_v59, %v2009_v1 }
 0x543   : > { %v1950_v5 = vpop.f32.mrf.mxu1  ;;  %2176 = vmatmul.mubr.f32.gmra.mxu0 %v2035_v63 }
 0x544   : > { %v2038_v6 = vmax.f32 %v1945_v57, %v2010_v61  ;;  %v1951_v2 = vadd.f32 %v1950_v5, %v3247_v24  ;;  %v2011_v4 = vmul.f32 0.2, %v1949_v62 }
 0x545   : > { %v1954_v13 = vpop.f32.mrf.mxu1 }
 0x546   : > { %v2012_v0 = vmul.f32 0.2, %v1951_v2  ;;  %v1955_v7 = vadd.f32 %v1954_v13, %v3244_v23  ;;  %2180 = vmatprep.mubr.f32.mxu0 %v2038_v6  ;;  %v2039_v14 = vmax.f32 %v1949_v62, %v2011_v4 }
 0x547   : > { %v1956_v8 = vpop.f32.mrf.mxu1  ;;  %2181 = vmatmul.mubr.f32.gmra.mxu0 %v2037_v3 }
 0x548   : > { %v2040_v9 = vmax.f32 %v1951_v2, %v2012_v0  ;;  %v1957_v11 = vadd.f32 %v1956_v8, %v3247_v24  ;;  %v2013_v15 = vmul.f32 0.2, %v1955_v7 }
 0x549   : > { %v1960_v16 = vpop.f32.mrf.mxu1 }
 0x54a   : > { %v2014_v17 = vmul.f32 0.2, %v1957_v11  ;;  %v1961_v18 = vadd.f32 %v1960_v16, %v3244_v23  ;;  %2185 = vmatprep.mubr.f32.mxu0 %v2040_v9  ;;  %v2041_v21 = vmax.f32 %v1955_v7, %v2013_v15 }
 0x54b   : > { %v1962_v19 = vpop.f32.mrf.mxu1  ;;  %2186 = vmatmul.mubr.f32.gmra.mxu0 %v2039_v14 }
 0x54c   : > { %v2042_v20 = vmax.f32 %v1957_v11, %v2014_v17  ;;  %v1963_v27 = vadd.f32 %v1962_v19, %v3247_v24  ;;  %v2015_v22 = vmul.f32 0.2, %v1961_v18 }
 0x54d   : > { %v1966_v28 = vpop.f32.mrf.mxu1 }
 0x54e   : > { %v2016_v25 = vmul.f32 0.2, %v1963_v27  ;;  %v1967_v26 = vadd.f32 %v1966_v28, %v3244_v23  ;;  %2190 = vmatprep.mubr.f32.mxu0 %v2042_v20  ;;  %v2043_v32 = vmax.f32 %v1961_v18, %v2015_v22 }
 0x54f   : > { %v1968_v29 = vpop.f32.mrf.mxu1  ;;  %2191 = vmatmul.mubr.f32.gmra.mxu0 %v2041_v21 }
 0x550   : > { %v2044_v30 = vmax.f32 %v1963_v27, %v2016_v25  ;;  %v1969_v31 = vadd.f32 %v1968_v29, %v3247_v24  ;;  %v2017_v33 = vmul.f32 0.2, %v1967_v26 }
 0x551   : > { %v1972_v34 = vpop.f32.mrf.mxu1 }
 0x552   : > { %v2018_v35 = vmul.f32 0.2, %v1969_v31  ;;  %v1973_v36 = vadd.f32 %v1972_v34, %v3244_v23  ;;  %2195 = vmatprep.mubr.f32.mxu0 %v2044_v30  ;;  %v2045_v39 = vmax.f32 %v1967_v26, %v2017_v33 }
 0x553   : > { %v1974_v37 = vpop.f32.mrf.mxu1  ;;  %2196 = vmatmul.mubr.f32.gmra.mxu0 %v2043_v32 }
 0x554   : > { %v2046_v10 = vmax.f32 %v1969_v31, %v2018_v35  ;;  %v1975_v38 = vadd.f32 %v1974_v37, %v3247_v24  ;;  %v2019_v12 = vmul.f32 0.2, %v1973_v36 }
 0x555   : > { %v1978_v40 = vpop.f32.mrf.mxu1 }
 0x556   : > { %v2020_v41 = vmul.f32 0.2, %v1975_v38  ;;  %v1979_v42 = vadd.f32 %v1978_v40, %v3244_v23  ;;  %2200 = vmatprep.mubr.f32.mxu0 %v2046_v10  ;;  %v2047_v46 = vmax.f32 %v1973_v36, %v2019_v12 }
 0x557   : > { %v1980_v43 = vpop.f32.mrf.mxu1  ;;  %2201 = vmatmul.mubr.f32.gmra.mxu0 %v2045_v39 }
 0x558   : > { %v2048_v44 = vmax.f32 %v1975_v38, %v2020_v41  ;;  %v1981_v45 = vadd.f32 %v1980_v43, %v3247_v24  ;;  %v2021_v47 = vmul.f32 0.2, %v1979_v42 }
 0x559   : > { %v1984_v48 = vpop.f32.mrf.mxu1 }
 0x55a   : > { %v2022_v49 = vmul.f32 0.2, %v1981_v45  ;;  %v1985_v50 = vadd.f32 %v1984_v48, %v3244_v23  ;;  %2205 = vmatprep.mubr.f32.mxu0 %v2048_v44  ;;  %v2049_v53 = vmax.f32 %v1979_v42, %v2021_v47 }
 0x55b   : > { %v1986_v51 = vpop.f32.mrf.mxu1  ;;  %2206 = vmatmul.mubr.f32.gmra.mxu0 %v2047_v46 }
 0x55c   : > { %v2050_v52 = vmax.f32 %v1981_v45, %v2022_v49  ;;  %v1987_v58 = vadd.f32 %v1986_v51, %v3247_v24  ;;  %v2023_v54 = vmul.f32 0.2, %v1985_v50 }
 0x55d   : > { %v1990_v59 = vpop.f32.mrf.mxu1 }
 0x55e   : > { %v2024_v55 = vmul.f32 0.2, %v1987_v58  ;;  %v1991_v56 = vadd.f32 %v1990_v59, %v3244_v23  ;;  %2210 = vmatprep.mubr.f32.mxu0 %v2050_v52  ;;  %v2051_v60 = vmax.f32 %v1985_v50, %v2023_v54 }
 0x55f   : > { %v1992_v57 = vpop.f32.mrf.mxu1  ;;  %2211 = vmatmul.mubr.f32.gmra.mxu0 %v2049_v53 }
 0x560   : > { %v2052_v63 = vmax.f32 %v1987_v58, %v2024_v55  ;;  %v1993_v1 = vadd.f32 %v1992_v57, %v3247_v24  ;;  %v2025_v61 = vmul.f32 0.2, %v1991_v56 }
 0x561   : > { %v1996_v62 = vpop.f32.mrf.mxu1 }
 0x562   : > { %v2026_v5 = vmul.f32 0.2, %v1993_v1  ;;  %v1997_v6 = vadd.f32 %v1996_v62, %v3244_v23  ;;  %2215 = vmatprep.mubr.f32.mxu0 %v2052_v63  ;;  %v2053_v13 = vmax.f32 %v1991_v56, %v2025_v61  ;;  %v3280_v23 = vld [vmem:[#allocation11] ss:$0 sm:$0xff] }
 0x563   : > { %v1998_v2 = vpop.f32.mrf.mxu1  ;;  %2216 = vmatmul.mubr.f32.gmra.mxu0 %v2051_v60 }
 0x564   : > { %v2054_v3 = vmax.f32 %v1993_v1, %v2026_v5  ;;  %v1999_v4 = vadd.f32 %v1998_v2, %v3247_v24  ;;  %v2027_v0 = vmul.f32 0.2, %v1997_v6 }
 0x566   : > { %v2028_v7 = vmul.f32 0.2, %v1999_v4  ;;  %2220 = vmatprep.mubr.f32.mxu0 %v2054_v3  ;;  %v2055_v9 = vmax.f32 %v1997_v6, %v2027_v0 }
 0x567   : > { %2221 = vmatmul.mubr.f32.gmra.mxu0 %v2053_v13 }
 0x568   : > { %v2056_v8 = vmax.f32 %v1999_v4, %v2028_v7 }
 0x56a   : > { %2225 = vmatprep.mubr.f32.mxu0 %v2056_v8 }
 0x56b   : > { %2226 = vmatmul.mubr.f32.gmra.mxu0 %v2055_v9 }
 0x5f7   : > { %v2451_v11 = vpop.f32.mrf.mxu0 }
 0x5f9   : > { %v2452_v14 = vpop.f32.mrf.mxu0 }
 0x5fa   : > { %v2453_v15 = vadd.f32 %v2452_v14, %v2451_v11 }
 0x5fb   : > { %v2454_v16 = vpop.f32.mrf.mxu0 }
 0x5fc   : > { %v2163_v24 = vadd.f32 %v2453_v15, %v3280_v23 }
 0x5fd   : > { %v2455_v17 = vpop.f32.mrf.mxu0 }
 0x5fe   : > { %2231 = vst [vmem:[%s3283_s17] sm:$0xff] %v2163_v24  ;;  %v2456_v18 = vadd.f32 %v2455_v17, %v2454_v16 }
 0x5ff   : > { %v2457_v19 = vpop.f32.mrf.mxu0 }
 0x600   : > { %v2168_v20 = vadd.f32 %v2456_v18, %v3280_v23 }
 0x601   : > { %v2458_v27 = vpop.f32.mrf.mxu0 }
 0x602   : > { %2232 = vst [vmem:[%s3283_s17 + $0x8] sm:$0xff] %v2168_v20  ;;  %v2459_v21 = vadd.f32 %v2458_v27, %v2457_v19 }
 0x603   : > { %v2460_v22 = vpop.f32.mrf.mxu0 }
 0x604   : > { %v2173_v28 = vadd.f32 %v2459_v21, %v3280_v23 }
 0x605   : > { %v2461_v25 = vpop.f32.mrf.mxu0 }
 0x606   : > { %2233 = vst [vmem:[%s3283_s17 + $0x10] sm:$0xff] %v2173_v28  ;;  %v2462_v26 = vadd.f32 %v2461_v25, %v2460_v22 }
 0x607   : > { %v2463_v29 = vpop.f32.mrf.mxu0 }
 0x608   : > { %v2178_v30 = vadd.f32 %v2462_v26, %v3280_v23 }
 0x609   : > { %v2464_v31 = vpop.f32.mrf.mxu0 }
 0x60a   : > { %2234 = vst [vmem:[%s3283_s17 + $0x18] sm:$0xff] %v2178_v30  ;;  %v2465_v32 = vadd.f32 %v2464_v31, %v2463_v29 }
 0x60b   : > { %v2466_v33 = vpop.f32.mrf.mxu0 }
 0x60c   : > { %v2183_v34 = vadd.f32 %v2465_v32, %v3280_v23 }
 0x60d   : > { %v2467_v35 = vpop.f32.mrf.mxu0 }
 0x60e   : > { %2235 = vst [vmem:[%s3283_s17 + $0x20] sm:$0xff] %v2183_v34  ;;  %v2468_v36 = vadd.f32 %v2467_v35, %v2466_v33 }
 0x60f   : > { %v2469_v37 = vpop.f32.mrf.mxu0 }
 0x610   : > { %v2188_v10 = vadd.f32 %v2468_v36, %v3280_v23 }
 0x611   : > { %v2470_v38 = vpop.f32.mrf.mxu0 }
 0x612   : > { %2236 = vst [vmem:[%s3283_s17 + $0x28] sm:$0xff] %v2188_v10  ;;  %v2471_v39 = vadd.f32 %v2470_v38, %v2469_v37 }
 0x613   : > { %v2472_v12 = vpop.f32.mrf.mxu0 }
 0x614   : > { %v2193_v40 = vadd.f32 %v2471_v39, %v3280_v23 }
 0x615   : > { %v2473_v41 = vpop.f32.mrf.mxu0 }
 0x616   : > { %2237 = vst [vmem:[%s3283_s17 + $0x30] sm:$0xff] %v2193_v40  ;;  %v2474_v42 = vadd.f32 %v2473_v41, %v2472_v12 }
 0x617   : > { %v2475_v43 = vpop.f32.mrf.mxu0 }
 0x618   : > { %v2198_v44 = vadd.f32 %v2474_v42, %v3280_v23 }
 0x619   : > { %v2476_v45 = vpop.f32.mrf.mxu0 }
 0x61a   : > { %2238 = vst [vmem:[%s3283_s17 + $0x38] sm:$0xff] %v2198_v44  ;;  %v2477_v46 = vadd.f32 %v2476_v45, %v2475_v43 }
 0x61b   : > { %v2478_v47 = vpop.f32.mrf.mxu0 }
 0x61c   : > { %v2203_v48 = vadd.f32 %v2477_v46, %v3280_v23 }
 0x61d   : > { %v2479_v49 = vpop.f32.mrf.mxu0 }
 0x61e   : > { %2239 = vst [vmem:[%s3283_s17 + $0x40] sm:$0xff] %v2203_v48  ;;  %v2480_v50 = vadd.f32 %v2479_v49, %v2478_v47 }
 0x61f   : > { %v2481_v51 = vpop.f32.mrf.mxu0 }
 0x620   : > { %v2208_v52 = vadd.f32 %v2480_v50, %v3280_v23 }
 0x621   : > { %v2482_v58 = vpop.f32.mrf.mxu0 }
 0x622   : > { %2240 = vst [vmem:[%s3283_s17 + $0x48] sm:$0xff] %v2208_v52  ;;  %v2483_v53 = vadd.f32 %v2482_v58, %v2481_v51 }
 0x623   : > { %v2484_v54 = vpop.f32.mrf.mxu0 }
 0x624   : > { %v2213_v59 = vadd.f32 %v2483_v53, %v3280_v23 }
 0x625   : > { %v2485_v55 = vpop.f32.mrf.mxu0 }
 0x626   : > { %2241 = vst [vmem:[%s3283_s17 + $0x50] sm:$0xff] %v2213_v59  ;;  %v2486_v56 = vadd.f32 %v2485_v55, %v2484_v54 }
 0x627   : > { %v2487_v57 = vpop.f32.mrf.mxu0 }
 0x628   : > { %v2218_v63 = vadd.f32 %v2486_v56, %v3280_v23 }
 0x629   : > { %v2488_v1 = vpop.f32.mrf.mxu0 }
 0x62a   : > { %2242 = vst [vmem:[%s3283_s17 + $0x58] sm:$0xff] %v2218_v63  ;;  %v2489_v60 = vadd.f32 %v2488_v1, %v2487_v57 }
 0x62b   : > { %v2490_v61 = vpop.f32.mrf.mxu0 }
 0x62c   : > { %v2223_v62 = vadd.f32 %v2489_v60, %v3280_v23 }
 0x62d   : > { %v2491_v5 = vpop.f32.mrf.mxu0 }
 0x62e   : > { %2243 = vst [vmem:[%s3283_s17 + $0x60] sm:$0xff] %v2223_v62  ;;  %v2492_v6 = vadd.f32 %v2491_v5, %v2490_v61 }
 0x630   : > { %v2228_v2 = vadd.f32 %v2492_v6, %v3280_v23 }
 0x632   : > { %2244 = vst [vmem:[%s3283_s17 + $0x68] sm:$0xff] %v2228_v2 }
 0x633   : > { %2773 = shalt.err (!%p2770_p6)
}
 0x634   : > { %s2774_s15 = scalar_lea.hbm %s3315_s19, 1792  ;;  %s2778_s8 = scalar_lea.hbm %s3370_s7, 3584 }
 0x635   : > { %p2775_p10 = scmp.ne.s32.totalorder %s3315_s19, %s2774_s15  ;;  %p2779_p11 = scmp.lt.s32.totalorder %s3315_s19, %s3370_s7 }
 0x636   : > { %p2780_p0 = scmp.lt.s32.totalorder %s2778_s8, %s2774_s15 }
 0x637   : > { %p2776_p8 = pnand %p2775_p10, %p3388_p3 }
 0x638   : > { %p2781_p1 = por %p2780_p0, %p2779_p11 }
 0x639   : > { %p2777_p12 = pneg %p2776_p8 }
 0x63b   : > { %p2782_p2 = pnand %p2781_p1, %p2777_p12 }
 0x63d   : > { %2785 = shalt.err (!%p2782_p2)
}
 0x63e   : > { %s2852_s16 = smov 128   ;;  %s2853_s20 = smov 8  }
 0x63f   : > { %2518 = dma.vmem_to_hbm [thread:$0]  (%p3388_p3), %s3317_s14, 1792, %s3315_s19, %s3323_s28, %s2852_s16, %s2852_s16, %s2853_s20  }
 0x640 PF: > { %p2555_p9 = scmp.ge.s32.totalorder %s2836_s27, 2  ;;  %s2274_s22 = sand.u32 1, %s2824_s24  }
 0x641   : > { %p3389_p4 = scmp.ne.s32.totalorder %s3375_s12, 0  ;;  %s2275_s13 = scalar_lea.sflag [#allocation4], %s2274_s22 }
 0x643   : > { %p2540_p7 = pnand %p2555_p9, %p3389_p4 }
 0x645   : > { %p2541_p5 = pneg %p2540_p7 }
 0x647   : > { %2819 = dma.done.wait (%p2541_p5), %s2275_s13, 1792  }
 0x648   : > { %2821 = vsyncadd (%p2541_p5), %s2275_s13, 4294965504  ;;  %p21_p13 = scmp.ge.s32.totalorder %s2919_s30, 4   ;;  %s3390_s24 = smov %s2828_s25 }
 0x649   : > { %s3391_s25 = smov %s2832_s26  ;;  %s3392_s26 = smov %s2930_s10 }
 0x64a   : > { %s3393_s27 = smov %s2919_s30  ;;  %23 = sbr.rel (!%p21_p13) target bundleno = 7 (0x7), region = 116 }
 0x64f   :  { %2280 = vsyncpa [#allocation3], 1 }
 0x650   :  { %2282 = vsyncpa [#allocation3 + $0x1], 1 }
 0x651   :  { %2283 = vsyncpa [#allocation6], 1 }
 0x652   :  { %2284 = vsyncpa [#allocation9], 1 }
 0x653   :  { %2285 = vsyncpa [#allocation12], 1 }
 0x654   :  { %2286 = vsyncpa [#allocation4], 1 }
 0x655   :  { %2288 = vsyncpa [#allocation4 + $0x1], 1 }

// kernel: tpu_custom_call.1
= control target key start
LH: loop header
LB: loop body
LE: loop exit
PB: predicated region body
PF: predicated region fallthrough
CT: control target
= control target key end

     0   :  { %12 = vsyncpa [#allocation3], 0  ;;  %s3363_s0 = inlined_call_operand.vmem [shape: f32[224,3], index: 0, kind: input, shape index: {}]   ;;  %s3364_s1 = inlined_call_operand.hbm [shape: f32[3,256], index: 1, kind: input, shape index: {}]   ;;  %s3365_s2 = inlined_call_operand.hbm [shape: f32[1,256], index: 2, kind: input, shape index: {}]   ;;  %s3366_s3 = inlined_call_operand.hbm [shape: f32[5,256,256], index: 3, kind: input, shape index: {}]   ;;  %s3367_s4 = inlined_call_operand.hbm [shape: f32[5,1,256], index: 4, kind: input, shape index: {}]   ;;  %s3368_s5 = inlined_call_operand.hbm [shape: f32[256,128], index: 5, kind: input, shape index: {}]   ;;  %s3369_s6 = inlined_call_operand.hbm [shape: f32[1,128], index: 6, kind: input, shape index: {}]   ;;  %s3370_s7 = inlined_call_operand.hbm [shape: f32[224,128], index: 7, kind: output, shape index: {}]  }
   0x1   :  { %13 = vsyncpa [#allocation6], 0 }
   0x2   :  { %14 = vsyncpa [#allocation9], 0 }
   0x3   :  { %15 = vsyncpa [#allocation12], 0 }
   0x4   :  { %16 = vsyncpa [#allocation4], 0 }
   0x5   :  { %18 = vsyncpa [#allocation4 + $0x1], 0  ;;  %s2894_s24 = smov 0   ;;  %s2896_s25 = smov 0  }
   0x6   :  { %s2898_s26 = smov 0   ;;  %s2900_s27 = smov 0  }
   0x7 LB: > { %s2915_s28 = sadd.s32 4294967295, %s2836_s27   ;;  %s2381_s29 = sadd.s32 4294967294, %s2836_s27   ;;  %s2836_s27 = sphi %s2900_s27, %s3393_s27   ;;  %s2832_s26 = sphi %s2898_s26, %s3392_s26   ;;  %s2828_s25 = sphi %s2896_s25, %s3391_s25   ;;  %s2824_s24 = sphi %s2894_s24, %s3390_s24  }
   0x8   : > { %s2919_s30 = sadd.s32 1, %s2836_s27   ;;  %s183_s8 = sadd.s32 1, %s2832_s26 }
   0x9   : > { %s180_s9 = ssub.s32 %s2836_s27, %s2919_s30  ;;  %p193_p0 = scmp.ne.s32.totalorder %s2832_s26, %s2828_s25 }
   0xa   : > { %p181_p1 = scmp.eq.s32.totalorder %s180_s9, 0  ;;  %p194_p2 = scmp.eq.s32.totalorder %s2915_s28, 1 }
   0xb   : > { %p199_p3 = scmp.ne.s32.totalorder %s2828_s25, %s2824_s24  ;;  %p200_p4 = scmp.eq.s32.totalorder %s2381_s29, 1 }
   0xc   : > { %s2930_s10 = scalar_select %p181_p1, %s2832_s26, %s183_s8  }
   0xd   : > { %p2932_p5 = por %p194_p2, %p193_p0  ;;  %p2936_p6 = por %p200_p4, %p199_p3 }
   0xe   : > { %p2382_p7 = scmp.ge.s32.totalorder %s2836_s27, 1  ;;  %p207_p8 = scmp.lt.s32.totalorder %s2836_s27, 3 }
   0xf   : > { %s3374_s11 = scalar_select %p2932_p5, 1, 0 }
  0x10   : > { %s3375_s12 = scalar_select %p2936_p6, 1, 0 }
  0x11   : > { %p3371_p9 = scmp.eq.s32.totalorder %s2915_s28, 0  ;;  %p2943_p10 = pnand %p2382_p7, %p207_p8 }
  0x12   : > { %s2838_s14 = smov [#allocation5]   ;;  %s2839_s16 = smov [#allocation8]  }
  0x13   : > { %s3376_s13 = scalar_select %p2943_p10, 1, 0 }
  0x14   : > { %s231_s15 = sshll.u32 %s2838_s14, 4  ;;  %p2520_p11 = pneg %p2943_p10  ;;  %s232_s15 = int_to_ptr.vmem [resolvable:$true] %s231_s15 }
  0x15   : > { %s254_s17 = sshll.u32 %s2839_s16, 4  ;;  %s2840_s19 = smov [#allocation2]   ;;  %s255_s17 = int_to_ptr.vmem [resolvable:$true] %s254_s17 }
  0x16   : > { %p2951_p12 = pnand %p3371_p9, %p2520_p11  ;;  %s220_s20 = sshll.u32 %s2840_s19, 4  ;;  %s221_s20 = int_to_ptr.vmem [resolvable:$true] %s220_s20 }
  0x17   : > { %s2615_s22 = scalar_lea.vmem %s232_s15, 32  ;;  %p2623_p3 = scmp.lt.s32.totalorder %s232_s15, %s232_s15 }
  0x18   : > { %p2957_p13 = pneg %p2951_p12  ;;  %p2616_p0 = scmp.ne.s32.totalorder %s232_s15, %s2615_s22 }
  0x19   : > { %p2624_p4 = scmp.lt.s32.totalorder %s2615_s22, %s2615_s22 }
  0x1a   : > { %p2618_p1 = pnand %p2616_p0, %p2957_p13 }
  0x1b   : > { %p2625_p7 = por %p2624_p4, %p2623_p3 }
  0x1c   : > { %p2619_p2 = pneg %p2618_p1 }
  0x1e   : > { %p2626_p8 = pnand %p2625_p7, %p2619_p2 }
  0x20   : > { %2629 = shalt.err (!%p2626_p8)
}
  0x21   : > { %2526 = dma.hbm_to_vmem [thread:$0]  (!%p2951_p12), %s3365_s2, 32, %s232_s15, [#allocation6]  }
  0x22   : > { %s2641_s8 = scalar_lea.vmem %s255_s17, 160  ;;  %p2649_p5 = scmp.lt.s32.totalorder %s255_s17, %s255_s17 }
  0x23   : > { %p2642_p11 = scmp.ne.s32.totalorder %s255_s17, %s2641_s8  ;;  %p2650_p0 = scmp.lt.s32.totalorder %s2641_s8, %s2641_s8 }
  0x25   : > { %p2644_p9 = pnand %p2642_p11, %p2957_p13  ;;  %p2651_p1 = por %p2650_p0, %p2649_p5 }
  0x27   : > { %p2645_p6 = pneg %p2644_p9 }
  0x29   : > { %p2652_p10 = pnand %p2651_p1, %p2645_p6 }
  0x2b   : > { %2655 = shalt.err (!%p2652_p10)
}
  0x2c   : > { %s2841_s9 = smov 32   ;;  %s2842_s14 = smov 2  }
  0x2d   : > { %2532 = dma.hbm_to_vmem [thread:$0]  (!%p2951_p12), %s3367_s4, 160, %s255_s17, [#allocation9], %s2841_s9, %s2841_s9, %s2842_s14  }
  0x2e   : > { %s2667_s15 = scalar_lea.vmem %s221_s20, 128  ;;  %p2675_p4 = scmp.lt.s32.totalorder %s221_s20, %s221_s20 }
  0x2f   : > { %p2668_p2 = scmp.ne.s32.totalorder %s221_s20, %s2667_s15  ;;  %p2676_p7 = scmp.lt.s32.totalorder %s2667_s15, %s2667_s15 }
  0x31   : > { %p2670_p3 = pnand %p2668_p2, %p2957_p13  ;;  %p2677_p5 = por %p2676_p7, %p2675_p4 }
  0x33   : > { %p2671_p9 = pneg %p2670_p3 }
  0x35   : > { %p2678_p6 = pnand %p2677_p5, %p2671_p9 }
  0x37   : > { %2681 = shalt.err (!%p2678_p6)
}
  0x38   : > { %2523 = dma.hbm_to_vmem [thread:$0]  (!%p2951_p12), %s3364_s1, 128, %s221_s20, [#allocation3]  }
  0x39   : > { %s2843_s29 = smov [#allocation7]  }
  0x3a   : > { %s241_s17 = sshll.u32 %s2843_s29, 4  ;;  %s242_s17 = int_to_ptr.vmem [resolvable:$true] %s241_s17 }
  0x3b   : > { %s2693_s8 = scalar_lea.vmem %s242_s17, 40960  ;;  %p2701_p0 = scmp.lt.s32.totalorder %s242_s17, %s242_s17 }
  0x3c   : > { %p2694_p10 = scmp.ne.s32.totalorder %s242_s17, %s2693_s8  ;;  %p2702_p1 = scmp.lt.s32.totalorder %s2693_s8, %s2693_s8 }
  0x3e   : > { %p2696_p8 = pnand %p2694_p10, %p2957_p13  ;;  %p2703_p2 = por %p2702_p1, %p2701_p0 }
  0x40   : > { %p2697_p11 = pneg %p2696_p8 }
  0x42   : > { %p2704_p3 = pnand %p2703_p2, %p2697_p11 }
  0x44   : > { %2707 = shalt.err (!%p2704_p3)
}
  0x45   : > { %s2844_s9 = smov 256   ;;  %s2845_s14 = smov 16  }
  0x46   : > { %2529 = dma.hbm_to_vmem [thread:$0]  (!%p2951_p12), %s3366_s3, 40960, %s242_s17, [#allocation6], %s2844_s9, %s2844_s9, %s2845_s14  }
  0x47   : > { %s2846_s19 = smov [#allocation10]  }
  0x48   : > { %s267_s15 = sshll.u32 %s2846_s19, 4  ;;  %s268_s15 = int_to_ptr.vmem [resolvable:$true] %s267_s15 }
  0x49   : > { %s2719_s22 = scalar_lea.vmem %s268_s15, 4096  ;;  %p2727_p5 = scmp.lt.s32.totalorder %s268_s15, %s268_s15 }
  0x4a   : > { %p2720_p9 = scmp.ne.s32.totalorder %s268_s15, %s2719_s22  ;;  %p2728_p6 = scmp.lt.s32.totalorder %s2719_s22, %s2719_s22 }
  0x4c   : > { %p2722_p4 = pnand %p2720_p9, %p2957_p13  ;;  %p2729_p10 = por %p2728_p6, %p2727_p5 }
  0x4e   : > { %p2723_p7 = pneg %p2722_p4 }
  0x50   : > { %p2730_p8 = pnand %p2729_p10, %p2723_p7 }
  0x52   : > { %2733 = shalt.err (!%p2730_p8)
}
  0x53   : > { %s2847_s23 = smov 128   ;;  %s2848_s29 = smov 8  }
  0x54   : > { %2535 = dma.hbm_to_vmem [thread:$0]  (!%p2951_p12), %s3368_s5, 4096, %s268_s15, [#allocation9], %s2847_s23, %s2847_s23, %s2848_s29  }
  0x55   : > { %s2849_s9 = smov [#allocation11]  }
  0x56   : > { %s281_s14 = sshll.u32 %s2849_s9, 4  ;;  %s282_s14 = int_to_ptr.vmem [resolvable:$true] %s281_s14 }
  0x57   : > { %s2745_s16 = scalar_lea.vmem %s282_s14, 16  ;;  %s2752_s20 = scalar_lea.vmem %s282_s14, 32 }
  0x58   : > { %p2746_p11 = scmp.ne.s32.totalorder %s282_s14, %s2745_s16  ;;  %p2753_p2 = scmp.lt.s32.totalorder %s282_s14, %s282_s14 }
  0x59   : > { %p2754_p3 = scmp.lt.s32.totalorder %s2752_s20, %s2745_s16 }
  0x5a   : > { %p2748_p0 = pnand %p2746_p11, %p2957_p13 }
  0x5b   : > { %p2755_p9 = por %p2754_p3, %p2753_p2 }
  0x5c   : > { %p2749_p1 = pneg %p2748_p0 }
  0x5e   : > { %p2756_p4 = pnand %p2755_p9, %p2749_p1 }
  0x60   : > { %2759 = shalt.err (!%p2756_p4)
}
  0x61   : > { %2538 = dma.hbm_to_vmem [thread:$0]  (!%p2951_p12), %s3369_s6, 16, %s282_s14, [#allocation12]  }
  0x62   : > { %p3379_p7 = scmp.ne.s32.totalorder %s3376_s13, 0 }
  0x63   : > { %p3380_p5 = scmp.eq.s32.totalorder (!%p3379_p7), %s2915_s28, 0 }
  0x64   : > { %303 = sbr.rel (%p3379_p7) target bundleno = 1600 (0x640), region = 48 }
  0x69   : > { %2803 = dma.done.wait (%p3380_p5), [#allocation3], 128   ;;  %p3381_p13 = pmov %p3380_p5 }
  0x6a   : > { %p3382_p6 = pmov %p3380_p5 }
  0x6b   : > { %2805 = vsyncadd (%p3381_p13), [#allocation3], 4294967168 }
  0x6c   : > { %2807 = dma.done.wait (%p3382_p6), [#allocation6], 40992   ;;  %p3383_p10 = pmov %p3380_p5 }
  0x6d   : > { %p3384_p8 = pmov %p3380_p5 }
  0x6e   : > { %2809 = vsyncadd (%p3383_p10), [#allocation6], 4294926304 }
  0x6f   : > { %2811 = dma.done.wait (%p3384_p8), [#allocation9], 4256   ;;  %p3385_p12 = pmov %p3380_p5 }
  0x70   : > { %p3386_p11 = pmov %p3380_p5 }
  0x71   : > { %2813 = vsyncadd (%p3385_p12), [#allocation9], 4294963040 }
  0x72   : > { %2815 = dma.done.wait (%p3386_p11), [#allocation12], 16   ;;  %p3387_p0 = pmov %p3380_p5 }
  0x73   : > { %s355_s13 = smul.u32 14, %s2915_s28  ;;  %v2850_v0 = vmov 0.0   ;;  %v376_v1 = vld [vmem:[#allocation2] sm:$0x77]  ;;  %vm434_vm0 = vcmask 1042432   ;;  %vm391_vm1 = vcmask 23552  }
  0x74   : > { %2817 = vsyncadd (%p3387_p0), [#allocation12], 4294967280  ;;  %503 = vmatprep.mubr.f32.mxu0 %v2850_v0  ;;  %v675_v2 = vld [vmem:[#allocation7 + $0xf8] sm:$0xff]  ;;  %v674_v3 = vld [vmem:[#allocation7 + $0xf0] sm:$0xff]  ;;  %v390_v4 = vcombine.high %v376_v1, %v376_v1  ;;  %s352_s29 = sand.u32 1, %s2828_s25   ;;  %s2418_s9 = smul.u32 1792, %s2915_s28 }
  0x75   : > { %p356_p1 = scmp.lt.s32.totalorder %s355_s13, 27  ;;  %720 = vmatprep.subr.mxu1 %v675_v2  ;;  %v673_v7 = vld [vmem:[#allocation7 + $0xe8] sm:$0xff]  ;;  %v672_v8 = vld [vmem:[#allocation7 + $0xe0] sm:$0xff]  ;;  %v671_v9 = vld [vmem:[#allocation7 + $0xd8] sm:$0xff]  ;;  %s2493_s8 = smul.u32 112, %s352_s29 }
  0x76   : > { %721 = vmatpush1.msra.mxu1 %v674_v3  ;;  %2398 = vmatprep.subr.msk.mxu0 %vm434_vm0, %v390_v4  ;;  %v670_v10 = vld [vmem:[#allocation7 + $0xd0] sm:$0xff]  ;;  %v669_v11 = vld [vmem:[#allocation7 + $0xc8] sm:$0xff]  ;;  %v668_v12 = vld [vmem:[#allocation7 + $0xc0] sm:$0xff]  ;;  %s3315_s19 = scalar_lea.hbm %s3370_s7, %s2418_s9  ;;  %s3323_s28 = scalar_lea.sflag [#allocation4], %s352_s29 }
  0x77   : > { %s3395_s13 = smov (!%p356_p1, %s355_s13), 27  ;;  %2399 = vmatpush1.msk.msra.mxu0 %vm434_vm0, %v376_v1  ;;  %722 = vmatprep.subr.mxu1 %v673_v7  ;;  %v667_v13 = vld [vmem:[#allocation7 + $0xb8] sm:$0xff]  ;;  %v666_v15 = vld [vmem:[#allocation7 + $0xb0] sm:$0xff]  ;;  %v665_v16 = vld [vmem:[#allocation7 + $0xa8] sm:$0xff]  ;;  %s3283_s17 = scalar_lea.vmem [#allocation13], %s2493_s8 }
  0x78   : > { %s2397_s18 = sshll.u32 %s3395_s13, 3  ;;  %723 = vmatpush1.msra.mxu1 %v672_v8  ;;  %v664_v17 = vld [vmem:[#allocation7 + $0xa0] sm:$0xff]  ;;  %v663_v18 = vld [vmem:[#allocation7 + $0x98] sm:$0xff]  ;;  %v662_v20 = vld [vmem:[#allocation7 + $0x90] sm:$0xff]  ;;  %s2259_s14 = sshll.u32 %s3283_s17, 4  ;;  %s3317_s14 = int_to_ptr.vmem [resolvable:$true] %s2259_s14 }
  0x79   : > { %s3026_s23 = scalar_lea.vmem %s3363_s0, %s2397_s18  ;;  %724 = vmatprep.subr.mxu1 %v671_v9  ;;  %v661_v21 = vld [vmem:[#allocation7 + $0x88] sm:$0xff]  ;;  %v660_v22 = vld [vmem:[#allocation7 + $0x80] sm:$0xff]  ;;  %v659_v23 = vld [vmem:[#allocation7 + $0x78] sm:$0xff]  ;;  %s2760_s22 = scalar_lea.vmem %s3317_s14, 1792 }
  0x7a   : > { %v362_v5 = vld [vmem:[%s3026_s23] sm:$0xff]  ;;  %v363_v6 = vld [vmem:[%s3026_s23 + $0x8] sm:$0xff]  ;;  %725 = vmatpush1.msra.mxu1 %v670_v10  ;;  %v364_v14 = vld [vmem:[%s3026_s23 + $0x10] sm:$0xff]  ;;  %p2761_p2 = scmp.ne.s32.totalorder %s3317_s14, %s2760_s22  ;;  %p3388_p3 = scmp.ne.s32.totalorder %s3374_s11, 0 }
  0x7b   : > { %2400 = vmatmul.mubr.msk.f32.vlgmr.msra.gmra.mxu0 %vm391_vm1, %v362_v5  ;;  %726 = vmatprep.subr.mxu1 %v669_v11  ;;  %v365_v19 = vld [vmem:[%s3026_s23 + $0x18] sm:$0xff]  ;;  %v366_v24 = vld [vmem:[%s3026_s23 + $0x20] sm:$0xff]  ;;  %v656_v27 = vld [vmem:[#allocation7 + $0x60] sm:$0xff]  ;;  %s2851_s13 = smov [#allocation13]  }
  0x7c   : > { %509 = vmatprep.mubr.f32.mxu0 %v2850_v0  ;;  %727 = vmatpush1.msra.mxu1 %v668_v12  ;;  %v658_v25 = vld [vmem:[#allocation7 + $0x70] sm:$0xff]  ;;  %v657_v26 = vld [vmem:[#allocation7 + $0x68] sm:$0xff]  ;;  %v655_v28 = vld [vmem:[#allocation7 + $0x58] sm:$0xff]  ;;  %p2762_p9 = pnand %p2761_p2, %p3388_p3  ;;  %s2764_s18 = sshll.u32 %s2851_s13, 4  ;;  %s2765_s18 = int_to_ptr.vmem [resolvable:$false] %s2764_s18 }
  0x7d   : > { %728 = vmatprep.subr.mxu1 %v667_v13  ;;  %v367_v29 = vld [vmem:[%s3026_s23 + $0x28] sm:$0xff]  ;;  %v654_v30 = vld [vmem:[#allocation7 + $0x50] sm:$0xff]  ;;  %v653_v31 = vld [vmem:[#allocation7 + $0x48] sm:$0xff]  ;;  %s2766_s21 = scalar_lea.vmem %s2765_s18, 3584  ;;  %p2767_p7 = scmp.lt.s32.totalorder %s3317_s14, %s2765_s18 }
  0x7e   : > { %729 = vmatpush1.msra.mxu1 %v666_v15  ;;  %v652_v32 = vld [vmem:[#allocation7 + $0x40] sm:$0xff]  ;;  %v651_v33 = vld [vmem:[#allocation7 + $0x38] sm:$0xff]  ;;  %v650_v35 = vld [vmem:[#allocation7 + $0x30] sm:$0xff]  ;;  %p2763_p4 = pneg %p2762_p9  ;;  %p2768_p5 = scmp.lt.s32.totalorder %s2766_s21, %s2760_s22 }
  0x7f   : > { %2401 = vmatmul.mubr.msk.f32.gmra.mxu0 %vm391_vm1, %v363_v6  ;;  %730 = vmatprep.subr.mxu1 %v665_v16  ;;  %v368_v34 = vld [vmem:[%s3026_s23 + $0x30] sm:$0xff]  ;;  %v647_v38 = vld [vmem:[#allocation7 + $0x18] sm:$0xff]  ;;  %v369_v39 = vld [vmem:[%s3026_s23 + $0x38] sm:$0xff] }
  0x80   : > { %515 = vmatprep.mubr.f32.mxu0 %v2850_v0  ;;  %731 = vmatpush1.msra.mxu1 %v664_v17  ;;  %v649_v36 = vld [vmem:[#allocation7 + $0x28] sm:$0xff]  ;;  %v648_v37 = vld [vmem:[#allocation7 + $0x20] sm:$0xff]  ;;  %v646_v40 = vld [vmem:[#allocation7 + $0x10] sm:$0xff]  ;;  %p2769_p13 = por %p2768_p5, %p2767_p7 }
  0x81   : > { %732 = vmatprep.subr.mxu1 %v663_v18  ;;  %v645_v41 = vld [vmem:[#allocation7 + $0x8] sm:$0xff]  ;;  %v644_v42 = vld [vmem:[#allocation7] sm:$0xff]  ;;  %v707_v43 = vld [vmem:[#allocation7 + $0x1f8] sm:$0xff] }
  0x82   : > { %733 = vmatpush1.msra.mxu1 %v662_v20  ;;  %v370_v44 = vld [vmem:[%s3026_s23 + $0x40] sm:$0xff]  ;;  %v705_v46 = vld [vmem:[#allocation7 + $0x1e8] sm:$0xff]  ;;  %v704_v47 = vld [vmem:[#allocation7 + $0x1e0] sm:$0xff]  ;;  %p2770_p6 = pnand %p2769_p13, %p2763_p4 }
  0x83   : > { %2402 = vmatmul.mubr.msk.f32.gmra.mxu0 %vm391_vm1, %v364_v14  ;;  %734 = vmatprep.subr.mxu1 %v661_v21  ;;  %v706_v45 = vld [vmem:[#allocation7 + $0x1f0] sm:$0xff]  ;;  %v703_v48 = vld [vmem:[#allocation7 + $0x1d8] sm:$0xff]  ;;  %v701_v51 = vld [vmem:[#allocation7 + $0x1c8] sm:$0xff] }
  0x84   : > { %521 = vmatprep.mubr.f32.mxu0 %v2850_v0  ;;  %735 = vmatpush1.msra.mxu1 %v660_v22  ;;  %v371_v49 = vld [vmem:[%s3026_s23 + $0x48] sm:$0xff]  ;;  %v702_v50 = vld [vmem:[#allocation7 + $0x1d0] sm:$0xff]  ;;  %v372_v54 = vld [vmem:[%s3026_s23 + $0x50] sm:$0xff] }
  0x85   : > { %736 = vmatprep.subr.mxu1 %v659_v23  ;;  %v700_v52 = vld [vmem:[#allocation7 + $0x1c0] sm:$0xff]  ;;  %v699_v53 = vld [vmem:[#allocation7 + $0x1b8] sm:$0xff]  ;;  %v698_v55 = vld [vmem:[#allocation7 + $0x1b0] sm:$0xff] }
  0x86   : > { %737 = vmatpush1.msra.mxu1 %v658_v25  ;;  %v697_v56 = vld [vmem:[#allocation7 + $0x1a8] sm:$0xff]  ;;  %v696_v57 = vld [vmem:[#allocation7 + $0x1a0] sm:$0xff]  ;;  %v695_v58 = vld [vmem:[#allocation7 + $0x198] sm:$0xff] }
  0x87   : > { %2403 = vmatmul.mubr.msk.f32.gmra.mxu0 %vm391_vm1, %v365_v19  ;;  %738 = vmatprep.subr.mxu1 %v657_v26  ;;  %v373_v59 = vld [vmem:[%s3026_s23 + $0x58] sm:$0xff]  ;;  %v692_v62 = vld [vmem:[#allocation7 + $0x180] sm:$0xff]  ;;  %v691_v63 = vld [vmem:[#allocation7 + $0x178] sm:$0xff] }
  0x88   : > { %527 = vmatprep.mubr.f32.mxu0 %v2850_v0  ;;  %739 = vmatpush1.msra.mxu1 %v656_v27  ;;  %v694_v60 = vld [vmem:[#allocation7 + $0x190] sm:$0xff]  ;;  %v693_v61 = vld [vmem:[#allocation7 + $0x188] sm:$0xff]  ;;  %v688_v4 = vld [vmem:[#allocation7 + $0x160] sm:$0xff] }
  0x89   : > { %740 = vmatprep.subr.mxu1 %v655_v28  ;;  %v374_v1 = vld [vmem:[%s3026_s23 + $0x60] sm:$0xff]  ;;  %v689_v3 = vld [vmem:[#allocation7 + $0x168] sm:$0xff]  ;;  %v375_v6 = vld [vmem:[%s3026_s23 + $0x68] sm:$0xff] }
  0x8a   : > { %741 = vmatpush1.msra.mxu1 %v654_v30  ;;  %v690_v2 = vld [vmem:[#allocation7 + $0x170] sm:$0xff]  ;;  %v687_v5 = vld [vmem:[#allocation7 + $0x158] sm:$0xff]  ;;  %v685_v8 = vld [vmem:[#allocation7 + $0x148] sm:$0xff] }
  0x8b   : > { %2404 = vmatmul.mubr.msk.f32.gmra.mxu0 %vm391_vm1, %v366_v24  ;;  %742 = vmatprep.subr.mxu1 %v653_v31  ;;  %v686_v7 = vld [vmem:[#allocation7 + $0x150] sm:$0xff]  ;;  %v684_v9 = vld [vmem:[#allocation7 + $0x140] sm:$0xff]  ;;  %v683_v10 = vld [vmem:[#allocation7 + $0x138] sm:$0xff] }
  0x8c   : > { %533 = vmatprep.mubr.f32.mxu0 %v2850_v0  ;;  %743 = vmatpush1.msra.mxu1 %v652_v32  ;;  %v682_v11 = vld [vmem:[#allocation7 + $0x130] sm:$0xff]  ;;  %v681_v12 = vld [vmem:[#allocation7 + $0x128] sm:$0xff]  ;;  %v680_v13 = vld [vmem:[#allocation7 + $0x120] sm:$0xff] }
  0x8d   : > { %744 = vmatprep.subr.mxu1 %v651_v33  ;;  %v678_v14 = vld [vmem:[#allocation7 + $0x110] sm:$0xff]  ;;  %v677_v15 = vld [vmem:[#allocation7 + $0x108] sm:$0xff]  ;;  %v676_v16 = vld [vmem:[#allocation7 + $0x100] sm:$0xff] }
  0x8e   : > { %745 = vmatpush1.msra.mxu1 %v650_v35  ;;  %v957_v17 = vld [vmem:[#allocation7 + $0x2f8] sm:$0xff]  ;;  %v956_v18 = vld [vmem:[#allocation7 + $0x2f0] sm:$0xff]  ;;  %v955_v19 = vld [vmem:[#allocation7 + $0x2e8] sm:$0xff] }
  0x8f   : > { %2405 = vmatmul.mubr.msk.f32.gmra.mxu0 %vm391_vm1, %v367_v29  ;;  %746 = vmatprep.subr.mxu1 %v649_v36  ;;  %v954_v20 = vld [vmem:[#allocation7 + $0x2e0] sm:$0xff]  ;;  %v953_v21 = vld [vmem:[#allocation7 + $0x2d8] sm:$0xff]  ;;  %v952_v22 = vld [vmem:[#allocation7 + $0x2d0] sm:$0xff] }
  0x90   : > { %539 = vmatprep.mubr.f32.mxu0 %v2850_v0  ;;  %747 = vmatpush1.msra.mxu1 %v648_v37  ;;  %v951_v23 = vld [vmem:[#allocation7 + $0x2c8] sm:$0xff]  ;;  %v950_v24 = vld [vmem:[#allocation7 + $0x2c0] sm:$0xff]  ;;  %v949_v25 = vld [vmem:[#allocation7 + $0x2b8] sm:$0xff] }
  0x91   : > { %748 = vmatprep.subr.mxu1 %v647_v38  ;;  %1003 = vmatprep.subr.mxu0 %v957_v17  ;;  %v948_v26 = vld [vmem:[#allocation7 + $0x2b0] sm:$0xff]  ;;  %v947_v27 = vld [vmem:[#allocation7 + $0x2a8] sm:$0xff]  ;;  %v946_v28 = vld [vmem:[#allocation7 + $0x2a0] sm:$0xff] }
  0x92   : > { %749 = vmatpush1.msra.mxu1 %v646_v40  ;;  %1004 = vmatpush1.msra.mxu0 %v956_v18  ;;  %v945_v29 = vld [vmem:[#allocation7 + $0x298] sm:$0xff]  ;;  %v944_v30 = vld [vmem:[#allocation7 + $0x290] sm:$0xff]  ;;  %v943_v31 = vld [vmem:[#allocation7 + $0x288] sm:$0xff] }
  0x93   : > { %2406 = vmatmul.mubr.msk.f32.gmra.mxu0 %vm391_vm1, %v368_v34  ;;  %750 = vmatprep.subr.mxu1 %v645_v41  ;;  %v942_v32 = vld [vmem:[#allocation7 + $0x280] sm:$0xff]  ;;  %v941_v33 = vld [vmem:[#allocation7 + $0x278] sm:$0xff]  ;;  %v940_v34 = vld [vmem:[#allocation7 + $0x270] sm:$0xff] }
  0x94   : > { %545 = vmatprep.mubr.f32.mxu0 %v2850_v0  ;;  %751 = vmatpush1.msra.mxu1 %v644_v42  ;;  %v939_v35 = vld [vmem:[#allocation7 + $0x268] sm:$0xff]  ;;  %v938_v36 = vld [vmem:[#allocation7 + $0x260] sm:$0xff]  ;;  %v937_v37 = vld [vmem:[#allocation7 + $0x258] sm:$0xff] }
  0x95   : > { %752 = vmatprep.subr.mxu1 %v707_v43  ;;  %1005 = vmatprep.subr.mxu0 %v955_v19  ;;  %v936_v38 = vld [vmem:[#allocation7 + $0x250] sm:$0xff]  ;;  %v934_v40 = vld [vmem:[#allocation7 + $0x240] sm:$0xff]  ;;  %v933_v41 = vld [vmem:[#allocation7 + $0x238] sm:$0xff] }
  0x96   : > { %753 = vmatpush2.msra.mxu1 %v706_v45  ;;  %1006 = vmatpush1.msra.mxu0 %v954_v20  ;;  %v932_v42 = vld [vmem:[#allocation7 + $0x230] sm:$0xff]  ;;  %v931_v43 = vld [vmem:[#allocation7 + $0x228] sm:$0xff]  ;;  %v929_v45 = vld [vmem:[#allocation7 + $0x218] sm:$0xff] }
  0x97   : > { %2407 = vmatmul.mubr.msk.f32.gmra.mxu0 %vm391_vm1, %v369_v39  ;;  %754 = vmatprep.subr.mxu1 %v705_v46  ;;  %v935_v39 = vld [vmem:[#allocation7 + $0x248] sm:$0xff]  ;;  %v928_v46 = vld [vmem:[#allocation7 + $0x210] sm:$0xff] }
  0x98   : > { %551 = vmatprep.mubr.f32.mxu0 %v2850_v0  ;;  %755 = vmatpush2.msra.mxu1 %v704_v47  ;;  %v927_v47 = vld [vmem:[#allocation7 + $0x208] sm:$0xff] }
  0x99   : > { %756 = vmatprep.subr.mxu1 %v703_v48  ;;  %1007 = vmatprep.subr.mxu0 %v953_v21  ;;  %v926_v48 = vld [vmem:[#allocation7 + $0x200] sm:$0xff] }
  0x9a   : > { %757 = vmatpush2.msra.mxu1 %v702_v50  ;;  %1008 = vmatpush1.msra.mxu0 %v952_v22  ;;  %v988_v50 = vld [vmem:[#allocation7 + $0x3f0] sm:$0xff] }
  0x9b   : > { %2408 = vmatmul.mubr.msk.f32.gmra.mxu0 %vm391_vm1, %v370_v44  ;;  %758 = vmatprep.subr.mxu1 %v701_v51  ;;  %v930_v44 = vld [vmem:[#allocation7 + $0x220] sm:$0xff]  ;;  %v987_v51 = vld [vmem:[#allocation7 + $0x3e8] sm:$0xff] }
  0x9c   : > { %557 = vmatprep.mubr.f32.mxu0 %v2850_v0  ;;  %759 = vmatpush2.msra.mxu1 %v700_v52  ;;  %v986_v52 = vld [vmem:[#allocation7 + $0x3e0] sm:$0xff] }
  0x9d   : > { %760 = vmatprep.subr.mxu1 %v699_v53  ;;  %1009 = vmatprep.subr.mxu0 %v951_v23  ;;  %v985_v53 = vld [vmem:[#allocation7 + $0x3d8] sm:$0xff] }
  0x9e   : > { %761 = vmatpush2.msra.mxu1 %v698_v55  ;;  %1010 = vmatpush1.msra.mxu0 %v950_v24  ;;  %v983_v55 = vld [vmem:[#allocation7 + $0x3c8] sm:$0xff] }
  0x9f   : > { %2409 = vmatmul.mubr.msk.f32.gmra.mxu0 %vm391_vm1, %v371_v49  ;;  %762 = vmatprep.subr.mxu1 %v697_v56  ;;  %v989_v49 = vld [vmem:[#allocation7 + $0x3f8] sm:$0xff]  ;;  %v982_v56 = vld [vmem:[#allocation7 + $0x3c0] sm:$0xff] }
  0xa0   : > { %563 = vmatprep.mubr.f32.mxu0 %v2850_v0  ;;  %763 = vmatpush2.msra.mxu1 %v696_v57  ;;  %v981_v57 = vld [vmem:[#allocation7 + $0x3b8] sm:$0xff] }
  0xa1   : > { %764 = vmatprep.subr.mxu1 %v695_v58  ;;  %1011 = vmatprep.subr.mxu0 %v949_v25  ;;  %v980_v58 = vld [vmem:[#allocation7 + $0x3b0] sm:$0xff] }
  0xa2   : > { %765 = vmatpush2.msra.mxu1 %v694_v60  ;;  %1012 = vmatpush1.msra.mxu0 %v948_v26  ;;  %v978_v60 = vld [vmem:[#allocation7 + $0x3a0] sm:$0xff] }
  0xa3   : > { %2410 = vmatmul.mubr.msk.f32.gmra.mxu0 %vm391_vm1, %v372_v54  ;;  %766 = vmatprep.subr.mxu1 %v693_v61  ;;  %v984_v54 = vld [vmem:[#allocation7 + $0x3d0] sm:$0xff]  ;;  %v977_v61 = vld [vmem:[#allocation7 + $0x398] sm:$0xff] }
  0xa4   : > { %569 = vmatprep.mubr.f32.mxu0 %v2850_v0  ;;  %767 = vmatpush2.msra.mxu1 %v692_v62  ;;  %v976_v62 = vld [vmem:[#allocation7 + $0x390] sm:$0xff] }
  0xa5   : > { %768 = vmatprep.subr.mxu1 %v691_v63  ;;  %1013 = vmatprep.subr.mxu0 %v947_v27  ;;  %v975_v63 = vld [vmem:[#allocation7 + $0x388] sm:$0xff] }
  0xa6   : > { %769 = vmatpush2.msra.mxu1 %v690_v2  ;;  %1014 = vmatpush1.msra.mxu0 %v946_v28  ;;  %v973_v2 = vld [vmem:[#allocation7 + $0x378] sm:$0xff] }
  0xa7   : > { %2411 = vmatmul.mubr.msk.f32.gmra.mxu0 %vm391_vm1, %v373_v59  ;;  %770 = vmatprep.subr.mxu1 %v689_v3  ;;  %v979_v59 = vld [vmem:[#allocation7 + $0x3a8] sm:$0xff]  ;;  %v972_v3 = vld [vmem:[#allocation7 + $0x370] sm:$0xff] }
  0xa8   : > { %575 = vmatprep.mubr.f32.mxu0 %v2850_v0  ;;  %771 = vmatpush2.msra.mxu1 %v688_v4  ;;  %v971_v4 = vld [vmem:[#allocation7 + $0x368] sm:$0xff] }
  0xa9   : > { %772 = vmatprep.subr.mxu1 %v687_v5  ;;  %1015 = vmatprep.subr.mxu0 %v945_v29  ;;  %v970_v5 = vld [vmem:[#allocation7 + $0x360] sm:$0xff] }
  0xaa   : > { %773 = vmatpush2.msra.mxu1 %v686_v7  ;;  %1016 = vmatpush1.msra.mxu0 %v944_v30  ;;  %v379_v7 = vlaneseq }
  0xab   : > { %2412 = vmatmul.mubr.msk.f32.gmra.mxu0 %vm391_vm1, %v374_v1  ;;  %774 = vmatprep.subr.mxu1 %v685_v8  ;;  %v974_v1 = vld [vmem:[#allocation7 + $0x380] sm:$0xff]  ;;  %v968_v8 = vld [vmem:[#allocation7 + $0x350] sm:$0xff] }
  0xac   : > { %581 = vmatprep.mubr.f32.mxu0 %v2850_v0  ;;  %775 = vmatpush2.msra.mxu1 %v684_v9  ;;  %v679_v0 = vld [vmem:[#allocation7 + $0x118] sm:$0xff]  ;;  %v380_v9 = vshrl.u32 %v379_v7, 7 }
  0xad   : > { %776 = vmatprep.subr.mxu1 %v683_v10  ;;  %1017 = vmatprep.subr.mxu0 %v943_v31 }
  0xae   : > { %777 = vmatpush2.msra.mxu1 %v682_v11  ;;  %1018 = vmatpush1.msra.mxu0 %v942_v32  ;;  %v3069_v10 = vsub.s32 0, %v380_v9  ;;  %v377_v11 = vld [vmem:[#allocation5] sm:$0x3] }
  0xaf   : > { %2413 = vmatmul.mubr.msk.f32.gmra.mxu0 %vm391_vm1, %v375_v6  ;;  %778 = vmatprep.subr.mxu1 %v681_v12  ;;  %v969_v6 = vld [vmem:[#allocation7 + $0x358] sm:$0xff]  ;;  %v3071_v12 = vsub.s32 1, %v380_v9 }
  0xb0   : > { %779 = vmatpush2.msra.mxu1 %v680_v13  ;;  %1019 = vmatprep.subr.mxu0 %v941_v33  ;;  %v3074_v13 = vrot.slane %v377_v11, %v3069_v10 }
  0xb1   : > { %780 = vmatprep.subr.mxu1 %v679_v0  ;;  %1020 = vmatpush1.msra.mxu0 %v940_v34  ;;  %v3077_v0 = vrot.slane %v377_v11, %v3071_v12 }
  0xb2   : > { %781 = vmatpush2.msra.mxu1 %v678_v14  ;;  %1021 = vmatprep.subr.mxu0 %v939_v35 }
  0xb3   : > { %782 = vmatprep.subr.mxu1 %v677_v15  ;;  %1022 = vmatpush1.msra.mxu0 %v938_v36 }
  0xb4   : > { %783 = vmatpush2.msra.mxu1 %v676_v16  ;;  %1023 = vmatprep.subr.mxu0 %v937_v37 }
  0xb5   : > { %1024 = vmatpush1.msra.mxu0 %v936_v38 }
  0xb6   : > { %1025 = vmatprep.subr.mxu0 %v935_v39 }
  0xb7   : > { %1026 = vmatpush1.msra.mxu0 %v934_v40 }
  0xb8   : > { %1027 = vmatprep.subr.mxu0 %v933_v41 }
  0xb9   : > { %1028 = vmatpush1.msra.mxu0 %v932_v42 }
  0xba   : > { %1029 = vmatprep.subr.mxu0 %v931_v43 }
  0xbb   : > { %1030 = vmatpush1.msra.mxu0 %v930_v44 }
  0xbc   : > { %1031 = vmatprep.subr.mxu0 %v929_v45 }
  0xbd   : > { %1032 = vmatpush1.msra.mxu0 %v928_v46 }
  0xbe   : > { %1033 = vmatprep.subr.mxu0 %v927_v47 }
  0xbf   : > { %1034 = vmatpush1.msra.mxu0 %v926_v48 }
  0xc0   : > { %1035 = vmatprep.subr.mxu0 %v989_v49 }
  0xc1   : > { %1036 = vmatpush2.msra.mxu0 %v988_v50 }
  0xc2   : > { %1037 = vmatprep.subr.mxu0 %v987_v51 }
  0xc3   : > { %1038 = vmatpush2.msra.mxu0 %v986_v52 }
  0xc4   : > { %1039 = vmatprep.subr.mxu0 %v985_v53 }
  0xc5   : > { %1040 = vmatpush2.msra.mxu0 %v984_v54 }
  0xc6   : > { %1041 = vmatprep.subr.mxu0 %v983_v55 }
  0xc7   : > { %1042 = vmatpush2.msra.mxu0 %v982_v56 }
  0xc8   : > { %1043 = vmatprep.subr.mxu0 %v981_v57 }
  0xc9   : > { %1044 = vmatpush2.msra.mxu0 %v980_v58 }
  0xca   : > { %1045 = vmatprep.subr.mxu0 %v979_v59 }
  0xcb   : > { %1046 = vmatpush2.msra.mxu0 %v978_v60 }
  0xcc   : > { %1047 = vmatprep.subr.mxu0 %v977_v61 }
  0xcd   : > { %1048 = vmatpush2.msra.mxu0 %v976_v62 }
  0xce   : > { %1049 = vmatprep.subr.mxu0 %v975_v63 }
  0xcf   : > { %1050 = vmatpush2.msra.mxu0 %v974_v1 }
  0xd0   : > { %1051 = vmatprep.subr.mxu0 %v973_v2 }
  0xd1   : > { %1052 = vmatpush2.msra.mxu0 %v972_v3 }
  0xd2   : > { %1053 = vmatprep.subr.mxu0 %v971_v4 }
  0xd3   : > { %1054 = vmatpush2.msra.mxu0 %v970_v5 }
  0xd4   : > { %1055 = vmatprep.subr.mxu0 %v969_v6 }
  0xd5   : > { %1056 = vmatpush2.msra.mxu0 %v968_v8 }
 0x13b   : > { %v505_v14 = vpop.f32.mrf.mxu0 }
 0x13c   : > { %v506_v15 = vadd.f32 %v505_v14, %v3074_v13 }
 0x13d   : > { %v507_v16 = vpop.f32.mrf.mxu0 }
 0x13e   : > { %v508_v17 = vadd.f32 %v507_v16, %v3077_v0  ;;  %v588_v18 = vmul.f32 0.2, %v506_v15 }
 0x13f   : > { %v511_v19 = vpop.f32.mrf.mxu0 }
 0x140   : > { %v512_v20 = vadd.f32 %v511_v19, %v3074_v13  ;;  %v589_v21 = vmul.f32 0.2, %v508_v17  ;;  %v616_v25 = vmax.f32 %v506_v15, %v588_v18 }
 0x141   : > { %v513_v22 = vpop.f32.mrf.mxu0 }
 0x142   : > { %v514_v23 = vadd.f32 %v513_v22, %v3077_v0  ;;  %v617_v24 = vmax.f32 %v508_v17, %v589_v21  ;;  %v590_v26 = vmul.f32 0.2, %v512_v20 }
 0x143   : > { %v517_v27 = vpop.f32.mrf.mxu0 }
 0x144   : > { %v591_v28 = vmul.f32 0.2, %v514_v23  ;;  %v518_v29 = vadd.f32 %v517_v27, %v3074_v13  ;;  %784 = vmatprep.mubr.f32.mxu1 %v617_v24  ;;  %v618_v33 = vmax.f32 %v512_v20, %v590_v26 }
 0x145   : > { %v519_v30 = vpop.f32.mrf.mxu0  ;;  %785 = vmatmul.mubr.f32.vlgmr.msra.gmra.mxu1 %v616_v25 }
 0x146   : > { %v619_v31 = vmax.f32 %v514_v23, %v591_v28  ;;  %v520_v32 = vadd.f32 %v519_v30, %v3077_v0  ;;  %v592_v34 = vmul.f32 0.2, %v518_v29 }
 0x147   : > { %v523_v35 = vpop.f32.mrf.mxu0 }
 0x148   : > { %v593_v36 = vmul.f32 0.2, %v520_v32  ;;  %v524_v37 = vadd.f32 %v523_v35, %v3074_v13  ;;  %790 = vmatprep.mubr.f32.mxu1 %v619_v31  ;;  %v620_v41 = vmax.f32 %v518_v29, %v592_v34 }
 0x149   : > { %v525_v38 = vpop.f32.mrf.mxu0  ;;  %791 = vmatmul.mubr.f32.gmra.mxu1 %v618_v33 }
 0x14a   : > { %v621_v39 = vmax.f32 %v520_v32, %v593_v36  ;;  %v526_v40 = vadd.f32 %v525_v38, %v3077_v0  ;;  %v594_v42 = vmul.f32 0.2, %v524_v37 }
 0x14b   : > { %v529_v43 = vpop.f32.mrf.mxu0 }
 0x14c   : > { %v595_v44 = vmul.f32 0.2, %v526_v40  ;;  %v530_v45 = vadd.f32 %v529_v43, %v3074_v13  ;;  %796 = vmatprep.mubr.f32.mxu1 %v621_v39  ;;  %v622_v49 = vmax.f32 %v524_v37, %v594_v42 }
 0x14d   : > { %v531_v46 = vpop.f32.mrf.mxu0  ;;  %797 = vmatmul.mubr.f32.gmra.mxu1 %v620_v41 }
 0x14e   : > { %v623_v47 = vmax.f32 %v526_v40, %v595_v44  ;;  %v532_v48 = vadd.f32 %v531_v46, %v3077_v0  ;;  %v596_v50 = vmul.f32 0.2, %v530_v45 }
 0x14f   : > { %v535_v51 = vpop.f32.mrf.mxu0 }
 0x150   : > { %v597_v52 = vmul.f32 0.2, %v532_v48  ;;  %v536_v53 = vadd.f32 %v535_v51, %v3074_v13  ;;  %802 = vmatprep.mubr.f32.mxu1 %v623_v47  ;;  %v624_v57 = vmax.f32 %v530_v45, %v596_v50 }
 0x151   : > { %v537_v54 = vpop.f32.mrf.mxu0  ;;  %803 = vmatmul.mubr.f32.gmra.mxu1 %v622_v49 }
 0x152   : > { %v625_v55 = vmax.f32 %v532_v48, %v597_v52  ;;  %v538_v56 = vadd.f32 %v537_v54, %v3077_v0  ;;  %v598_v58 = vmul.f32 0.2, %v536_v53 }
 0x153   : > { %v541_v59 = vpop.f32.mrf.mxu0 }
 0x154   : > { %v599_v60 = vmul.f32 0.2, %v538_v56  ;;  %v542_v61 = vadd.f32 %v541_v59, %v3074_v13  ;;  %808 = vmatprep.mubr.f32.mxu1 %v625_v55  ;;  %v626_v2 = vmax.f32 %v536_v53, %v598_v58 }
 0x155   : > { %v543_v62 = vpop.f32.mrf.mxu0  ;;  %809 = vmatmul.mubr.f32.gmra.mxu1 %v624_v57 }
 0x156   : > { %v627_v63 = vmax.f32 %v538_v56, %v599_v60  ;;  %v544_v1 = vadd.f32 %v543_v62, %v3077_v0  ;;  %v600_v3 = vmul.f32 0.2, %v542_v61 }
 0x157   : > { %v547_v4 = vpop.f32.mrf.mxu0 }
 0x158   : > { %v601_v5 = vmul.f32 0.2, %v544_v1  ;;  %v548_v6 = vadd.f32 %v547_v4, %v3074_v13  ;;  %814 = vmatprep.mubr.f32.mxu1 %v627_v63  ;;  %v628_v11 = vmax.f32 %v542_v61, %v600_v3  ;;  %v967_v3 = vld [vmem:[#allocation7 + $0x348] sm:$0xff]  ;;  %v966_v4 = vld [vmem:[#allocation7 + $0x340] sm:$0xff] }
 0x159   : > { %v549_v7 = vpop.f32.mrf.mxu0  ;;  %815 = vmatmul.mubr.f32.gmra.mxu1 %v626_v2  ;;  %1057 = vmatprep.subr.mxu0 %v967_v3  ;;  %v1252_v3 = vld [vmem:[#allocation7 + $0x558] sm:$0xff] }
 0x15a   : > { %v629_v8 = vmax.f32 %v544_v1, %v601_v5  ;;  %v550_v9 = vadd.f32 %v549_v7, %v3077_v0  ;;  %v602_v14 = vmul.f32 0.2, %v548_v6  ;;  %1058 = vmatpush2.msra.mxu0 %v966_v4  ;;  %v964_v5 = vld [vmem:[#allocation7 + $0x330] sm:$0xff]  ;;  %v961_v7 = vld [vmem:[#allocation7 + $0x318] sm:$0xff] }
 0x15b   : > { %v553_v15 = vpop.f32.mrf.mxu0  ;;  %v1251_v4 = vld [vmem:[#allocation7 + $0x550] sm:$0xff] }
 0x15c   : > { %v603_v16 = vmul.f32 0.2, %v550_v9  ;;  %v554_v17 = vadd.f32 %v553_v15, %v3074_v13  ;;  %820 = vmatprep.mubr.f32.mxu1 %v629_v8  ;;  %v630_v21 = vmax.f32 %v548_v6, %v602_v14  ;;  %v963_v6 = vld [vmem:[#allocation7 + $0x328] sm:$0xff]  ;;  %v960_v8 = vld [vmem:[#allocation7 + $0x310] sm:$0xff]  ;;  %v1240_v14 = vld [vmem:[#allocation7 + $0x4f8] sm:$0xff] }
 0x15d   : > { %v555_v18 = vpop.f32.mrf.mxu0  ;;  %821 = vmatmul.mubr.f32.gmra.mxu1 %v628_v11  ;;  %v958_v11 = vld [vmem:[#allocation7 + $0x300] sm:$0xff]  ;;  %v1239_v15 = vld [vmem:[#allocation7 + $0x4f0] sm:$0xff]  ;;  %1286 = vmatprep.subr.mxu1 %v1240_v14 }
 0x15e   : > { %v631_v19 = vmax.f32 %v550_v9, %v603_v16  ;;  %v556_v20 = vadd.f32 %v555_v18, %v3077_v0  ;;  %v604_v22 = vmul.f32 0.2, %v554_v17  ;;  %v959_v9 = vld [vmem:[#allocation7 + $0x308] sm:$0xff]  ;;  %1287 = vmatpush1.msra.mxu1 %v1239_v15  ;;  %v1236_v18 = vld [vmem:[#allocation7 + $0x4d8] sm:$0xff] }
 0x15f   : > { %v559_v23 = vpop.f32.mrf.mxu0  ;;  %v1238_v16 = vld [vmem:[#allocation7 + $0x4e8] sm:$0xff] }
 0x160   : > { %v605_v24 = vmul.f32 0.2, %v556_v20  ;;  %v560_v25 = vadd.f32 %v559_v23, %v3074_v13  ;;  %826 = vmatprep.mubr.f32.mxu1 %v631_v19  ;;  %v632_v29 = vmax.f32 %v554_v17, %v604_v22  ;;  %v1237_v17 = vld [vmem:[#allocation7 + $0x4e0] sm:$0xff]  ;;  %1288 = vmatprep.subr.mxu1 %v1238_v16  ;;  %v1235_v19 = vld [vmem:[#allocation7 + $0x4d0] sm:$0xff]  ;;  %v1232_v22 = vld [vmem:[#allocation7 + $0x4b8] sm:$0xff] }
 0x161   : > { %v561_v26 = vpop.f32.mrf.mxu0  ;;  %827 = vmatmul.mubr.f32.gmra.mxu1 %v630_v21  ;;  %v1233_v21 = vld [vmem:[#allocation7 + $0x4c0] sm:$0xff]  ;;  %v1231_v23 = vld [vmem:[#allocation7 + $0x4b0] sm:$0xff] }
 0x162   : > { %v633_v27 = vmax.f32 %v556_v20, %v605_v24  ;;  %v562_v28 = vadd.f32 %v561_v26, %v3077_v0  ;;  %v606_v30 = vmul.f32 0.2, %v560_v25  ;;  %1289 = vmatpush1.msra.mxu1 %v1237_v17  ;;  %v1234_v20 = vld [vmem:[#allocation7 + $0x4c8] sm:$0xff]  ;;  %v1228_v26 = vld [vmem:[#allocation7 + $0x498] sm:$0xff] }
 0x163   : > { %v565_v31 = vpop.f32.mrf.mxu0  ;;  %1290 = vmatprep.subr.mxu1 %v1236_v18  ;;  %v1230_v24 = vld [vmem:[#allocation7 + $0x4a8] sm:$0xff] }
 0x164   : > { %v607_v32 = vmul.f32 0.2, %v562_v28  ;;  %v566_v33 = vadd.f32 %v565_v31, %v3074_v13  ;;  %832 = vmatprep.mubr.f32.mxu1 %v633_v27  ;;  %v634_v37 = vmax.f32 %v560_v25, %v606_v30  ;;  %1291 = vmatpush1.msra.mxu1 %v1235_v19  ;;  %v1229_v25 = vld [vmem:[#allocation7 + $0x4a0] sm:$0xff]  ;;  %v1227_v27 = vld [vmem:[#allocation7 + $0x490] sm:$0xff]  ;;  %v1224_v30 = vld [vmem:[#allocation7 + $0x478] sm:$0xff] }
 0x165   : > { %v567_v34 = vpop.f32.mrf.mxu0  ;;  %833 = vmatmul.mubr.f32.gmra.mxu1 %v632_v29  ;;  %1292 = vmatprep.subr.mxu1 %v1234_v20  ;;  %v1225_v29 = vld [vmem:[#allocation7 + $0x480] sm:$0xff]  ;;  %v1223_v31 = vld [vmem:[#allocation7 + $0x470] sm:$0xff] }
 0x166   : > { %v635_v35 = vmax.f32 %v562_v28, %v607_v32  ;;  %v568_v36 = vadd.f32 %v567_v34, %v3077_v0  ;;  %v608_v38 = vmul.f32 0.2, %v566_v33  ;;  %1293 = vmatpush1.msra.mxu1 %v1233_v21  ;;  %v1226_v28 = vld [vmem:[#allocation7 + $0x488] sm:$0xff]  ;;  %v1220_v34 = vld [vmem:[#allocation7 + $0x458] sm:$0xff] }
 0x167   : > { %v571_v39 = vpop.f32.mrf.mxu0  ;;  %1294 = vmatprep.subr.mxu1 %v1232_v22  ;;  %v1222_v32 = vld [vmem:[#allocation7 + $0x468] sm:$0xff] }
 0x168   : > { %v609_v40 = vmul.f32 0.2, %v568_v36  ;;  %v572_v41 = vadd.f32 %v571_v39, %v3074_v13  ;;  %838 = vmatprep.mubr.f32.mxu1 %v635_v35  ;;  %v636_v45 = vmax.f32 %v566_v33, %v608_v38  ;;  %1295 = vmatpush1.msra.mxu1 %v1231_v23  ;;  %v1221_v33 = vld [vmem:[#allocation7 + $0x460] sm:$0xff]  ;;  %v1219_v35 = vld [vmem:[#allocation7 + $0x450] sm:$0xff]  ;;  %v1216_v38 = vld [vmem:[#allocation7 + $0x438] sm:$0xff] }
 0x169   : > { %v573_v42 = vpop.f32.mrf.mxu0  ;;  %839 = vmatmul.mubr.f32.gmra.mxu1 %v634_v37  ;;  %1296 = vmatprep.subr.mxu1 %v1230_v24  ;;  %v1217_v37 = vld [vmem:[#allocation7 + $0x440] sm:$0xff]  ;;  %v1215_v39 = vld [vmem:[#allocation7 + $0x430] sm:$0xff] }
 0x16a   : > { %v637_v43 = vmax.f32 %v568_v36, %v609_v40  ;;  %v574_v44 = vadd.f32 %v573_v42, %v3077_v0  ;;  %v610_v46 = vmul.f32 0.2, %v572_v41  ;;  %1297 = vmatpush1.msra.mxu1 %v1229_v25  ;;  %v1218_v36 = vld [vmem:[#allocation7 + $0x448] sm:$0xff]  ;;  %v1212_v42 = vld [vmem:[#allocation7 + $0x418] sm:$0xff] }
 0x16b   : > { %v577_v47 = vpop.f32.mrf.mxu0  ;;  %1298 = vmatprep.subr.mxu1 %v1228_v26  ;;  %v1214_v40 = vld [vmem:[#allocation7 + $0x428] sm:$0xff] }
 0x16c   : > { %v611_v48 = vmul.f32 0.2, %v574_v44  ;;  %v578_v49 = vadd.f32 %v577_v47, %v3074_v13  ;;  %844 = vmatprep.mubr.f32.mxu1 %v637_v43  ;;  %v638_v53 = vmax.f32 %v572_v41, %v610_v46  ;;  %1299 = vmatpush1.msra.mxu1 %v1227_v27  ;;  %v1213_v41 = vld [vmem:[#allocation7 + $0x420] sm:$0xff]  ;;  %v1211_v43 = vld [vmem:[#allocation7 + $0x410] sm:$0xff]  ;;  %v1272_v46 = vld [vmem:[#allocation7 + $0x5f8] sm:$0xff] }
 0x16d   : > { %v579_v50 = vpop.f32.mrf.mxu0  ;;  %845 = vmatmul.mubr.f32.gmra.mxu1 %v636_v45  ;;  %1300 = vmatprep.subr.mxu1 %v1226_v28  ;;  %v1209_v45 = vld [vmem:[#allocation7 + $0x400] sm:$0xff]  ;;  %v1271_v47 = vld [vmem:[#allocation7 + $0x5f0] sm:$0xff] }
 0x16e   : > { %v639_v51 = vmax.f32 %v574_v44, %v611_v48  ;;  %v580_v52 = vadd.f32 %v579_v50, %v3077_v0  ;;  %v612_v54 = vmul.f32 0.2, %v578_v49  ;;  %1301 = vmatpush1.msra.mxu1 %v1225_v29  ;;  %v1210_v44 = vld [vmem:[#allocation7 + $0x408] sm:$0xff]  ;;  %v1268_v50 = vld [vmem:[#allocation7 + $0x5d8] sm:$0xff] }
 0x16f   : > { %v583_v55 = vpop.f32.mrf.mxu0  ;;  %1302 = vmatprep.subr.mxu1 %v1224_v30  ;;  %v1270_v48 = vld [vmem:[#allocation7 + $0x5e8] sm:$0xff] }
 0x170   : > { %v613_v56 = vmul.f32 0.2, %v580_v52  ;;  %v584_v57 = vadd.f32 %v583_v55, %v3074_v13  ;;  %850 = vmatprep.mubr.f32.mxu1 %v639_v51  ;;  %v640_v61 = vmax.f32 %v578_v49, %v612_v54  ;;  %v965_v13 = vld [vmem:[#allocation7 + $0x338] sm:$0xff]  ;;  %1303 = vmatpush1.msra.mxu1 %v1223_v31  ;;  %v1269_v49 = vld [vmem:[#allocation7 + $0x5e0] sm:$0xff]  ;;  %v1267_v51 = vld [vmem:[#allocation7 + $0x5d0] sm:$0xff] }
 0x171   : > { %v585_v58 = vpop.f32.mrf.mxu0  ;;  %851 = vmatmul.mubr.f32.gmra.mxu1 %v638_v53  ;;  %1059 = vmatprep.subr.mxu0 %v965_v13  ;;  %v1265_v53 = vld [vmem:[#allocation7 + $0x5c0] sm:$0xff]  ;;  %v1264_v54 = vld [vmem:[#allocation7 + $0x5b8] sm:$0xff]  ;;  %v1263_v55 = vld [vmem:[#allocation7 + $0x5b0] sm:$0xff] }
 0x172   : > { %v641_v59 = vmax.f32 %v580_v52, %v613_v56  ;;  %v586_v60 = vadd.f32 %v585_v58, %v3077_v0  ;;  %v614_v62 = vmul.f32 0.2, %v584_v57  ;;  %1060 = vmatpush2.msra.mxu0 %v964_v5  ;;  %v962_v0 = vld [vmem:[#allocation7 + $0x320] sm:$0xff]  ;;  %1304 = vmatprep.subr.mxu1 %v1222_v32  ;;  %v1266_v52 = vld [vmem:[#allocation7 + $0x5c8] sm:$0xff]  ;;  %v1260_v58 = vld [vmem:[#allocation7 + $0x598] sm:$0xff] }
 0x173   : > { %1061 = vmatprep.subr.mxu0 %v963_v6  ;;  %1305 = vmatpush1.msra.mxu1 %v1221_v33  ;;  %v1262_v56 = vld [vmem:[#allocation7 + $0x5a8] sm:$0xff]  ;;  %v708_v13 = vld [vmem:[#allocation8] sm:$0x3] }
 0x174   : > { %v615_v63 = vmul.f32 0.2, %v586_v60  ;;  %856 = vmatprep.mubr.f32.mxu1 %v641_v59  ;;  %v642_v2 = vmax.f32 %v584_v57, %v614_v62  ;;  %1062 = vmatpush2.msra.mxu0 %v962_v0  ;;  %v1261_v57 = vld [vmem:[#allocation7 + $0x5a0] sm:$0xff]  ;;  %v1259_v59 = vld [vmem:[#allocation7 + $0x590] sm:$0xff]  ;;  %v1256_v62 = vld [vmem:[#allocation7 + $0x578] sm:$0xff]  ;;  %v3108_v5 = vrot.slane %v708_v13, %v3069_v10  ;;  %v3111_v6 = vrot.slane %v708_v13, %v3071_v12 }
 0x175   : > { %857 = vmatmul.mubr.f32.gmra.mxu1 %v640_v61  ;;  %1063 = vmatprep.subr.mxu0 %v961_v7  ;;  %v1257_v61 = vld [vmem:[#allocation7 + $0x580] sm:$0xff] }
 0x176   : > { %v643_v1 = vmax.f32 %v586_v60, %v615_v63  ;;  %1064 = vmatpush2.msra.mxu0 %v960_v8  ;;  %1306 = vmatprep.subr.mxu1 %v1220_v34  ;;  %v1258_v60 = vld [vmem:[#allocation7 + $0x588] sm:$0xff]  ;;  %v1255_v63 = vld [vmem:[#allocation7 + $0x570] sm:$0xff] }
 0x177   : > { %1065 = vmatprep.subr.mxu0 %v959_v9  ;;  %1307 = vmatpush1.msra.mxu1 %v1219_v35 }
 0x178   : > { %862 = vmatprep.mubr.f32.mxu1 %v643_v1  ;;  %1066 = vmatpush2.msra.mxu0 %v958_v11  ;;  %v1254_v1 = vld [vmem:[#allocation7 + $0x568] sm:$0xff] }
 0x179   : > { %863 = vmatmul.mubr.f32.gmra.mxu1 %v642_v2  ;;  %1308 = vmatprep.subr.mxu1 %v1218_v36  ;;  %v1253_v2 = vld [vmem:[#allocation7 + $0x560] sm:$0xff] }
 0x17a   : > { %1309 = vmatpush1.msra.mxu1 %v1217_v37 }
 0x17b   : > { %1310 = vmatprep.subr.mxu1 %v1216_v38 }
 0x17c   : > { %1311 = vmatpush1.msra.mxu1 %v1215_v39 }
 0x17d   : > { %1312 = vmatprep.subr.mxu1 %v1214_v40 }
 0x17e   : > { %1313 = vmatpush1.msra.mxu1 %v1213_v41 }
 0x17f   : > { %1314 = vmatprep.subr.mxu1 %v1212_v42 }
 0x180   : > { %1315 = vmatpush1.msra.mxu1 %v1211_v43 }
 0x181   : > { %1316 = vmatprep.subr.mxu1 %v1210_v44 }
 0x182   : > { %1317 = vmatpush1.msra.mxu1 %v1209_v45 }
 0x183   : > { %1318 = vmatprep.subr.mxu1 %v1272_v46 }
 0x184   : > { %1319 = vmatpush2.msra.mxu1 %v1271_v47 }
 0x185   : > { %1320 = vmatprep.subr.mxu1 %v1270_v48 }
 0x186   : > { %1321 = vmatpush2.msra.mxu1 %v1269_v49 }
 0x187   : > { %1322 = vmatprep.subr.mxu1 %v1268_v50 }
 0x188   : > { %1323 = vmatpush2.msra.mxu1 %v1267_v51 }
 0x189   : > { %1324 = vmatprep.subr.mxu1 %v1266_v52 }
 0x18a   : > { %1325 = vmatpush2.msra.mxu1 %v1265_v53 }
 0x18b   : > { %1326 = vmatprep.subr.mxu1 %v1264_v54 }
 0x18c   : > { %1327 = vmatpush2.msra.mxu1 %v1263_v55 }
 0x18d   : > { %1328 = vmatprep.subr.mxu1 %v1262_v56 }
 0x18e   : > { %1329 = vmatpush2.msra.mxu1 %v1261_v57 }
 0x18f   : > { %1330 = vmatprep.subr.mxu1 %v1260_v58 }
 0x190   : > { %1331 = vmatpush2.msra.mxu1 %v1259_v59 }
 0x191   : > { %1332 = vmatprep.subr.mxu1 %v1258_v60 }
 0x192   : > { %1333 = vmatpush2.msra.mxu1 %v1257_v61 }
 0x193   : > { %1334 = vmatprep.subr.mxu1 %v1256_v62 }
 0x194   : > { %1335 = vmatpush2.msra.mxu1 %v1255_v63 }
 0x195   : > { %1336 = vmatprep.subr.mxu1 %v1254_v1 }
 0x196   : > { %1337 = vmatpush2.msra.mxu1 %v1253_v2 }
 0x197   : > { %1338 = vmatprep.subr.mxu1 %v1252_v3 }
 0x198   : > { %1339 = vmatpush2.msra.mxu1 %v1251_v4 }
 0x205   : > { %v786_v0 = vpop.f32.mrf.mxu1 }
 0x206   : > { %v787_v7 = vadd.f32 %v786_v0, %v3108_v5 }
 0x207   : > { %v788_v8 = vpop.f32.mrf.mxu1 }
 0x208   : > { %v789_v9 = vadd.f32 %v788_v8, %v3111_v6  ;;  %v869_v11 = vmul.f32 0.2, %v787_v7 }
 0x209   : > { %v792_v14 = vpop.f32.mrf.mxu1 }
 0x20a   : > { %v870_v15 = vmul.f32 0.2, %v789_v9  ;;  %v793_v16 = vadd.f32 %v792_v14, %v3108_v5  ;;  %v897_v20 = vmax.f32 %v787_v7, %v869_v11 }
 0x20b   : > { %v794_v17 = vpop.f32.mrf.mxu1 }
 0x20c   : > { %v898_v18 = vmax.f32 %v789_v9, %v870_v15  ;;  %v795_v19 = vadd.f32 %v794_v17, %v3111_v6  ;;  %v871_v21 = vmul.f32 0.2, %v793_v16 }
 0x20d   : > { %v798_v22 = vpop.f32.mrf.mxu1 }
 0x20e   : > { %v872_v23 = vmul.f32 0.2, %v795_v19  ;;  %v799_v24 = vadd.f32 %v798_v22, %v3108_v5  ;;  %1067 = vmatprep.mubr.f32.mxu0 %v898_v18  ;;  %v899_v28 = vmax.f32 %v793_v16, %v871_v21 }
 0x20f   : > { %v800_v25 = vpop.f32.mrf.mxu1  ;;  %1068 = vmatmul.mubr.f32.vlgmr.msra.gmra.mxu0 %v897_v20 }
 0x210   : > { %v900_v26 = vmax.f32 %v795_v19, %v872_v23  ;;  %v801_v27 = vadd.f32 %v800_v25, %v3111_v6  ;;  %v873_v29 = vmul.f32 0.2, %v799_v24 }
 0x211   : > { %v804_v30 = vpop.f32.mrf.mxu1 }
 0x212   : > { %v874_v31 = vmul.f32 0.2, %v801_v27  ;;  %v805_v32 = vadd.f32 %v804_v30, %v3108_v5  ;;  %1073 = vmatprep.mubr.f32.mxu0 %v900_v26  ;;  %v901_v36 = vmax.f32 %v799_v24, %v873_v29 }
 0x213   : > { %v806_v33 = vpop.f32.mrf.mxu1  ;;  %1074 = vmatmul.mubr.f32.gmra.mxu0 %v899_v28 }
 0x214   : > { %v902_v34 = vmax.f32 %v801_v27, %v874_v31  ;;  %v807_v35 = vadd.f32 %v806_v33, %v3111_v6  ;;  %v875_v37 = vmul.f32 0.2, %v805_v32 }
 0x215   : > { %v810_v38 = vpop.f32.mrf.mxu1 }
 0x216   : > { %v876_v39 = vmul.f32 0.2, %v807_v35  ;;  %v811_v40 = vadd.f32 %v810_v38, %v3108_v5  ;;  %1079 = vmatprep.mubr.f32.mxu0 %v902_v34  ;;  %v903_v44 = vmax.f32 %v805_v32, %v875_v37 }
 0x217   : > { %v812_v41 = vpop.f32.mrf.mxu1  ;;  %1080 = vmatmul.mubr.f32.gmra.mxu0 %v901_v36 }
 0x218   : > { %v904_v42 = vmax.f32 %v807_v35, %v876_v39  ;;  %v813_v43 = vadd.f32 %v812_v41, %v3111_v6  ;;  %v877_v45 = vmul.f32 0.2, %v811_v40 }
 0x219   : > { %v816_v46 = vpop.f32.mrf.mxu1 }
 0x21a   : > { %v878_v47 = vmul.f32 0.2, %v813_v43  ;;  %v817_v48 = vadd.f32 %v816_v46, %v3108_v5  ;;  %1085 = vmatprep.mubr.f32.mxu0 %v904_v42  ;;  %v905_v52 = vmax.f32 %v811_v40, %v877_v45 }
 0x21b   : > { %v818_v49 = vpop.f32.mrf.mxu1  ;;  %1086 = vmatmul.mubr.f32.gmra.mxu0 %v903_v44 }
 0x21c   : > { %v906_v50 = vmax.f32 %v813_v43, %v878_v47  ;;  %v819_v51 = vadd.f32 %v818_v49, %v3111_v6  ;;  %v879_v53 = vmul.f32 0.2, %v817_v48 }
 0x21d   : > { %v822_v54 = vpop.f32.mrf.mxu1 }
 0x21e   : > { %v880_v55 = vmul.f32 0.2, %v819_v51  ;;  %v823_v56 = vadd.f32 %v822_v54, %v3108_v5  ;;  %1091 = vmatprep.mubr.f32.mxu0 %v906_v50  ;;  %v907_v60 = vmax.f32 %v817_v48, %v879_v53 }
 0x21f   : > { %v824_v57 = vpop.f32.mrf.mxu1  ;;  %1092 = vmatmul.mubr.f32.gmra.mxu0 %v905_v52 }
 0x220   : > { %v908_v58 = vmax.f32 %v819_v51, %v880_v55  ;;  %v825_v59 = vadd.f32 %v824_v57, %v3111_v6  ;;  %v881_v61 = vmul.f32 0.2, %v823_v56 }
 0x221   : > { %v828_v62 = vpop.f32.mrf.mxu1 }
 0x222   : > { %v882_v63 = vmul.f32 0.2, %v825_v59  ;;  %v829_v1 = vadd.f32 %v828_v62, %v3108_v5  ;;  %1097 = vmatprep.mubr.f32.mxu0 %v908_v58  ;;  %v909_v13 = vmax.f32 %v823_v56, %v881_v61  ;;  %v1250_v61 = vld [vmem:[#allocation7 + $0x548] sm:$0xff]  ;;  %v1249_v62 = vld [vmem:[#allocation7 + $0x540] sm:$0xff] }
 0x223   : > { %v830_v2 = vpop.f32.mrf.mxu1  ;;  %1098 = vmatmul.mubr.f32.gmra.mxu0 %v907_v60  ;;  %1340 = vmatprep.subr.mxu1 %v1250_v61  ;;  %v1535_v61 = vld [vmem:[#allocation7 + $0x758] sm:$0xff] }
 0x224   : > { %v910_v3 = vmax.f32 %v825_v59, %v882_v63  ;;  %v831_v4 = vadd.f32 %v830_v2, %v3111_v6  ;;  %v883_v0 = vmul.f32 0.2, %v829_v1  ;;  %1341 = vmatpush2.msra.mxu1 %v1249_v62  ;;  %v1247_v63 = vld [vmem:[#allocation7 + $0x530] sm:$0xff]  ;;  %v1244_v2 = vld [vmem:[#allocation7 + $0x518] sm:$0xff] }
 0x225   : > { %v834_v7 = vpop.f32.mrf.mxu1  ;;  %v1534_v62 = vld [vmem:[#allocation7 + $0x750] sm:$0xff] }
 0x226   : > { %v884_v8 = vmul.f32 0.2, %v831_v4  ;;  %v835_v9 = vadd.f32 %v834_v7, %v3108_v5  ;;  %1103 = vmatprep.mubr.f32.mxu0 %v910_v3  ;;  %v911_v16 = vmax.f32 %v829_v1, %v883_v0  ;;  %v1246_v1 = vld [vmem:[#allocation7 + $0x528] sm:$0xff]  ;;  %v1243_v3 = vld [vmem:[#allocation7 + $0x510] sm:$0xff]  ;;  %v1523_v0 = vld [vmem:[#allocation7 + $0x6f8] sm:$0xff] }
 0x227   : > { %v836_v11 = vpop.f32.mrf.mxu1  ;;  %1104 = vmatmul.mubr.f32.gmra.mxu0 %v909_v13  ;;  %v1241_v13 = vld [vmem:[#allocation7 + $0x500] sm:$0xff]  ;;  %v1522_v7 = vld [vmem:[#allocation7 + $0x6f0] sm:$0xff]  ;;  %1569 = vmatprep.subr.mxu0 %v1523_v0 }
 0x228   : > { %v912_v14 = vmax.f32 %v831_v4, %v884_v8  ;;  %v837_v15 = vadd.f32 %v836_v11, %v3111_v6  ;;  %v885_v17 = vmul.f32 0.2, %v835_v9  ;;  %v1242_v4 = vld [vmem:[#allocation7 + $0x508] sm:$0xff]  ;;  %1570 = vmatpush1.msra.mxu0 %v1522_v7  ;;  %v1519_v11 = vld [vmem:[#allocation7 + $0x6d8] sm:$0xff] }
 0x229   : > { %v840_v18 = vpop.f32.mrf.mxu1  ;;  %v1521_v8 = vld [vmem:[#allocation7 + $0x6e8] sm:$0xff] }
 0x22a   : > { %v886_v19 = vmul.f32 0.2, %v837_v15  ;;  %v841_v20 = vadd.f32 %v840_v18, %v3108_v5  ;;  %1109 = vmatprep.mubr.f32.mxu0 %v912_v14  ;;  %v913_v24 = vmax.f32 %v835_v9, %v885_v17  ;;  %v1520_v9 = vld [vmem:[#allocation7 + $0x6e0] sm:$0xff]  ;;  %1571 = vmatprep.subr.mxu0 %v1521_v8  ;;  %v1518_v14 = vld [vmem:[#allocation7 + $0x6d0] sm:$0xff]  ;;  %v1515_v17 = vld [vmem:[#allocation7 + $0x6b8] sm:$0xff] }
 0x22b   : > { %v842_v21 = vpop.f32.mrf.mxu1  ;;  %1110 = vmatmul.mubr.f32.gmra.mxu0 %v911_v16  ;;  %v1516_v16 = vld [vmem:[#allocation7 + $0x6c0] sm:$0xff]  ;;  %v1514_v18 = vld [vmem:[#allocation7 + $0x6b0] sm:$0xff] }
 0x22c   : > { %v914_v22 = vmax.f32 %v837_v15, %v886_v19  ;;  %v843_v23 = vadd.f32 %v842_v21, %v3111_v6  ;;  %v887_v25 = vmul.f32 0.2, %v841_v20  ;;  %1572 = vmatpush1.msra.mxu0 %v1520_v9  ;;  %v1517_v15 = vld [vmem:[#allocation7 + $0x6c8] sm:$0xff]  ;;  %v1511_v21 = vld [vmem:[#allocation7 + $0x698] sm:$0xff] }
 0x22d   : > { %v846_v26 = vpop.f32.mrf.mxu1  ;;  %1573 = vmatprep.subr.mxu0 %v1519_v11  ;;  %v1513_v19 = vld [vmem:[#allocation7 + $0x6a8] sm:$0xff] }
 0x22e   : > { %v888_v27 = vmul.f32 0.2, %v843_v23  ;;  %v847_v28 = vadd.f32 %v846_v26, %v3108_v5  ;;  %1115 = vmatprep.mubr.f32.mxu0 %v914_v22  ;;  %v915_v32 = vmax.f32 %v841_v20, %v887_v25  ;;  %1574 = vmatpush1.msra.mxu0 %v1518_v14  ;;  %v1512_v20 = vld [vmem:[#allocation7 + $0x6a0] sm:$0xff]  ;;  %v1510_v22 = vld [vmem:[#allocation7 + $0x690] sm:$0xff]  ;;  %v1507_v25 = vld [vmem:[#allocation7 + $0x678] sm:$0xff] }
 0x22f   : > { %v848_v29 = vpop.f32.mrf.mxu1  ;;  %1116 = vmatmul.mubr.f32.gmra.mxu0 %v913_v24  ;;  %1575 = vmatprep.subr.mxu0 %v1517_v15  ;;  %v1508_v24 = vld [vmem:[#allocation7 + $0x680] sm:$0xff]  ;;  %v1506_v26 = vld [vmem:[#allocation7 + $0x670] sm:$0xff] }
 0x230   : > { %v916_v30 = vmax.f32 %v843_v23, %v888_v27  ;;  %v849_v31 = vadd.f32 %v848_v29, %v3111_v6  ;;  %v889_v33 = vmul.f32 0.2, %v847_v28  ;;  %1576 = vmatpush1.msra.mxu0 %v1516_v16  ;;  %v1509_v23 = vld [vmem:[#allocation7 + $0x688] sm:$0xff]  ;;  %v1503_v29 = vld [vmem:[#allocation7 + $0x658] sm:$0xff] }
 0x231   : > { %v852_v34 = vpop.f32.mrf.mxu1  ;;  %1577 = vmatprep.subr.mxu0 %v1515_v17  ;;  %v1505_v27 = vld [vmem:[#allocation7 + $0x668] sm:$0xff] }
 0x232   : > { %v890_v35 = vmul.f32 0.2, %v849_v31  ;;  %v853_v36 = vadd.f32 %v852_v34, %v3108_v5  ;;  %1121 = vmatprep.mubr.f32.mxu0 %v916_v30  ;;  %v917_v40 = vmax.f32 %v847_v28, %v889_v33  ;;  %1578 = vmatpush1.msra.mxu0 %v1514_v18  ;;  %v1504_v28 = vld [vmem:[#allocation7 + $0x660] sm:$0xff]  ;;  %v1502_v30 = vld [vmem:[#allocation7 + $0x650] sm:$0xff]  ;;  %v1499_v33 = vld [vmem:[#allocation7 + $0x638] sm:$0xff] }
 0x233   : > { %v854_v37 = vpop.f32.mrf.mxu1  ;;  %1122 = vmatmul.mubr.f32.gmra.mxu0 %v915_v32  ;;  %1579 = vmatprep.subr.mxu0 %v1513_v19  ;;  %v1500_v32 = vld [vmem:[#allocation7 + $0x640] sm:$0xff]  ;;  %v1498_v34 = vld [vmem:[#allocation7 + $0x630] sm:$0xff] }
 0x234   : > { %v918_v38 = vmax.f32 %v849_v31, %v890_v35  ;;  %v855_v39 = vadd.f32 %v854_v37, %v3111_v6  ;;  %v891_v41 = vmul.f32 0.2, %v853_v36  ;;  %1580 = vmatpush1.msra.mxu0 %v1512_v20  ;;  %v1501_v31 = vld [vmem:[#allocation7 + $0x648] sm:$0xff]  ;;  %v1495_v37 = vld [vmem:[#allocation7 + $0x618] sm:$0xff] }
 0x235   : > { %v858_v42 = vpop.f32.mrf.mxu1  ;;  %1581 = vmatprep.subr.mxu0 %v1511_v21  ;;  %v1497_v35 = vld [vmem:[#allocation7 + $0x628] sm:$0xff] }
 0x236   : > { %v892_v43 = vmul.f32 0.2, %v855_v39  ;;  %v859_v44 = vadd.f32 %v858_v42, %v3108_v5  ;;  %1127 = vmatprep.mubr.f32.mxu0 %v918_v38  ;;  %v919_v48 = vmax.f32 %v853_v36, %v891_v41  ;;  %1582 = vmatpush1.msra.mxu0 %v1510_v22  ;;  %v1496_v36 = vld [vmem:[#allocation7 + $0x620] sm:$0xff]  ;;  %v1494_v38 = vld [vmem:[#allocation7 + $0x610] sm:$0xff]  ;;  %v1555_v41 = vld [vmem:[#allocation7 + $0x7f8] sm:$0xff] }
 0x237   : > { %v860_v45 = vpop.f32.mrf.mxu1  ;;  %1128 = vmatmul.mubr.f32.gmra.mxu0 %v917_v40  ;;  %1583 = vmatprep.subr.mxu0 %v1509_v23  ;;  %v1492_v40 = vld [vmem:[#allocation7 + $0x600] sm:$0xff]  ;;  %v1554_v42 = vld [vmem:[#allocation7 + $0x7f0] sm:$0xff] }
 0x238   : > { %v920_v46 = vmax.f32 %v855_v39, %v892_v43  ;;  %v861_v47 = vadd.f32 %v860_v45, %v3111_v6  ;;  %v893_v49 = vmul.f32 0.2, %v859_v44  ;;  %1584 = vmatpush1.msra.mxu0 %v1508_v24  ;;  %v1493_v39 = vld [vmem:[#allocation7 + $0x608] sm:$0xff]  ;;  %v1551_v45 = vld [vmem:[#allocation7 + $0x7d8] sm:$0xff] }
 0x239   : > { %v864_v50 = vpop.f32.mrf.mxu1  ;;  %1585 = vmatprep.subr.mxu0 %v1507_v25  ;;  %v1553_v43 = vld [vmem:[#allocation7 + $0x7e8] sm:$0xff] }
 0x23a   : > { %v894_v51 = vmul.f32 0.2, %v861_v47  ;;  %v865_v52 = vadd.f32 %v864_v50, %v3108_v5  ;;  %1133 = vmatprep.mubr.f32.mxu0 %v920_v46  ;;  %v921_v56 = vmax.f32 %v859_v44, %v893_v49  ;;  %v1248_v5 = vld [vmem:[#allocation7 + $0x538] sm:$0xff]  ;;  %1586 = vmatpush1.msra.mxu0 %v1506_v26  ;;  %v1552_v44 = vld [vmem:[#allocation7 + $0x7e0] sm:$0xff]  ;;  %v1550_v46 = vld [vmem:[#allocation7 + $0x7d0] sm:$0xff] }
 0x23b   : > { %v866_v53 = vpop.f32.mrf.mxu1  ;;  %1134 = vmatmul.mubr.f32.gmra.mxu0 %v919_v48  ;;  %1342 = vmatprep.subr.mxu1 %v1248_v5  ;;  %v1548_v48 = vld [vmem:[#allocation7 + $0x7c0] sm:$0xff]  ;;  %v1547_v49 = vld [vmem:[#allocation7 + $0x7b8] sm:$0xff]  ;;  %v1546_v50 = vld [vmem:[#allocation7 + $0x7b0] sm:$0xff] }
 0x23c   : > { %v922_v54 = vmax.f32 %v861_v47, %v894_v51  ;;  %v867_v55 = vadd.f32 %v866_v53, %v3111_v6  ;;  %v895_v57 = vmul.f32 0.2, %v865_v52  ;;  %1343 = vmatpush2.msra.mxu1 %v1247_v63  ;;  %v1245_v6 = vld [vmem:[#allocation7 + $0x520] sm:$0xff]  ;;  %1587 = vmatprep.subr.mxu0 %v1505_v27  ;;  %v1549_v47 = vld [vmem:[#allocation7 + $0x7c8] sm:$0xff]  ;;  %v1543_v53 = vld [vmem:[#allocation7 + $0x798] sm:$0xff] }
 0x23d   : > { %1344 = vmatprep.subr.mxu1 %v1246_v1  ;;  %1588 = vmatpush1.msra.mxu0 %v1504_v28  ;;  %v1545_v51 = vld [vmem:[#allocation7 + $0x7a8] sm:$0xff]  ;;  %v991_v5 = vld [vmem:[#allocation8 + $0x2] sm:$0x3] }
 0x23e   : > { %v896_v58 = vmul.f32 0.2, %v867_v55  ;;  %1139 = vmatprep.mubr.f32.mxu0 %v922_v54  ;;  %v923_v60 = vmax.f32 %v865_v52, %v895_v57  ;;  %1345 = vmatpush2.msra.mxu1 %v1245_v6  ;;  %v1544_v52 = vld [vmem:[#allocation7 + $0x7a0] sm:$0xff]  ;;  %v1542_v54 = vld [vmem:[#allocation7 + $0x790] sm:$0xff]  ;;  %v1539_v57 = vld [vmem:[#allocation7 + $0x778] sm:$0xff]  ;;  %v3142_v63 = vrot.slane %v991_v5, %v3069_v10  ;;  %v3145_v1 = vrot.slane %v991_v5, %v3071_v12 }
 0x23f   : > { %1140 = vmatmul.mubr.f32.gmra.mxu0 %v921_v56  ;;  %1346 = vmatprep.subr.mxu1 %v1244_v2  ;;  %v1540_v56 = vld [vmem:[#allocation7 + $0x780] sm:$0xff] }
 0x240   : > { %v924_v59 = vmax.f32 %v867_v55, %v896_v58  ;;  %1347 = vmatpush2.msra.mxu1 %v1243_v3  ;;  %1589 = vmatprep.subr.mxu0 %v1503_v29  ;;  %v1541_v55 = vld [vmem:[#allocation7 + $0x788] sm:$0xff]  ;;  %v1538_v58 = vld [vmem:[#allocation7 + $0x770] sm:$0xff] }
 0x241   : > { %1348 = vmatprep.subr.mxu1 %v1242_v4  ;;  %1590 = vmatpush1.msra.mxu0 %v1502_v30 }
 0x242   : > { %1145 = vmatprep.mubr.f32.mxu0 %v924_v59  ;;  %1349 = vmatpush2.msra.mxu1 %v1241_v13  ;;  %v1537_v59 = vld [vmem:[#allocation7 + $0x768] sm:$0xff] }
 0x243   : > { %1146 = vmatmul.mubr.f32.gmra.mxu0 %v923_v60  ;;  %1591 = vmatprep.subr.mxu0 %v1501_v31  ;;  %v1536_v60 = vld [vmem:[#allocation7 + $0x760] sm:$0xff] }
 0x244   : > { %1592 = vmatpush1.msra.mxu0 %v1500_v32 }
 0x245   : > { %1593 = vmatprep.subr.mxu0 %v1499_v33 }
 0x246   : > { %1594 = vmatpush1.msra.mxu0 %v1498_v34 }
 0x247   : > { %1595 = vmatprep.subr.mxu0 %v1497_v35 }
 0x248   : > { %1596 = vmatpush1.msra.mxu0 %v1496_v36 }
 0x249   : > { %1597 = vmatprep.subr.mxu0 %v1495_v37 }
 0x24a   : > { %1598 = vmatpush1.msra.mxu0 %v1494_v38 }
 0x24b   : > { %1599 = vmatprep.subr.mxu0 %v1493_v39 }
 0x24c   : > { %1600 = vmatpush1.msra.mxu0 %v1492_v40 }
 0x24d   : > { %1601 = vmatprep.subr.mxu0 %v1555_v41 }
 0x24e   : > { %1602 = vmatpush2.msra.mxu0 %v1554_v42 }
 0x24f   : > { %1603 = vmatprep.subr.mxu0 %v1553_v43 }
 0x250   : > { %1604 = vmatpush2.msra.mxu0 %v1552_v44 }
 0x251   : > { %1605 = vmatprep.subr.mxu0 %v1551_v45 }
 0x252   : > { %1606 = vmatpush2.msra.mxu0 %v1550_v46 }
 0x253   : > { %1607 = vmatprep.subr.mxu0 %v1549_v47 }
 0x254   : > { %1608 = vmatpush2.msra.mxu0 %v1548_v48 }
 0x255   : > { %1609 = vmatprep.subr.mxu0 %v1547_v49 }
 0x256   : > { %1610 = vmatpush2.msra.mxu0 %v1546_v50 }
 0x257   : > { %1611 = vmatprep.subr.mxu0 %v1545_v51 }
 0x258   : > { %1612 = vmatpush2.msra.mxu0 %v1544_v52 }
 0x259   : > { %1613 = vmatprep.subr.mxu0 %v1543_v53 }
 0x25a   : > { %1614 = vmatpush2.msra.mxu0 %v1542_v54 }
 0x25b   : > { %1615 = vmatprep.subr.mxu0 %v1541_v55 }
 0x25c   : > { %1616 = vmatpush2.msra.mxu0 %v1540_v56 }
 0x25d   : > { %1617 = vmatprep.subr.mxu0 %v1539_v57 }
 0x25e   : > { %1618 = vmatpush2.msra.mxu0 %v1538_v58 }
 0x25f   : > { %1619 = vmatprep.subr.mxu0 %v1537_v59 }
 0x260   : > { %1620 = vmatpush2.msra.mxu0 %v1536_v60 }
 0x261   : > { %1621 = vmatprep.subr.mxu0 %v1535_v61 }
 0x262   : > { %1622 = vmatpush2.msra.mxu0 %v1534_v62 }
 0x2cf   : > { %v1069_v6 = vpop.f32.mrf.mxu0 }
 0x2d0   : > { %v1070_v2 = vadd.f32 %v1069_v6, %v3142_v63 }
 0x2d1   : > { %v1071_v3 = vpop.f32.mrf.mxu0 }
 0x2d2   : > { %v1072_v4 = vadd.f32 %v1071_v3, %v3145_v1  ;;  %v1152_v13 = vmul.f32 0.2, %v1070_v2 }
 0x2d3   : > { %v1075_v0 = vpop.f32.mrf.mxu0 }
 0x2d4   : > { %v1153_v7 = vmul.f32 0.2, %v1072_v4  ;;  %v1076_v8 = vadd.f32 %v1075_v0, %v3142_v63  ;;  %v1180_v15 = vmax.f32 %v1070_v2, %v1152_v13 }
 0x2d5   : > { %v1077_v9 = vpop.f32.mrf.mxu0 }
 0x2d6   : > { %v1181_v11 = vmax.f32 %v1072_v4, %v1153_v7  ;;  %v1078_v14 = vadd.f32 %v1077_v9, %v3145_v1  ;;  %v1154_v16 = vmul.f32 0.2, %v1076_v8 }
 0x2d7   : > { %v1081_v17 = vpop.f32.mrf.mxu0 }
 0x2d8   : > { %v1155_v18 = vmul.f32 0.2, %v1078_v14  ;;  %v1082_v19 = vadd.f32 %v1081_v17, %v3142_v63  ;;  %1350 = vmatprep.mubr.f32.mxu1 %v1181_v11  ;;  %v1182_v23 = vmax.f32 %v1076_v8, %v1154_v16 }
 0x2d9   : > { %v1083_v20 = vpop.f32.mrf.mxu0  ;;  %1351 = vmatmul.mubr.f32.vlgmr.msra.gmra.mxu1 %v1180_v15 }
 0x2da   : > { %v1183_v21 = vmax.f32 %v1078_v14, %v1155_v18  ;;  %v1084_v22 = vadd.f32 %v1083_v20, %v3145_v1  ;;  %v1156_v24 = vmul.f32 0.2, %v1082_v19 }
 0x2db   : > { %v1087_v25 = vpop.f32.mrf.mxu0 }
 0x2dc   : > { %v1157_v26 = vmul.f32 0.2, %v1084_v22  ;;  %v1088_v27 = vadd.f32 %v1087_v25, %v3142_v63  ;;  %1356 = vmatprep.mubr.f32.mxu1 %v1183_v21  ;;  %v1184_v31 = vmax.f32 %v1082_v19, %v1156_v24 }
 0x2dd   : > { %v1089_v28 = vpop.f32.mrf.mxu0  ;;  %1357 = vmatmul.mubr.f32.gmra.mxu1 %v1182_v23 }
 0x2de   : > { %v1185_v29 = vmax.f32 %v1084_v22, %v1157_v26  ;;  %v1090_v30 = vadd.f32 %v1089_v28, %v3145_v1  ;;  %v1158_v32 = vmul.f32 0.2, %v1088_v27 }
 0x2df   : > { %v1093_v33 = vpop.f32.mrf.mxu0 }
 0x2e0   : > { %v1159_v34 = vmul.f32 0.2, %v1090_v30  ;;  %v1094_v35 = vadd.f32 %v1093_v33, %v3142_v63  ;;  %1362 = vmatprep.mubr.f32.mxu1 %v1185_v29  ;;  %v1186_v39 = vmax.f32 %v1088_v27, %v1158_v32 }
 0x2e1   : > { %v1095_v36 = vpop.f32.mrf.mxu0  ;;  %1363 = vmatmul.mubr.f32.gmra.mxu1 %v1184_v31 }
 0x2e2   : > { %v1187_v37 = vmax.f32 %v1090_v30, %v1159_v34  ;;  %v1096_v38 = vadd.f32 %v1095_v36, %v3145_v1  ;;  %v1160_v40 = vmul.f32 0.2, %v1094_v35 }
 0x2e3   : > { %v1099_v41 = vpop.f32.mrf.mxu0 }
 0x2e4   : > { %v1161_v42 = vmul.f32 0.2, %v1096_v38  ;;  %v1100_v43 = vadd.f32 %v1099_v41, %v3142_v63  ;;  %1368 = vmatprep.mubr.f32.mxu1 %v1187_v37  ;;  %v1188_v47 = vmax.f32 %v1094_v35, %v1160_v40 }
 0x2e5   : > { %v1101_v44 = vpop.f32.mrf.mxu0  ;;  %1369 = vmatmul.mubr.f32.gmra.mxu1 %v1186_v39 }
 0x2e6   : > { %v1189_v45 = vmax.f32 %v1096_v38, %v1161_v42  ;;  %v1102_v46 = vadd.f32 %v1101_v44, %v3145_v1  ;;  %v1162_v48 = vmul.f32 0.2, %v1100_v43 }
 0x2e7   : > { %v1105_v49 = vpop.f32.mrf.mxu0 }
 0x2e8   : > { %v1163_v50 = vmul.f32 0.2, %v1102_v46  ;;  %v1106_v51 = vadd.f32 %v1105_v49, %v3142_v63  ;;  %1374 = vmatprep.mubr.f32.mxu1 %v1189_v45  ;;  %v1190_v55 = vmax.f32 %v1100_v43, %v1162_v48 }
 0x2e9   : > { %v1107_v52 = vpop.f32.mrf.mxu0  ;;  %1375 = vmatmul.mubr.f32.gmra.mxu1 %v1188_v47 }
 0x2ea   : > { %v1191_v53 = vmax.f32 %v1102_v46, %v1163_v50  ;;  %v1108_v54 = vadd.f32 %v1107_v52, %v3145_v1  ;;  %v1164_v56 = vmul.f32 0.2, %v1106_v51 }
 0x2eb   : > { %v1111_v57 = vpop.f32.mrf.mxu0 }
 0x2ec   : > { %v1165_v58 = vmul.f32 0.2, %v1108_v54  ;;  %v1112_v59 = vadd.f32 %v1111_v57, %v3142_v63  ;;  %1380 = vmatprep.mubr.f32.mxu1 %v1191_v53  ;;  %v1192_v5 = vmax.f32 %v1106_v51, %v1164_v56  ;;  %v1533_v56 = vld [vmem:[#allocation7 + $0x748] sm:$0xff]  ;;  %v1532_v57 = vld [vmem:[#allocation7 + $0x740] sm:$0xff] }
 0x2ed   : > { %v1113_v60 = vpop.f32.mrf.mxu0  ;;  %1381 = vmatmul.mubr.f32.gmra.mxu1 %v1190_v55  ;;  %1623 = vmatprep.subr.mxu0 %v1533_v56  ;;  %v1818_v56 = vld [vmem:[#allocation7 + $0x958] sm:$0xff] }
 0x2ee   : > { %v1193_v61 = vmax.f32 %v1108_v54, %v1165_v58  ;;  %v1114_v62 = vadd.f32 %v1113_v60, %v3145_v1  ;;  %v1166_v6 = vmul.f32 0.2, %v1112_v59  ;;  %1624 = vmatpush2.msra.mxu0 %v1532_v57  ;;  %v1530_v58 = vld [vmem:[#allocation7 + $0x730] sm:$0xff]  ;;  %v1527_v60 = vld [vmem:[#allocation7 + $0x718] sm:$0xff] }
 0x2ef   : > { %v1117_v2 = vpop.f32.mrf.mxu0  ;;  %v1817_v57 = vld [vmem:[#allocation7 + $0x950] sm:$0xff] }
 0x2f0   : > { %v1167_v3 = vmul.f32 0.2, %v1114_v62  ;;  %v1118_v4 = vadd.f32 %v1117_v2, %v3142_v63  ;;  %1386 = vmatprep.mubr.f32.mxu1 %v1193_v61  ;;  %v1194_v8 = vmax.f32 %v1112_v59, %v1166_v6  ;;  %v1529_v59 = vld [vmem:[#allocation7 + $0x728] sm:$0xff]  ;;  %v1526_v61 = vld [vmem:[#allocation7 + $0x710] sm:$0xff]  ;;  %v1806_v6 = vld [vmem:[#allocation7 + $0x8f8] sm:$0xff] }
 0x2f1   : > { %v1119_v13 = vpop.f32.mrf.mxu0  ;;  %1387 = vmatmul.mubr.f32.gmra.mxu1 %v1192_v5  ;;  %v1524_v5 = vld [vmem:[#allocation7 + $0x700] sm:$0xff]  ;;  %v1805_v2 = vld [vmem:[#allocation7 + $0x8f0] sm:$0xff]  ;;  %1852 = vmatprep.subr.mxu1 %v1806_v6 }
 0x2f2   : > { %v1195_v0 = vmax.f32 %v1114_v62, %v1167_v3  ;;  %v1120_v7 = vadd.f32 %v1119_v13, %v3145_v1  ;;  %v1168_v9 = vmul.f32 0.2, %v1118_v4  ;;  %v1525_v62 = vld [vmem:[#allocation7 + $0x708] sm:$0xff]  ;;  %1853 = vmatpush1.msra.mxu1 %v1805_v2  ;;  %v1802_v13 = vld [vmem:[#allocation7 + $0x8d8] sm:$0xff] }
 0x2f3   : > { %v1123_v11 = vpop.f32.mrf.mxu0  ;;  %v1804_v3 = vld [vmem:[#allocation7 + $0x8e8] sm:$0xff] }
 0x2f4   : > { %v1169_v14 = vmul.f32 0.2, %v1120_v7  ;;  %v1124_v15 = vadd.f32 %v1123_v11, %v3142_v63  ;;  %1392 = vmatprep.mubr.f32.mxu1 %v1195_v0  ;;  %v1196_v19 = vmax.f32 %v1118_v4, %v1168_v9  ;;  %v1803_v4 = vld [vmem:[#allocation7 + $0x8e0] sm:$0xff]  ;;  %1854 = vmatprep.subr.mxu1 %v1804_v3  ;;  %v1801_v0 = vld [vmem:[#allocation7 + $0x8d0] sm:$0xff]  ;;  %v1798_v9 = vld [vmem:[#allocation7 + $0x8b8] sm:$0xff] }
 0x2f5   : > { %v1125_v16 = vpop.f32.mrf.mxu0  ;;  %1393 = vmatmul.mubr.f32.gmra.mxu1 %v1194_v8  ;;  %v1799_v8 = vld [vmem:[#allocation7 + $0x8c0] sm:$0xff]  ;;  %v1797_v11 = vld [vmem:[#allocation7 + $0x8b0] sm:$0xff] }
 0x2f6   : > { %v1197_v17 = vmax.f32 %v1120_v7, %v1169_v14  ;;  %v1126_v18 = vadd.f32 %v1125_v16, %v3145_v1  ;;  %v1170_v20 = vmul.f32 0.2, %v1124_v15  ;;  %1855 = vmatpush1.msra.mxu1 %v1803_v4  ;;  %v1800_v7 = vld [vmem:[#allocation7 + $0x8c8] sm:$0xff]  ;;  %v1794_v16 = vld [vmem:[#allocation7 + $0x898] sm:$0xff] }
 0x2f7   : > { %v1129_v21 = vpop.f32.mrf.mxu0  ;;  %1856 = vmatprep.subr.mxu1 %v1802_v13  ;;  %v1796_v14 = vld [vmem:[#allocation7 + $0x8a8] sm:$0xff] }
 0x2f8   : > { %v1171_v22 = vmul.f32 0.2, %v1126_v18  ;;  %v1130_v23 = vadd.f32 %v1129_v21, %v3142_v63  ;;  %1398 = vmatprep.mubr.f32.mxu1 %v1197_v17  ;;  %v1198_v27 = vmax.f32 %v1124_v15, %v1170_v20  ;;  %1857 = vmatpush1.msra.mxu1 %v1801_v0  ;;  %v1795_v15 = vld [vmem:[#allocation7 + $0x8a0] sm:$0xff]  ;;  %v1793_v17 = vld [vmem:[#allocation7 + $0x890] sm:$0xff]  ;;  %v1790_v20 = vld [vmem:[#allocation7 + $0x878] sm:$0xff] }
 0x2f9   : > { %v1131_v24 = vpop.f32.mrf.mxu0  ;;  %1399 = vmatmul.mubr.f32.gmra.mxu1 %v1196_v19  ;;  %1858 = vmatprep.subr.mxu1 %v1800_v7  ;;  %v1791_v19 = vld [vmem:[#allocation7 + $0x880] sm:$0xff]  ;;  %v1789_v21 = vld [vmem:[#allocation7 + $0x870] sm:$0xff] }
 0x2fa   : > { %v1199_v25 = vmax.f32 %v1126_v18, %v1171_v22  ;;  %v1132_v26 = vadd.f32 %v1131_v24, %v3145_v1  ;;  %v1172_v28 = vmul.f32 0.2, %v1130_v23  ;;  %1859 = vmatpush1.msra.mxu1 %v1799_v8  ;;  %v1792_v18 = vld [vmem:[#allocation7 + $0x888] sm:$0xff]  ;;  %v1786_v24 = vld [vmem:[#allocation7 + $0x858] sm:$0xff] }
 0x2fb   : > { %v1135_v29 = vpop.f32.mrf.mxu0  ;;  %1860 = vmatprep.subr.mxu1 %v1798_v9  ;;  %v1788_v22 = vld [vmem:[#allocation7 + $0x868] sm:$0xff] }
 0x2fc   : > { %v1173_v30 = vmul.f32 0.2, %v1132_v26  ;;  %v1136_v31 = vadd.f32 %v1135_v29, %v3142_v63  ;;  %1404 = vmatprep.mubr.f32.mxu1 %v1199_v25  ;;  %v1200_v35 = vmax.f32 %v1130_v23, %v1172_v28  ;;  %1861 = vmatpush1.msra.mxu1 %v1797_v11  ;;  %v1787_v23 = vld [vmem:[#allocation7 + $0x860] sm:$0xff]  ;;  %v1785_v25 = vld [vmem:[#allocation7 + $0x850] sm:$0xff]  ;;  %v1782_v28 = vld [vmem:[#allocation7 + $0x838] sm:$0xff] }
 0x2fd   : > { %v1137_v32 = vpop.f32.mrf.mxu0  ;;  %1405 = vmatmul.mubr.f32.gmra.mxu1 %v1198_v27  ;;  %1862 = vmatprep.subr.mxu1 %v1796_v14  ;;  %v1783_v27 = vld [vmem:[#allocation7 + $0x840] sm:$0xff]  ;;  %v1781_v29 = vld [vmem:[#allocation7 + $0x830] sm:$0xff] }
 0x2fe   : > { %v1201_v33 = vmax.f32 %v1132_v26, %v1173_v30  ;;  %v1138_v34 = vadd.f32 %v1137_v32, %v3145_v1  ;;  %v1174_v36 = vmul.f32 0.2, %v1136_v31  ;;  %1863 = vmatpush1.msra.mxu1 %v1795_v15  ;;  %v1784_v26 = vld [vmem:[#allocation7 + $0x848] sm:$0xff]  ;;  %v1778_v32 = vld [vmem:[#allocation7 + $0x818] sm:$0xff] }
 0x2ff   : > { %v1141_v37 = vpop.f32.mrf.mxu0  ;;  %1864 = vmatprep.subr.mxu1 %v1794_v16  ;;  %v1780_v30 = vld [vmem:[#allocation7 + $0x828] sm:$0xff] }
 0x300   : > { %v1175_v38 = vmul.f32 0.2, %v1138_v34  ;;  %v1142_v39 = vadd.f32 %v1141_v37, %v3142_v63  ;;  %1410 = vmatprep.mubr.f32.mxu1 %v1201_v33  ;;  %v1202_v43 = vmax.f32 %v1136_v31, %v1174_v36  ;;  %1865 = vmatpush1.msra.mxu1 %v1793_v17  ;;  %v1779_v31 = vld [vmem:[#allocation7 + $0x820] sm:$0xff]  ;;  %v1777_v33 = vld [vmem:[#allocation7 + $0x810] sm:$0xff]  ;;  %v1838_v36 = vld [vmem:[#allocation7 + $0x9f8] sm:$0xff] }
 0x301   : > { %v1143_v40 = vpop.f32.mrf.mxu0  ;;  %1411 = vmatmul.mubr.f32.gmra.mxu1 %v1200_v35  ;;  %1866 = vmatprep.subr.mxu1 %v1792_v18  ;;  %v1775_v35 = vld [vmem:[#allocation7 + $0x800] sm:$0xff]  ;;  %v1837_v37 = vld [vmem:[#allocation7 + $0x9f0] sm:$0xff] }
 0x302   : > { %v1203_v41 = vmax.f32 %v1138_v34, %v1175_v38  ;;  %v1144_v42 = vadd.f32 %v1143_v40, %v3145_v1  ;;  %v1176_v44 = vmul.f32 0.2, %v1142_v39  ;;  %1867 = vmatpush1.msra.mxu1 %v1791_v19  ;;  %v1776_v34 = vld [vmem:[#allocation7 + $0x808] sm:$0xff]  ;;  %v1834_v40 = vld [vmem:[#allocation7 + $0x9d8] sm:$0xff] }
 0x303   : > { %v1147_v45 = vpop.f32.mrf.mxu0  ;;  %1868 = vmatprep.subr.mxu1 %v1790_v20  ;;  %v1836_v38 = vld [vmem:[#allocation7 + $0x9e8] sm:$0xff] }
 0x304   : > { %v1177_v46 = vmul.f32 0.2, %v1144_v42  ;;  %v1148_v47 = vadd.f32 %v1147_v45, %v3142_v63  ;;  %1416 = vmatprep.mubr.f32.mxu1 %v1203_v41  ;;  %v1204_v51 = vmax.f32 %v1142_v39, %v1176_v44  ;;  %v1531_v63 = vld [vmem:[#allocation7 + $0x738] sm:$0xff]  ;;  %1869 = vmatpush1.msra.mxu1 %v1789_v21  ;;  %v1835_v39 = vld [vmem:[#allocation7 + $0x9e0] sm:$0xff]  ;;  %v1833_v41 = vld [vmem:[#allocation7 + $0x9d0] sm:$0xff] }
 0x305   : > { %v1149_v48 = vpop.f32.mrf.mxu0  ;;  %1417 = vmatmul.mubr.f32.gmra.mxu1 %v1202_v43  ;;  %1625 = vmatprep.subr.mxu0 %v1531_v63  ;;  %v1831_v43 = vld [vmem:[#allocation7 + $0x9c0] sm:$0xff]  ;;  %v1830_v44 = vld [vmem:[#allocation7 + $0x9b8] sm:$0xff]  ;;  %v1829_v45 = vld [vmem:[#allocation7 + $0x9b0] sm:$0xff] }
 0x306   : > { %v1205_v49 = vmax.f32 %v1144_v42, %v1177_v46  ;;  %v1150_v50 = vadd.f32 %v1149_v48, %v3145_v1  ;;  %v1178_v52 = vmul.f32 0.2, %v1148_v47  ;;  %1626 = vmatpush2.msra.mxu0 %v1530_v58  ;;  %v1528_v1 = vld [vmem:[#allocation7 + $0x720] sm:$0xff]  ;;  %1870 = vmatprep.subr.mxu1 %v1788_v22  ;;  %v1832_v42 = vld [vmem:[#allocation7 + $0x9c8] sm:$0xff]  ;;  %v1826_v48 = vld [vmem:[#allocation7 + $0x998] sm:$0xff] }
 0x307   : > { %1627 = vmatprep.subr.mxu0 %v1529_v59  ;;  %1871 = vmatpush1.msra.mxu1 %v1787_v23  ;;  %v1828_v46 = vld [vmem:[#allocation7 + $0x9a8] sm:$0xff]  ;;  %v1274_v63 = vld [vmem:[#allocation8 + $0x4] sm:$0x3] }
 0x308   : > { %v1179_v53 = vmul.f32 0.2, %v1150_v50  ;;  %1422 = vmatprep.mubr.f32.mxu1 %v1205_v49  ;;  %v1206_v55 = vmax.f32 %v1148_v47, %v1178_v52  ;;  %1628 = vmatpush2.msra.mxu0 %v1528_v1  ;;  %v1827_v47 = vld [vmem:[#allocation7 + $0x9a0] sm:$0xff]  ;;  %v1825_v49 = vld [vmem:[#allocation7 + $0x990] sm:$0xff]  ;;  %v1822_v52 = vld [vmem:[#allocation7 + $0x978] sm:$0xff]  ;;  %v3176_v58 = vrot.slane %v1274_v63, %v3069_v10  ;;  %v3179_v59 = vrot.slane %v1274_v63, %v3071_v12 }
 0x309   : > { %1423 = vmatmul.mubr.f32.gmra.mxu1 %v1204_v51  ;;  %1629 = vmatprep.subr.mxu0 %v1527_v60  ;;  %v1823_v51 = vld [vmem:[#allocation7 + $0x980] sm:$0xff] }
 0x30a   : > { %v1207_v54 = vmax.f32 %v1150_v50, %v1179_v53  ;;  %1630 = vmatpush2.msra.mxu0 %v1526_v61  ;;  %1872 = vmatprep.subr.mxu1 %v1786_v24  ;;  %v1824_v50 = vld [vmem:[#allocation7 + $0x988] sm:$0xff]  ;;  %v1821_v53 = vld [vmem:[#allocation7 + $0x970] sm:$0xff] }
 0x30b   : > { %1631 = vmatprep.subr.mxu0 %v1525_v62  ;;  %1873 = vmatpush1.msra.mxu1 %v1785_v25 }
 0x30c   : > { %1428 = vmatprep.mubr.f32.mxu1 %v1207_v54  ;;  %1632 = vmatpush2.msra.mxu0 %v1524_v5  ;;  %v1820_v54 = vld [vmem:[#allocation7 + $0x968] sm:$0xff] }
 0x30d   : > { %1429 = vmatmul.mubr.f32.gmra.mxu1 %v1206_v55  ;;  %1874 = vmatprep.subr.mxu1 %v1784_v26  ;;  %v1819_v55 = vld [vmem:[#allocation7 + $0x960] sm:$0xff] }
 0x30e   : > { %1875 = vmatpush1.msra.mxu1 %v1783_v27 }
 0x30f   : > { %1876 = vmatprep.subr.mxu1 %v1782_v28 }
 0x310   : > { %1877 = vmatpush1.msra.mxu1 %v1781_v29 }
 0x311   : > { %1878 = vmatprep.subr.mxu1 %v1780_v30 }
 0x312   : > { %1879 = vmatpush1.msra.mxu1 %v1779_v31 }
 0x313   : > { %1880 = vmatprep.subr.mxu1 %v1778_v32 }
 0x314   : > { %1881 = vmatpush1.msra.mxu1 %v1777_v33 }
 0x315   : > { %1882 = vmatprep.subr.mxu1 %v1776_v34 }
 0x316   : > { %1883 = vmatpush1.msra.mxu1 %v1775_v35 }
 0x317   : > { %1884 = vmatprep.subr.mxu1 %v1838_v36 }
 0x318   : > { %1885 = vmatpush2.msra.mxu1 %v1837_v37 }
 0x319   : > { %1886 = vmatprep.subr.mxu1 %v1836_v38 }
 0x31a   : > { %1887 = vmatpush2.msra.mxu1 %v1835_v39 }
 0x31b   : > { %1888 = vmatprep.subr.mxu1 %v1834_v40 }
 0x31c   : > { %1889 = vmatpush2.msra.mxu1 %v1833_v41 }
 0x31d   : > { %1890 = vmatprep.subr.mxu1 %v1832_v42 }
 0x31e   : > { %1891 = vmatpush2.msra.mxu1 %v1831_v43 }
 0x31f   : > { %1892 = vmatprep.subr.mxu1 %v1830_v44 }
 0x320   : > { %1893 = vmatpush2.msra.mxu1 %v1829_v45 }
 0x321   : > { %1894 = vmatprep.subr.mxu1 %v1828_v46 }
 0x322   : > { %1895 = vmatpush2.msra.mxu1 %v1827_v47 }
 0x323   : > { %1896 = vmatprep.subr.mxu1 %v1826_v48 }
 0x324   : > { %1897 = vmatpush2.msra.mxu1 %v1825_v49 }
 0x325   : > { %1898 = vmatprep.subr.mxu1 %v1824_v50 }
 0x326   : > { %1899 = vmatpush2.msra.mxu1 %v1823_v51 }
 0x327   : > { %1900 = vmatprep.subr.mxu1 %v1822_v52 }
 0x328   : > { %1901 = vmatpush2.msra.mxu1 %v1821_v53 }
 0x329   : > { %1902 = vmatprep.subr.mxu1 %v1820_v54 }
 0x32a   : > { %1903 = vmatpush2.msra.mxu1 %v1819_v55 }
 0x32b   : > { %1904 = vmatprep.subr.mxu1 %v1818_v56 }
 0x32c   : > { %1905 = vmatpush2.msra.mxu1 %v1817_v57 }
 0x399   : > { %v1352_v1 = vpop.f32.mrf.mxu1 }
 0x39a   : > { %v1353_v60 = vadd.f32 %v1352_v1, %v3176_v58 }
 0x39b   : > { %v1354_v61 = vpop.f32.mrf.mxu1 }
 0x39c   : > { %v1355_v62 = vadd.f32 %v1354_v61, %v3179_v59  ;;  %v1435_v5 = vmul.f32 0.2, %v1353_v60 }
 0x39d   : > { %v1358_v6 = vpop.f32.mrf.mxu1 }
 0x39e   : > { %v1436_v2 = vmul.f32 0.2, %v1355_v62  ;;  %v1359_v3 = vadd.f32 %v1358_v6, %v3176_v58  ;;  %v1463_v7 = vmax.f32 %v1353_v60, %v1435_v5 }
 0x39f   : > { %v1360_v4 = vpop.f32.mrf.mxu1 }
 0x3a0   : > { %v1464_v13 = vmax.f32 %v1355_v62, %v1436_v2  ;;  %v1361_v0 = vadd.f32 %v1360_v4, %v3179_v59  ;;  %v1437_v8 = vmul.f32 0.2, %v1359_v3 }
 0x3a1   : > { %v1364_v9 = vpop.f32.mrf.mxu1 }
 0x3a2   : > { %v1438_v11 = vmul.f32 0.2, %v1361_v0  ;;  %v1365_v14 = vadd.f32 %v1364_v9, %v3176_v58  ;;  %1633 = vmatprep.mubr.f32.mxu0 %v1464_v13  ;;  %v1465_v18 = vmax.f32 %v1359_v3, %v1437_v8 }
 0x3a3   : > { %v1366_v15 = vpop.f32.mrf.mxu1  ;;  %1634 = vmatmul.mubr.f32.vlgmr.msra.gmra.mxu0 %v1463_v7 }
 0x3a4   : > { %v1466_v16 = vmax.f32 %v1361_v0, %v1438_v11  ;;  %v1367_v17 = vadd.f32 %v1366_v15, %v3179_v59  ;;  %v1439_v19 = vmul.f32 0.2, %v1365_v14 }
 0x3a5   : > { %v1370_v20 = vpop.f32.mrf.mxu1 }
 0x3a6   : > { %v1440_v21 = vmul.f32 0.2, %v1367_v17  ;;  %v1371_v22 = vadd.f32 %v1370_v20, %v3176_v58  ;;  %1639 = vmatprep.mubr.f32.mxu0 %v1466_v16  ;;  %v1467_v26 = vmax.f32 %v1365_v14, %v1439_v19 }
 0x3a7   : > { %v1372_v23 = vpop.f32.mrf.mxu1  ;;  %1640 = vmatmul.mubr.f32.gmra.mxu0 %v1465_v18 }
 0x3a8   : > { %v1468_v24 = vmax.f32 %v1367_v17, %v1440_v21  ;;  %v1373_v25 = vadd.f32 %v1372_v23, %v3179_v59  ;;  %v1441_v27 = vmul.f32 0.2, %v1371_v22 }
 0x3a9   : > { %v1376_v28 = vpop.f32.mrf.mxu1 }
 0x3aa   : > { %v1442_v29 = vmul.f32 0.2, %v1373_v25  ;;  %v1377_v30 = vadd.f32 %v1376_v28, %v3176_v58  ;;  %1645 = vmatprep.mubr.f32.mxu0 %v1468_v24  ;;  %v1469_v34 = vmax.f32 %v1371_v22, %v1441_v27 }
 0x3ab   : > { %v1378_v31 = vpop.f32.mrf.mxu1  ;;  %1646 = vmatmul.mubr.f32.gmra.mxu0 %v1467_v26 }
 0x3ac   : > { %v1470_v32 = vmax.f32 %v1373_v25, %v1442_v29  ;;  %v1379_v33 = vadd.f32 %v1378_v31, %v3179_v59  ;;  %v1443_v35 = vmul.f32 0.2, %v1377_v30 }
 0x3ad   : > { %v1382_v36 = vpop.f32.mrf.mxu1 }
 0x3ae   : > { %v1444_v37 = vmul.f32 0.2, %v1379_v33  ;;  %v1383_v38 = vadd.f32 %v1382_v36, %v3176_v58  ;;  %1651 = vmatprep.mubr.f32.mxu0 %v1470_v32  ;;  %v1471_v42 = vmax.f32 %v1377_v30, %v1443_v35 }
 0x3af   : > { %v1384_v39 = vpop.f32.mrf.mxu1  ;;  %1652 = vmatmul.mubr.f32.gmra.mxu0 %v1469_v34 }
 0x3b0   : > { %v1472_v40 = vmax.f32 %v1379_v33, %v1444_v37  ;;  %v1385_v41 = vadd.f32 %v1384_v39, %v3179_v59  ;;  %v1445_v43 = vmul.f32 0.2, %v1383_v38 }
 0x3b1   : > { %v1388_v44 = vpop.f32.mrf.mxu1 }
 0x3b2   : > { %v1446_v45 = vmul.f32 0.2, %v1385_v41  ;;  %v1389_v46 = vadd.f32 %v1388_v44, %v3176_v58  ;;  %1657 = vmatprep.mubr.f32.mxu0 %v1472_v40  ;;  %v1473_v50 = vmax.f32 %v1383_v38, %v1445_v43 }
 0x3b3   : > { %v1390_v47 = vpop.f32.mrf.mxu1  ;;  %1658 = vmatmul.mubr.f32.gmra.mxu0 %v1471_v42 }
 0x3b4   : > { %v1474_v48 = vmax.f32 %v1385_v41, %v1446_v45  ;;  %v1391_v49 = vadd.f32 %v1390_v47, %v3179_v59  ;;  %v1447_v51 = vmul.f32 0.2, %v1389_v46 }
 0x3b5   : > { %v1394_v52 = vpop.f32.mrf.mxu1 }
 0x3b6   : > { %v1448_v53 = vmul.f32 0.2, %v1391_v49  ;;  %v1395_v54 = vadd.f32 %v1394_v52, %v3176_v58  ;;  %1663 = vmatprep.mubr.f32.mxu0 %v1474_v48  ;;  %v1475_v63 = vmax.f32 %v1389_v46, %v1447_v51  ;;  %v1816_v51 = vld [vmem:[#allocation7 + $0x948] sm:$0xff]  ;;  %v1815_v52 = vld [vmem:[#allocation7 + $0x940] sm:$0xff] }
 0x3b7   : > { %v1396_v55 = vpop.f32.mrf.mxu1  ;;  %1664 = vmatmul.mubr.f32.gmra.mxu0 %v1473_v50  ;;  %1906 = vmatprep.subr.mxu1 %v1816_v51 }
 0x3b8   : > { %v1476_v56 = vmax.f32 %v1391_v49, %v1448_v53  ;;  %v1397_v57 = vadd.f32 %v1396_v55, %v3179_v59  ;;  %v1449_v1 = vmul.f32 0.2, %v1395_v54  ;;  %1907 = vmatpush2.msra.mxu1 %v1815_v52  ;;  %v1813_v53 = vld [vmem:[#allocation7 + $0x930] sm:$0xff]  ;;  %v1810_v55 = vld [vmem:[#allocation7 + $0x918] sm:$0xff] }
 0x3b9   : > { %v1400_v60 = vpop.f32.mrf.mxu1 }
 0x3ba   : > { %v1450_v61 = vmul.f32 0.2, %v1397_v57  ;;  %v1401_v62 = vadd.f32 %v1400_v60, %v3176_v58  ;;  %1669 = vmatprep.mubr.f32.mxu0 %v1476_v56  ;;  %v1477_v3 = vmax.f32 %v1395_v54, %v1449_v1  ;;  %v1812_v54 = vld [vmem:[#allocation7 + $0x928] sm:$0xff]  ;;  %v1809_v56 = vld [vmem:[#allocation7 + $0x910] sm:$0xff] }
 0x3bb   : > { %v1402_v5 = vpop.f32.mrf.mxu1  ;;  %1670 = vmatmul.mubr.f32.gmra.mxu0 %v1475_v63  ;;  %v1807_v63 = vld [vmem:[#allocation7 + $0x900] sm:$0xff] }
 0x3bc   : > { %v1478_v6 = vmax.f32 %v1397_v57, %v1450_v61  ;;  %v1403_v2 = vadd.f32 %v1402_v5, %v3179_v59  ;;  %v1451_v4 = vmul.f32 0.2, %v1401_v62  ;;  %v1808_v57 = vld [vmem:[#allocation7 + $0x908] sm:$0xff]  ;;  %v2087_v61 = vld [vmem:[#allocation10 + $0xf0] sm:$0xff]  ;;  %v2086_v5 = vld [vmem:[#allocation10 + $0xe8] sm:$0xff] }
 0x3bd   : > { %v1406_v13 = vpop.f32.mrf.mxu1  ;;  %v2088_v1 = vld [vmem:[#allocation10 + $0xf8] sm:$0xff] }
 0x3be   : > { %v1452_v0 = vmul.f32 0.2, %v1403_v2  ;;  %v1407_v7 = vadd.f32 %v1406_v13, %v3176_v58  ;;  %1675 = vmatprep.mubr.f32.mxu0 %v1478_v6  ;;  %v1479_v14 = vmax.f32 %v1401_v62, %v1451_v4  ;;  %v2072_v60 = vld [vmem:[#allocation10 + $0x78] sm:$0xff]  ;;  %2419 = vmatprep.subr.mxu0 %v2088_v1  ;;  %v2071_v62 = vld [vmem:[#allocation10 + $0x70] sm:$0xff]  ;;  %v2070_v6 = vld [vmem:[#allocation10 + $0x68] sm:$0xff] }
 0x3bf   : > { %v1408_v8 = vpop.f32.mrf.mxu1  ;;  %1676 = vmatmul.mubr.f32.gmra.mxu0 %v1477_v3  ;;  %v2069_v3 = vld [vmem:[#allocation10 + $0x60] sm:$0xff]  ;;  %v2084_v4 = vld [vmem:[#allocation10 + $0xd8] sm:$0xff] }
 0x3c0   : > { %v1480_v9 = vmax.f32 %v1403_v2, %v1452_v0  ;;  %v1409_v11 = vadd.f32 %v1408_v8, %v3179_v59  ;;  %v1453_v15 = vmul.f32 0.2, %v1407_v7  ;;  %2420 = vmatpush3.msra.mxu0 %v2072_v60  ;;  %v2085_v2 = vld [vmem:[#allocation10 + $0xe0] sm:$0xff]  ;;  %v2068_v13 = vld [vmem:[#allocation10 + $0x58] sm:$0xff]  ;;  %v2083_v0 = vld [vmem:[#allocation10 + $0xd0] sm:$0xff] }
 0x3c1   : > { %v1412_v16 = vpop.f32.mrf.mxu1  ;;  %2421 = vmatprep.subr.mxu0 %v2087_v61  ;;  %v2082_v8 = vld [vmem:[#allocation10 + $0xc8] sm:$0xff] }
 0x3c2   : > { %v1454_v17 = vmul.f32 0.2, %v1409_v11  ;;  %v1413_v18 = vadd.f32 %v1412_v16, %v3176_v58  ;;  %1681 = vmatprep.mubr.f32.mxu0 %v1480_v9  ;;  %v1481_v22 = vmax.f32 %v1407_v7, %v1453_v15  ;;  %2422 = vmatpush3.msra.mxu0 %v2071_v62  ;;  %v2067_v7 = vld [vmem:[#allocation10 + $0x50] sm:$0xff]  ;;  %v2066_v9 = vld [vmem:[#allocation10 + $0x48] sm:$0xff]  ;;  %v2080_v15 = vld [vmem:[#allocation10 + $0xb8] sm:$0xff] }
 0x3c3   : > { %v1414_v19 = vpop.f32.mrf.mxu1  ;;  %1682 = vmatmul.mubr.f32.gmra.mxu0 %v1479_v14  ;;  %2423 = vmatprep.subr.mxu0 %v2086_v5  ;;  %v2065_v14 = vld [vmem:[#allocation10 + $0x40] sm:$0xff]  ;;  %v2064_v16 = vld [vmem:[#allocation10 + $0x38] sm:$0xff] }
 0x3c4   : > { %v1482_v20 = vmax.f32 %v1409_v11, %v1454_v17  ;;  %v1415_v21 = vadd.f32 %v1414_v19, %v3179_v59  ;;  %v1455_v23 = vmul.f32 0.2, %v1413_v18  ;;  %2424 = vmatpush3.msra.mxu0 %v2070_v6  ;;  %v2081_v11 = vld [vmem:[#allocation10 + $0xc0] sm:$0xff]  ;;  %v2079_v17 = vld [vmem:[#allocation10 + $0xb0] sm:$0xff]  ;;  %v2078_v19 = vld [vmem:[#allocation10 + $0xa8] sm:$0xff] }
 0x3c5   : > { %v1418_v24 = vpop.f32.mrf.mxu1  ;;  %2425 = vmatprep.subr.mxu0 %v2085_v2 }
 0x3c6   : > { %v1456_v25 = vmul.f32 0.2, %v1415_v21  ;;  %v1419_v26 = vadd.f32 %v1418_v24, %v3176_v58  ;;  %1687 = vmatprep.mubr.f32.mxu0 %v1482_v20  ;;  %v1483_v30 = vmax.f32 %v1413_v18, %v1455_v23  ;;  %2426 = vmatpush3.msra.mxu0 %v2069_v3  ;;  %v2063_v18 = vld [vmem:[#allocation10 + $0x30] sm:$0xff]  ;;  %v2062_v20 = vld [vmem:[#allocation10 + $0x28] sm:$0xff]  ;;  %v2076_v23 = vld [vmem:[#allocation10 + $0x98] sm:$0xff] }
 0x3c7   : > { %v1420_v27 = vpop.f32.mrf.mxu1  ;;  %1688 = vmatmul.mubr.f32.gmra.mxu0 %v1481_v22  ;;  %2427 = vmatprep.subr.mxu0 %v2084_v4  ;;  %v2061_v22 = vld [vmem:[#allocation10 + $0x20] sm:$0xff]  ;;  %v2060_v24 = vld [vmem:[#allocation10 + $0x18] sm:$0xff] }
 0x3c8   : > { %v1484_v28 = vmax.f32 %v1415_v21, %v1456_v25  ;;  %v1421_v29 = vadd.f32 %v1420_v27, %v3179_v59  ;;  %v1457_v31 = vmul.f32 0.2, %v1419_v26  ;;  %2428 = vmatpush3.msra.mxu0 %v2068_v13  ;;  %v2077_v21 = vld [vmem:[#allocation10 + $0xa0] sm:$0xff]  ;;  %v2075_v25 = vld [vmem:[#allocation10 + $0x90] sm:$0xff] }
 0x3c9   : > { %v1424_v32 = vpop.f32.mrf.mxu1  ;;  %2429 = vmatprep.subr.mxu0 %v2083_v0 }
 0x3ca   : > { %v1458_v33 = vmul.f32 0.2, %v1421_v29  ;;  %v1425_v34 = vadd.f32 %v1424_v32, %v3176_v58  ;;  %1693 = vmatprep.mubr.f32.mxu0 %v1484_v28  ;;  %v1485_v38 = vmax.f32 %v1419_v26, %v1457_v31  ;;  %2430 = vmatpush3.msra.mxu0 %v2067_v7  ;;  %v1557_v26 = vld [vmem:[#allocation8 + $0x6] sm:$0x3] }
 0x3cb   : > { %v1426_v35 = vpop.f32.mrf.mxu1  ;;  %1694 = vmatmul.mubr.f32.gmra.mxu0 %v1483_v30  ;;  %2431 = vmatprep.subr.mxu0 %v2082_v8  ;;  %v3210_v27 = vrot.slane %v1557_v26, %v3069_v10  ;;  %v3213_v28 = vrot.slane %v1557_v26, %v3071_v12 }
 0x3cc   : > { %v1486_v36 = vmax.f32 %v1421_v29, %v1458_v33  ;;  %v1427_v37 = vadd.f32 %v1426_v35, %v3179_v59  ;;  %v1459_v39 = vmul.f32 0.2, %v1425_v34  ;;  %2432 = vmatpush3.msra.mxu0 %v2066_v9 }
 0x3cd   : > { %v1430_v40 = vpop.f32.mrf.mxu1  ;;  %2433 = vmatprep.subr.mxu0 %v2081_v11 }
 0x3ce   : > { %v1460_v41 = vmul.f32 0.2, %v1427_v37  ;;  %v1431_v42 = vadd.f32 %v1430_v40, %v3176_v58  ;;  %1699 = vmatprep.mubr.f32.mxu0 %v1486_v36  ;;  %v1487_v46 = vmax.f32 %v1425_v34, %v1459_v39  ;;  %v1814_v58 = vld [vmem:[#allocation7 + $0x938] sm:$0xff]  ;;  %2434 = vmatpush3.msra.mxu0 %v2065_v14 }
 0x3cf   : > { %v1432_v43 = vpop.f32.mrf.mxu1  ;;  %1700 = vmatmul.mubr.f32.gmra.mxu0 %v1485_v38  ;;  %1908 = vmatprep.subr.mxu1 %v1814_v58 }
 0x3d0   : > { %v1488_v44 = vmax.f32 %v1427_v37, %v1460_v41  ;;  %v1433_v45 = vadd.f32 %v1432_v43, %v3179_v59  ;;  %v1461_v47 = vmul.f32 0.2, %v1431_v42  ;;  %1909 = vmatpush2.msra.mxu1 %v1813_v53  ;;  %v1811_v59 = vld [vmem:[#allocation7 + $0x920] sm:$0xff]  ;;  %2435 = vmatprep.subr.mxu0 %v2080_v15 }
 0x3d1   : > { %1910 = vmatprep.subr.mxu1 %v1812_v54  ;;  %2436 = vmatpush3.msra.mxu0 %v2064_v16 }
 0x3d2   : > { %v1462_v48 = vmul.f32 0.2, %v1433_v45  ;;  %1705 = vmatprep.mubr.f32.mxu0 %v1488_v44  ;;  %v1489_v50 = vmax.f32 %v1431_v42, %v1461_v47  ;;  %1911 = vmatpush2.msra.mxu1 %v1811_v59 }
 0x3d3   : > { %1706 = vmatmul.mubr.f32.gmra.mxu0 %v1487_v46  ;;  %1912 = vmatprep.subr.mxu1 %v1810_v55 }
 0x3d4   : > { %v1490_v49 = vmax.f32 %v1433_v45, %v1462_v48  ;;  %1913 = vmatpush2.msra.mxu1 %v1809_v56  ;;  %2437 = vmatprep.subr.mxu0 %v2079_v17 }
 0x3d5   : > { %1914 = vmatprep.subr.mxu1 %v1808_v57  ;;  %2438 = vmatpush3.msra.mxu0 %v2063_v18 }
 0x3d6   : > { %1711 = vmatprep.mubr.f32.mxu0 %v1490_v49  ;;  %1915 = vmatpush2.msra.mxu1 %v1807_v63 }
 0x3d7   : > { %1712 = vmatmul.mubr.f32.gmra.mxu0 %v1489_v50  ;;  %2439 = vmatprep.subr.mxu0 %v2078_v19 }
 0x3d8   : > { %2440 = vmatpush3.msra.mxu0 %v2062_v20 }
 0x3d9   : > { %2441 = vmatprep.subr.mxu0 %v2077_v21 }
 0x3da   : > { %2442 = vmatpush3.msra.mxu0 %v2061_v22 }
 0x3db   : > { %2443 = vmatprep.subr.mxu0 %v2076_v23 }
 0x3dc   : > { %2444 = vmatpush3.msra.mxu0 %v2060_v24 }
 0x3dd   : > { %2445 = vmatprep.subr.mxu0 %v2075_v25 }
 0x463   : > { %v1635_v29 = vpop.f32.mrf.mxu0 }
 0x464   : > { %v1636_v30 = vadd.f32 %v1635_v29, %v3210_v27 }
 0x465   : > { %v1637_v31 = vpop.f32.mrf.mxu0 }
 0x466   : > { %v1638_v32 = vadd.f32 %v1637_v31, %v3213_v28  ;;  %v1718_v33 = vmul.f32 0.2, %v1636_v30 }
 0x467   : > { %v1641_v34 = vpop.f32.mrf.mxu0 }
 0x468   : > { %v1719_v35 = vmul.f32 0.2, %v1638_v32  ;;  %v1642_v36 = vadd.f32 %v1641_v34, %v3210_v27  ;;  %v1746_v40 = vmax.f32 %v1636_v30, %v1718_v33 }
 0x469   : > { %v1643_v37 = vpop.f32.mrf.mxu0 }
 0x46a   : > { %v1747_v38 = vmax.f32 %v1638_v32, %v1719_v35  ;;  %v1644_v39 = vadd.f32 %v1643_v37, %v3213_v28  ;;  %v1720_v41 = vmul.f32 0.2, %v1642_v36 }
 0x46b   : > { %v1647_v42 = vpop.f32.mrf.mxu0 }
 0x46c   : > { %v1721_v43 = vmul.f32 0.2, %v1644_v39  ;;  %v1648_v44 = vadd.f32 %v1647_v42, %v3210_v27  ;;  %1916 = vmatprep.mubr.f32.mxu1 %v1747_v38  ;;  %v1748_v48 = vmax.f32 %v1642_v36, %v1720_v41 }
 0x46d   : > { %v1649_v45 = vpop.f32.mrf.mxu0  ;;  %1917 = vmatmul.mubr.f32.vlgmr.msra.gmra.mxu1 %v1746_v40 }
 0x46e   : > { %v1749_v46 = vmax.f32 %v1644_v39, %v1721_v43  ;;  %v1650_v47 = vadd.f32 %v1649_v45, %v3213_v28  ;;  %v1722_v49 = vmul.f32 0.2, %v1648_v44 }
 0x46f   : > { %v1653_v50 = vpop.f32.mrf.mxu0 }
 0x470   : > { %v1723_v51 = vmul.f32 0.2, %v1650_v47  ;;  %v1654_v52 = vadd.f32 %v1653_v50, %v3210_v27  ;;  %1922 = vmatprep.mubr.f32.mxu1 %v1749_v46  ;;  %v1750_v59 = vmax.f32 %v1648_v44, %v1722_v49 }
 0x471   : > { %v1655_v58 = vpop.f32.mrf.mxu0  ;;  %1923 = vmatmul.mubr.f32.gmra.mxu1 %v1748_v48 }
 0x472   : > { %v1751_v53 = vmax.f32 %v1650_v47, %v1723_v51  ;;  %v1656_v54 = vadd.f32 %v1655_v58, %v3213_v28  ;;  %v1724_v55 = vmul.f32 0.2, %v1654_v52 }
 0x473   : > { %v1659_v56 = vpop.f32.mrf.mxu0 }
 0x474   : > { %v1725_v57 = vmul.f32 0.2, %v1656_v54  ;;  %v1660_v63 = vadd.f32 %v1659_v56, %v3210_v27  ;;  %1928 = vmatprep.mubr.f32.mxu1 %v1751_v53  ;;  %v1752_v62 = vmax.f32 %v1654_v52, %v1724_v55 }
 0x475   : > { %v1661_v1 = vpop.f32.mrf.mxu0  ;;  %1929 = vmatmul.mubr.f32.gmra.mxu1 %v1750_v59 }
 0x476   : > { %v1753_v60 = vmax.f32 %v1656_v54, %v1725_v57  ;;  %v1662_v61 = vadd.f32 %v1661_v1, %v3213_v28  ;;  %v1726_v5 = vmul.f32 0.2, %v1660_v63 }
 0x477   : > { %v1665_v6 = vpop.f32.mrf.mxu0 }
 0x478   : > { %v1727_v2 = vmul.f32 0.2, %v1662_v61  ;;  %v1666_v3 = vadd.f32 %v1665_v6, %v3210_v27  ;;  %1934 = vmatprep.mubr.f32.mxu1 %v1753_v60  ;;  %v1754_v7 = vmax.f32 %v1660_v63, %v1726_v5 }
 0x479   : > { %v1667_v4 = vpop.f32.mrf.mxu0  ;;  %1935 = vmatmul.mubr.f32.gmra.mxu1 %v1752_v62 }
 0x47a   : > { %v1755_v13 = vmax.f32 %v1662_v61, %v1727_v2  ;;  %v1668_v0 = vadd.f32 %v1667_v4, %v3213_v28  ;;  %v1728_v8 = vmul.f32 0.2, %v1666_v3 }
 0x47b   : > { %v1671_v9 = vpop.f32.mrf.mxu0 }
 0x47c   : > { %v1729_v11 = vmul.f32 0.2, %v1668_v0  ;;  %v1672_v14 = vadd.f32 %v1671_v9, %v3210_v27  ;;  %1940 = vmatprep.mubr.f32.mxu1 %v1755_v13  ;;  %v1756_v18 = vmax.f32 %v1666_v3, %v1728_v8 }
 0x47d   : > { %v1673_v15 = vpop.f32.mrf.mxu0  ;;  %1941 = vmatmul.mubr.f32.gmra.mxu1 %v1754_v7 }
 0x47e   : > { %v1757_v16 = vmax.f32 %v1668_v0, %v1729_v11  ;;  %v1674_v17 = vadd.f32 %v1673_v15, %v3213_v28  ;;  %v1730_v19 = vmul.f32 0.2, %v1672_v14 }
 0x47f   : > { %v1677_v20 = vpop.f32.mrf.mxu0 }
 0x480   : > { %v1731_v21 = vmul.f32 0.2, %v1674_v17  ;;  %v1678_v22 = vadd.f32 %v1677_v20, %v3210_v27  ;;  %1946 = vmatprep.mubr.f32.mxu1 %v1757_v16  ;;  %v1758_v26 = vmax.f32 %v1672_v14, %v1730_v19  ;;  %v2059_v19 = vld [vmem:[#allocation10 + $0x10] sm:$0xff]  ;;  %v2074_v20 = vld [vmem:[#allocation10 + $0x88] sm:$0xff] }
 0x481   : > { %v1679_v23 = vpop.f32.mrf.mxu0  ;;  %1947 = vmatmul.mubr.f32.gmra.mxu1 %v1756_v18  ;;  %2446 = vmatpush3.msra.mxu0 %v2059_v19 }
 0x482   : > { %v1759_v24 = vmax.f32 %v1674_v17, %v1731_v21  ;;  %v1680_v25 = vadd.f32 %v1679_v23, %v3213_v28  ;;  %v1732_v29 = vmul.f32 0.2, %v1678_v22  ;;  %2447 = vmatprep.subr.mxu0 %v2074_v20  ;;  %v2073_v21 = vld [vmem:[#allocation10 + $0x80] sm:$0xff] }
 0x483   : > { %v1683_v30 = vpop.f32.mrf.mxu0 }
 0x484   : > { %v1733_v31 = vmul.f32 0.2, %v1680_v25  ;;  %v1684_v32 = vadd.f32 %v1683_v30, %v3210_v27  ;;  %1952 = vmatprep.mubr.f32.mxu1 %v1759_v24  ;;  %v1760_v36 = vmax.f32 %v1678_v22, %v1732_v29  ;;  %v2057_v22 = vld [vmem:[#allocation10] sm:$0xff] }
 0x485   : > { %v1685_v33 = vpop.f32.mrf.mxu0  ;;  %1953 = vmatmul.mubr.f32.gmra.mxu1 %v1758_v26 }
 0x486   : > { %v1761_v34 = vmax.f32 %v1680_v25, %v1733_v31  ;;  %v1686_v35 = vadd.f32 %v1685_v33, %v3213_v28  ;;  %v1734_v37 = vmul.f32 0.2, %v1684_v32 }
 0x487   : > { %v1689_v38 = vpop.f32.mrf.mxu0 }
 0x488   : > { %v1735_v39 = vmul.f32 0.2, %v1686_v35  ;;  %v1690_v40 = vadd.f32 %v1689_v38, %v3210_v27  ;;  %1958 = vmatprep.mubr.f32.mxu1 %v1761_v34  ;;  %v1762_v44 = vmax.f32 %v1684_v32, %v1734_v37 }
 0x489   : > { %v1691_v41 = vpop.f32.mrf.mxu0  ;;  %1959 = vmatmul.mubr.f32.gmra.mxu1 %v1760_v36 }
 0x48a   : > { %v1763_v42 = vmax.f32 %v1686_v35, %v1735_v39  ;;  %v1692_v43 = vadd.f32 %v1691_v41, %v3213_v28  ;;  %v1736_v45 = vmul.f32 0.2, %v1690_v40 }
 0x48b   : > { %v1695_v46 = vpop.f32.mrf.mxu0 }
 0x48c   : > { %v1737_v47 = vmul.f32 0.2, %v1692_v43  ;;  %v1696_v48 = vadd.f32 %v1695_v46, %v3210_v27  ;;  %1964 = vmatprep.mubr.f32.mxu1 %v1763_v42  ;;  %v1764_v52 = vmax.f32 %v1690_v40, %v1736_v45 }
 0x48d   : > { %v1697_v49 = vpop.f32.mrf.mxu0  ;;  %1965 = vmatmul.mubr.f32.gmra.mxu1 %v1762_v44 }
 0x48e   : > { %v1765_v50 = vmax.f32 %v1692_v43, %v1737_v47  ;;  %v1698_v51 = vadd.f32 %v1697_v49, %v3213_v28  ;;  %v1738_v58 = vmul.f32 0.2, %v1696_v48 }
 0x48f   : > { %v1701_v53 = vpop.f32.mrf.mxu0 }
 0x490   : > { %v1739_v54 = vmul.f32 0.2, %v1698_v51  ;;  %v1702_v59 = vadd.f32 %v1701_v53, %v3210_v27  ;;  %1970 = vmatprep.mubr.f32.mxu1 %v1765_v50  ;;  %v1766_v63 = vmax.f32 %v1696_v48, %v1738_v58 }
 0x491   : > { %v1703_v55 = vpop.f32.mrf.mxu0  ;;  %1971 = vmatmul.mubr.f32.gmra.mxu1 %v1764_v52 }
 0x492   : > { %v1767_v56 = vmax.f32 %v1698_v51, %v1739_v54  ;;  %v1704_v57 = vadd.f32 %v1703_v55, %v3213_v28  ;;  %v1740_v1 = vmul.f32 0.2, %v1702_v59 }
 0x493   : > { %v1707_v60 = vpop.f32.mrf.mxu0 }
 0x494   : > { %v1741_v61 = vmul.f32 0.2, %v1704_v57  ;;  %v1708_v62 = vadd.f32 %v1707_v60, %v3210_v27  ;;  %1976 = vmatprep.mubr.f32.mxu1 %v1767_v56  ;;  %v1768_v3 = vmax.f32 %v1702_v59, %v1740_v1 }
 0x495   : > { %v1709_v5 = vpop.f32.mrf.mxu0  ;;  %1977 = vmatmul.mubr.f32.gmra.mxu1 %v1766_v63 }
 0x496   : > { %v1769_v6 = vmax.f32 %v1704_v57, %v1741_v61  ;;  %v1710_v2 = vadd.f32 %v1709_v5, %v3213_v28  ;;  %v1742_v4 = vmul.f32 0.2, %v1708_v62 }
 0x497   : > { %v1713_v13 = vpop.f32.mrf.mxu0 }
 0x498   : > { %v1743_v0 = vmul.f32 0.2, %v1710_v2  ;;  %v1714_v7 = vadd.f32 %v1713_v13, %v3210_v27  ;;  %1982 = vmatprep.mubr.f32.mxu1 %v1769_v6  ;;  %v1770_v14 = vmax.f32 %v1708_v62, %v1742_v4  ;;  %v2058_v27 = vld [vmem:[#allocation10 + $0x8] sm:$0xff] }
 0x499   : > { %v1715_v8 = vpop.f32.mrf.mxu0  ;;  %1983 = vmatmul.mubr.f32.gmra.mxu1 %v1768_v3  ;;  %2448 = vmatpush3.msra.mxu0 %v2058_v27 }
 0x49a   : > { %v1771_v9 = vmax.f32 %v1710_v2, %v1743_v0  ;;  %v1716_v11 = vadd.f32 %v1715_v8, %v3213_v28  ;;  %v1744_v15 = vmul.f32 0.2, %v1714_v7  ;;  %2449 = vmatprep.subr.mxu0 %v2073_v21  ;;  %v1840_v28 = vld [vmem:[#allocation8 + $0x8] sm:$0x3] }
 0x49b   : > { %2450 = vmatpush3.msra.mxu0 %v2057_v22  ;;  %v3244_v23 = vrot.slane %v1840_v28, %v3069_v10  ;;  %v3247_v24 = vrot.slane %v1840_v28, %v3071_v12 }
 0x49c   : > { %v1745_v16 = vmul.f32 0.2, %v1716_v11  ;;  %1988 = vmatprep.mubr.f32.mxu1 %v1771_v9  ;;  %v1772_v18 = vmax.f32 %v1714_v7, %v1744_v15 }
 0x49d   : > { %1989 = vmatmul.mubr.f32.gmra.mxu1 %v1770_v14 }
 0x49e   : > { %v1773_v17 = vmax.f32 %v1716_v11, %v1745_v16 }
 0x4a0   : > { %1994 = vmatprep.mubr.f32.mxu1 %v1773_v17 }
 0x4a1   : > { %1995 = vmatmul.mubr.f32.gmra.mxu1 %v1772_v18 }
 0x52d   : > { %v1918_v25 = vpop.f32.mrf.mxu1 }
 0x52e   : > { %v1919_v26 = vadd.f32 %v1918_v25, %v3244_v23 }
 0x52f   : > { %v1920_v29 = vpop.f32.mrf.mxu1 }
 0x530   : > { %v1921_v30 = vadd.f32 %v1920_v29, %v3247_v24  ;;  %v2001_v31 = vmul.f32 0.2, %v1919_v26 }
 0x531   : > { %v1924_v32 = vpop.f32.mrf.mxu1 }
 0x532   : > { %v2002_v33 = vmul.f32 0.2, %v1921_v30  ;;  %v1925_v34 = vadd.f32 %v1924_v32, %v3244_v23  ;;  %v2029_v10 = vmax.f32 %v1919_v26, %v2001_v31 }
 0x533   : > { %v1926_v35 = vpop.f32.mrf.mxu1 }
 0x534   : > { %v2030_v36 = vmax.f32 %v1921_v30, %v2002_v33  ;;  %v1927_v37 = vadd.f32 %v1926_v35, %v3247_v24  ;;  %v2003_v38 = vmul.f32 0.2, %v1925_v34 }
 0x535   : > { %v1930_v39 = vpop.f32.mrf.mxu1 }
 0x536   : > { %v2004_v12 = vmul.f32 0.2, %v1927_v37  ;;  %v1931_v40 = vadd.f32 %v1930_v39, %v3244_v23  ;;  %2160 = vmatprep.mubr.f32.mxu0 %v2030_v36  ;;  %v2031_v44 = vmax.f32 %v1925_v34, %v2003_v38 }
 0x537   : > { %v1932_v41 = vpop.f32.mrf.mxu1  ;;  %2161 = vmatmul.mubr.f32.vlgmr.msra.gmra.mxu0 %v2029_v10 }
 0x538   : > { %v2032_v42 = vmax.f32 %v1927_v37, %v2004_v12  ;;  %v1933_v43 = vadd.f32 %v1932_v41, %v3247_v24  ;;  %v2005_v45 = vmul.f32 0.2, %v1931_v40 }
 0x539   : > { %v1936_v46 = vpop.f32.mrf.mxu1 }
 0x53a   : > { %v2006_v47 = vmul.f32 0.2, %v1933_v43  ;;  %v1937_v48 = vadd.f32 %v1936_v46, %v3244_v23  ;;  %2165 = vmatprep.mubr.f32.mxu0 %v2032_v42  ;;  %v2033_v52 = vmax.f32 %v1931_v40, %v2005_v45 }
 0x53b   : > { %v1938_v49 = vpop.f32.mrf.mxu1  ;;  %2166 = vmatmul.mubr.f32.gmra.mxu0 %v2031_v44 }
 0x53c   : > { %v2034_v50 = vmax.f32 %v1933_v43, %v2006_v47  ;;  %v1939_v51 = vadd.f32 %v1938_v49, %v3247_v24  ;;  %v2007_v58 = vmul.f32 0.2, %v1937_v48 }
 0x53d   : > { %v1942_v53 = vpop.f32.mrf.mxu1 }
 0x53e   : > { %v2008_v54 = vmul.f32 0.2, %v1939_v51  ;;  %v1943_v59 = vadd.f32 %v1942_v53, %v3244_v23  ;;  %2170 = vmatprep.mubr.f32.mxu0 %v2034_v50  ;;  %v2035_v63 = vmax.f32 %v1937_v48, %v2007_v58 }
 0x53f   : > { %v1944_v55 = vpop.f32.mrf.mxu1  ;;  %2171 = vmatmul.mubr.f32.gmra.mxu0 %v2033_v52 }
 0x540   : > { %v2036_v56 = vmax.f32 %v1939_v51, %v2008_v54  ;;  %v1945_v57 = vadd.f32 %v1944_v55, %v3247_v24  ;;  %v2009_v1 = vmul.f32 0.2, %v1943_v59 }
 0x541   : > { %v1948_v60 = vpop.f32.mrf.mxu1 }
 0x542   : > { %v2010_v61 = vmul.f32 0.2, %v1945_v57  ;;  %v1949_v62 = vadd.f32 %v1948_v60, %v3244_v23  ;;  %2175 = vmatprep.mubr.f32.mxu0 %v2036_v56  ;;  %v2037_v3 = vmax.f32 %v1943_v59, %v2009_v1 }
 0x543   : > { %v1950_v5 = vpop.f32.mrf.mxu1  ;;  %2176 = vmatmul.mubr.f32.gmra.mxu0 %v2035_v63 }
 0x544   : > { %v2038_v6 = vmax.f32 %v1945_v57, %v2010_v61  ;;  %v1951_v2 = vadd.f32 %v1950_v5, %v3247_v24  ;;  %v2011_v4 = vmul.f32 0.2, %v1949_v62 }
 0x545   : > { %v1954_v13 = vpop.f32.mrf.mxu1 }
 0x546   : > { %v2012_v0 = vmul.f32 0.2, %v1951_v2  ;;  %v1955_v7 = vadd.f32 %v1954_v13, %v3244_v23  ;;  %2180 = vmatprep.mubr.f32.mxu0 %v2038_v6  ;;  %v2039_v14 = vmax.f32 %v1949_v62, %v2011_v4 }
 0x547   : > { %v1956_v8 = vpop.f32.mrf.mxu1  ;;  %2181 = vmatmul.mubr.f32.gmra.mxu0 %v2037_v3 }
 0x548   : > { %v2040_v9 = vmax.f32 %v1951_v2, %v2012_v0  ;;  %v1957_v11 = vadd.f32 %v1956_v8, %v3247_v24  ;;  %v2013_v15 = vmul.f32 0.2, %v1955_v7 }
 0x549   : > { %v1960_v16 = vpop.f32.mrf.mxu1 }
 0x54a   : > { %v2014_v17 = vmul.f32 0.2, %v1957_v11  ;;  %v1961_v18 = vadd.f32 %v1960_v16, %v3244_v23  ;;  %2185 = vmatprep.mubr.f32.mxu0 %v2040_v9  ;;  %v2041_v21 = vmax.f32 %v1955_v7, %v2013_v15 }
 0x54b   : > { %v1962_v19 = vpop.f32.mrf.mxu1  ;;  %2186 = vmatmul.mubr.f32.gmra.mxu0 %v2039_v14 }
 0x54c   : > { %v2042_v20 = vmax.f32 %v1957_v11, %v2014_v17  ;;  %v1963_v27 = vadd.f32 %v1962_v19, %v3247_v24  ;;  %v2015_v22 = vmul.f32 0.2, %v1961_v18 }
 0x54d   : > { %v1966_v28 = vpop.f32.mrf.mxu1 }
 0x54e   : > { %v2016_v25 = vmul.f32 0.2, %v1963_v27  ;;  %v1967_v26 = vadd.f32 %v1966_v28, %v3244_v23  ;;  %2190 = vmatprep.mubr.f32.mxu0 %v2042_v20  ;;  %v2043_v32 = vmax.f32 %v1961_v18, %v2015_v22 }
 0x54f   : > { %v1968_v29 = vpop.f32.mrf.mxu1  ;;  %2191 = vmatmul.mubr.f32.gmra.mxu0 %v2041_v21 }
 0x550   : > { %v2044_v30 = vmax.f32 %v1963_v27, %v2016_v25  ;;  %v1969_v31 = vadd.f32 %v1968_v29, %v3247_v24  ;;  %v2017_v33 = vmul.f32 0.2, %v1967_v26 }
 0x551   : > { %v1972_v34 = vpop.f32.mrf.mxu1 }
 0x552   : > { %v2018_v35 = vmul.f32 0.2, %v1969_v31  ;;  %v1973_v36 = vadd.f32 %v1972_v34, %v3244_v23  ;;  %2195 = vmatprep.mubr.f32.mxu0 %v2044_v30  ;;  %v2045_v39 = vmax.f32 %v1967_v26, %v2017_v33 }
 0x553   : > { %v1974_v37 = vpop.f32.mrf.mxu1  ;;  %2196 = vmatmul.mubr.f32.gmra.mxu0 %v2043_v32 }
 0x554   : > { %v2046_v10 = vmax.f32 %v1969_v31, %v2018_v35  ;;  %v1975_v38 = vadd.f32 %v1974_v37, %v3247_v24  ;;  %v2019_v12 = vmul.f32 0.2, %v1973_v36 }
 0x555   : > { %v1978_v40 = vpop.f32.mrf.mxu1 }
 0x556   : > { %v2020_v41 = vmul.f32 0.2, %v1975_v38  ;;  %v1979_v42 = vadd.f32 %v1978_v40, %v3244_v23  ;;  %2200 = vmatprep.mubr.f32.mxu0 %v2046_v10  ;;  %v2047_v46 = vmax.f32 %v1973_v36, %v2019_v12 }
 0x557   : > { %v1980_v43 = vpop.f32.mrf.mxu1  ;;  %2201 = vmatmul.mubr.f32.gmra.mxu0 %v2045_v39 }
 0x558   : > { %v2048_v44 = vmax.f32 %v1975_v38, %v2020_v41  ;;  %v1981_v45 = vadd.f32 %v1980_v43, %v3247_v24  ;;  %v2021_v47 = vmul.f32 0.2, %v1979_v42 }
 0x559   : > { %v1984_v48 = vpop.f32.mrf.mxu1 }
 0x55a   : > { %v2022_v49 = vmul.f32 0.2, %v1981_v45  ;;  %v1985_v50 = vadd.f32 %v1984_v48, %v3244_v23  ;;  %2205 = vmatprep.mubr.f32.mxu0 %v2048_v44  ;;  %v2049_v53 = vmax.f32 %v1979_v42, %v2021_v47 }
 0x55b   : > { %v1986_v51 = vpop.f32.mrf.mxu1  ;;  %2206 = vmatmul.mubr.f32.gmra.mxu0 %v2047_v46 }
 0x55c   : > { %v2050_v52 = vmax.f32 %v1981_v45, %v2022_v49  ;;  %v1987_v58 = vadd.f32 %v1986_v51, %v3247_v24  ;;  %v2023_v54 = vmul.f32 0.2, %v1985_v50 }
 0x55d   : > { %v1990_v59 = vpop.f32.mrf.mxu1 }
 0x55e   : > { %v2024_v55 = vmul.f32 0.2, %v1987_v58  ;;  %v1991_v56 = vadd.f32 %v1990_v59, %v3244_v23  ;;  %2210 = vmatprep.mubr.f32.mxu0 %v2050_v52  ;;  %v2051_v60 = vmax.f32 %v1985_v50, %v2023_v54 }
 0x55f   : > { %v1992_v57 = vpop.f32.mrf.mxu1  ;;  %2211 = vmatmul.mubr.f32.gmra.mxu0 %v2049_v53 }
 0x560   : > { %v2052_v63 = vmax.f32 %v1987_v58, %v2024_v55  ;;  %v1993_v1 = vadd.f32 %v1992_v57, %v3247_v24  ;;  %v2025_v61 = vmul.f32 0.2, %v1991_v56 }
 0x561   : > { %v1996_v62 = vpop.f32.mrf.mxu1 }
 0x562   : > { %v2026_v5 = vmul.f32 0.2, %v1993_v1  ;;  %v1997_v6 = vadd.f32 %v1996_v62, %v3244_v23  ;;  %2215 = vmatprep.mubr.f32.mxu0 %v2052_v63  ;;  %v2053_v13 = vmax.f32 %v1991_v56, %v2025_v61  ;;  %v3280_v23 = vld [vmem:[#allocation11] ss:$0 sm:$0xff] }
 0x563   : > { %v1998_v2 = vpop.f32.mrf.mxu1  ;;  %2216 = vmatmul.mubr.f32.gmra.mxu0 %v2051_v60 }
 0x564   : > { %v2054_v3 = vmax.f32 %v1993_v1, %v2026_v5  ;;  %v1999_v4 = vadd.f32 %v1998_v2, %v3247_v24  ;;  %v2027_v0 = vmul.f32 0.2, %v1997_v6 }
 0x566   : > { %v2028_v7 = vmul.f32 0.2, %v1999_v4  ;;  %2220 = vmatprep.mubr.f32.mxu0 %v2054_v3  ;;  %v2055_v9 = vmax.f32 %v1997_v6, %v2027_v0 }
 0x567   : > { %2221 = vmatmul.mubr.f32.gmra.mxu0 %v2053_v13 }
 0x568   : > { %v2056_v8 = vmax.f32 %v1999_v4, %v2028_v7 }
 0x56a   : > { %2225 = vmatprep.mubr.f32.mxu0 %v2056_v8 }
 0x56b   : > { %2226 = vmatmul.mubr.f32.gmra.mxu0 %v2055_v9 }
 0x5f7   : > { %v2451_v11 = vpop.f32.mrf.mxu0 }
 0x5f9   : > { %v2452_v14 = vpop.f32.mrf.mxu0 }
 0x5fa   : > { %v2453_v15 = vadd.f32 %v2452_v14, %v2451_v11 }
 0x5fb   : > { %v2454_v16 = vpop.f32.mrf.mxu0 }
 0x5fc   : > { %v2163_v24 = vadd.f32 %v2453_v15, %v3280_v23 }
 0x5fd   : > { %v2455_v17 = vpop.f32.mrf.mxu0 }
 0x5fe   : > { %2231 = vst [vmem:[%s3283_s17] sm:$0xff] %v2163_v24  ;;  %v2456_v18 = vadd.f32 %v2455_v17, %v2454_v16 }
 0x5ff   : > { %v2457_v19 = vpop.f32.mrf.mxu0 }
 0x600   : > { %v2168_v20 = vadd.f32 %v2456_v18, %v3280_v23 }
 0x601   : > { %v2458_v27 = vpop.f32.mrf.mxu0 }
 0x602   : > { %2232 = vst [vmem:[%s3283_s17 + $0x8] sm:$0xff] %v2168_v20  ;;  %v2459_v21 = vadd.f32 %v2458_v27, %v2457_v19 }
 0x603   : > { %v2460_v22 = vpop.f32.mrf.mxu0 }
 0x604   : > { %v2173_v28 = vadd.f32 %v2459_v21, %v3280_v23 }
 0x605   : > { %v2461_v25 = vpop.f32.mrf.mxu0 }
 0x606   : > { %2233 = vst [vmem:[%s3283_s17 + $0x10] sm:$0xff] %v2173_v28  ;;  %v2462_v26 = vadd.f32 %v2461_v25, %v2460_v22 }
 0x607   : > { %v2463_v29 = vpop.f32.mrf.mxu0 }
 0x608   : > { %v2178_v30 = vadd.f32 %v2462_v26, %v3280_v23 }
 0x609   : > { %v2464_v31 = vpop.f32.mrf.mxu0 }
 0x60a   : > { %2234 = vst [vmem:[%s3283_s17 + $0x18] sm:$0xff] %v2178_v30  ;;  %v2465_v32 = vadd.f32 %v2464_v31, %v2463_v29 }
 0x60b   : > { %v2466_v33 = vpop.f32.mrf.mxu0 }
 0x60c   : > { %v2183_v34 = vadd.f32 %v2465_v32, %v3280_v23 }
 0x60d   : > { %v2467_v35 = vpop.f32.mrf.mxu0 }
 0x60e   : > { %2235 = vst [vmem:[%s3283_s17 + $0x20] sm:$0xff] %v2183_v34  ;;  %v2468_v36 = vadd.f32 %v2467_v35, %v2466_v33 }
 0x60f   : > { %v2469_v37 = vpop.f32.mrf.mxu0 }
 0x610   : > { %v2188_v10 = vadd.f32 %v2468_v36, %v3280_v23 }
 0x611   : > { %v2470_v38 = vpop.f32.mrf.mxu0 }
 0x612   : > { %2236 = vst [vmem:[%s3283_s17 + $0x28] sm:$0xff] %v2188_v10  ;;  %v2471_v39 = vadd.f32 %v2470_v38, %v2469_v37 }
 0x613   : > { %v2472_v12 = vpop.f32.mrf.mxu0 }
 0x614   : > { %v2193_v40 = vadd.f32 %v2471_v39, %v3280_v23 }
 0x615   : > { %v2473_v41 = vpop.f32.mrf.mxu0 }
 0x616   : > { %2237 = vst [vmem:[%s3283_s17 + $0x30] sm:$0xff] %v2193_v40  ;;  %v2474_v42 = vadd.f32 %v2473_v41, %v2472_v12 }
 0x617   : > { %v2475_v43 = vpop.f32.mrf.mxu0 }
 0x618   : > { %v2198_v44 = vadd.f32 %v2474_v42, %v3280_v23 }
 0x619   : > { %v2476_v45 = vpop.f32.mrf.mxu0 }
 0x61a   : > { %2238 = vst [vmem:[%s3283_s17 + $0x38] sm:$0xff] %v2198_v44  ;;  %v2477_v46 = vadd.f32 %v2476_v45, %v2475_v43 }
 0x61b   : > { %v2478_v47 = vpop.f32.mrf.mxu0 }
 0x61c   : > { %v2203_v48 = vadd.f32 %v2477_v46, %v3280_v23 }
 0x61d   : > { %v2479_v49 = vpop.f32.mrf.mxu0 }
 0x61e   : > { %2239 = vst [vmem:[%s3283_s17 + $0x40] sm:$0xff] %v2203_v48  ;;  %v2480_v50 = vadd.f32 %v2479_v49, %v2478_v47 }
 0x61f   : > { %v2481_v51 = vpop.f32.mrf.mxu0 }
 0x620   : > { %v2208_v52 = vadd.f32 %v2480_v50, %v3280_v23 }
 0x621   : > { %v2482_v58 = vpop.f32.mrf.mxu0 }
 0x622   : > { %2240 = vst [vmem:[%s3283_s17 + $0x48] sm:$0xff] %v2208_v52  ;;  %v2483_v53 = vadd.f32 %v2482_v58, %v2481_v51 }
 0x623   : > { %v2484_v54 = vpop.f32.mrf.mxu0 }
 0x624   : > { %v2213_v59 = vadd.f32 %v2483_v53, %v3280_v23 }
 0x625   : > { %v2485_v55 = vpop.f32.mrf.mxu0 }
 0x626   : > { %2241 = vst [vmem:[%s3283_s17 + $0x50] sm:$0xff] %v2213_v59  ;;  %v2486_v56 = vadd.f32 %v2485_v55, %v2484_v54 }
 0x627   : > { %v2487_v57 = vpop.f32.mrf.mxu0 }
 0x628   : > { %v2218_v63 = vadd.f32 %v2486_v56, %v3280_v23 }
 0x629   : > { %v2488_v1 = vpop.f32.mrf.mxu0 }
 0x62a   : > { %2242 = vst [vmem:[%s3283_s17 + $0x58] sm:$0xff] %v2218_v63  ;;  %v2489_v60 = vadd.f32 %v2488_v1, %v2487_v57 }
 0x62b   : > { %v2490_v61 = vpop.f32.mrf.mxu0 }
 0x62c   : > { %v2223_v62 = vadd.f32 %v2489_v60, %v3280_v23 }
 0x62d   : > { %v2491_v5 = vpop.f32.mrf.mxu0 }
 0x62e   : > { %2243 = vst [vmem:[%s3283_s17 + $0x60] sm:$0xff] %v2223_v62  ;;  %v2492_v6 = vadd.f32 %v2491_v5, %v2490_v61 }
 0x630   : > { %v2228_v2 = vadd.f32 %v2492_v6, %v3280_v23 }
 0x632   : > { %2244 = vst [vmem:[%s3283_s17 + $0x68] sm:$0xff] %v2228_v2 }
 0x633   : > { %2773 = shalt.err (!%p2770_p6)
}
 0x634   : > { %s2774_s15 = scalar_lea.hbm %s3315_s19, 1792  ;;  %s2778_s8 = scalar_lea.hbm %s3370_s7, 3584 }
 0x635   : > { %p2775_p10 = scmp.ne.s32.totalorder %s3315_s19, %s2774_s15  ;;  %p2779_p11 = scmp.lt.s32.totalorder %s3315_s19, %s3370_s7 }
 0x636   : > { %p2780_p0 = scmp.lt.s32.totalorder %s2778_s8, %s2774_s15 }
 0x637   : > { %p2776_p8 = pnand %p2775_p10, %p3388_p3 }
 0x638   : > { %p2781_p1 = por %p2780_p0, %p2779_p11 }
 0x639   : > { %p2777_p12 = pneg %p2776_p8 }
 0x63b   : > { %p2782_p2 = pnand %p2781_p1, %p2777_p12 }
 0x63d   : > { %2785 = shalt.err (!%p2782_p2)
}
 0x63e   : > { %s2852_s16 = smov 128   ;;  %s2853_s20 = smov 8  }
 0x63f   : > { %2518 = dma.vmem_to_hbm [thread:$0]  (%p3388_p3), %s3317_s14, 1792, %s3315_s19, %s3323_s28, %s2852_s16, %s2852_s16, %s2853_s20  }
 0x640 PF: > { %p2555_p9 = scmp.ge.s32.totalorder %s2836_s27, 2  ;;  %s2274_s22 = sand.u32 1, %s2824_s24  }
 0x641   : > { %p3389_p4 = scmp.ne.s32.totalorder %s3375_s12, 0  ;;  %s2275_s13 = scalar_lea.sflag [#allocation4], %s2274_s22 }
 0x643   : > { %p2540_p7 = pnand %p2555_p9, %p3389_p4 }
 0x645   : > { %p2541_p5 = pneg %p2540_p7 }
 0x647   : > { %2819 = dma.done.wait (%p2541_p5), %s2275_s13, 1792  }
 0x648   : > { %2821 = vsyncadd (%p2541_p5), %s2275_s13, 4294965504  ;;  %p21_p13 = scmp.ge.s32.totalorder %s2919_s30, 4   ;;  %s3390_s24 = smov %s2828_s25 }
 0x649   : > { %s3391_s25 = smov %s2832_s26  ;;  %s3392_s26 = smov %s2930_s10 }
 0x64a   : > { %s3393_s27 = smov %s2919_s30  ;;  %23 = sbr.rel (!%p21_p13) target bundleno = 7 (0x7), region = 116 }
 0x64f   :  { %2280 = vsyncpa [#allocation3], 1 }
 0x650   :  { %2282 = vsyncpa [#allocation3 + $0x1], 1 }
 0x651   :  { %2283 = vsyncpa [#allocation6], 1 }
 0x652   :  { %2284 = vsyncpa [#allocation9], 1 }
 0x653   :  { %2285 = vsyncpa [#allocation12], 1 }
 0x654   :  { %2286 = vsyncpa [#allocation4], 1 }
 0x655   :  { %2288 = vsyncpa [#allocation4 + $0x1], 1 }

</bundles_post_ra>
